<compile_context>
chip_gen: v5e
topology: v5e:2x2
jax: 0.10.0
libtpu: 0.0.40
codegen_flags: <defaults>
</compile_context>

<pallas_src>
import functools

import numpy as np
import jax
import jax.numpy as jnp
from jax.experimental import pallas as pl
from jax.experimental.pallas import tpu as pltpu


# ----------------------------- operator builders -----------------------------
def avgpool_matrix(size, k):
    out = size // k
    P = np.zeros((out, size), np.float64)
    for i in range(out):
        P[i, i * k:(i + 1) * k] = 1.0 / k
    return P


def upsample_matrix(out_size, in_size):
    # PyTorch bilinear, align_corners=False
    scale = in_size / out_size
    U = np.zeros((out_size, in_size), np.float64)
    for i in range(out_size):
        src = max((i + 0.5) * scale - 0.5, 0.0)
        i0 = min(int(np.floor(src)), in_size - 1)
        i1 = min(i0 + 1, in_size - 1)
        lam = src - i0
        U[i, i0] += 1.0 - lam
        U[i, i1] += lam
    return U


def boundary_masks(H, W):
    """masks[k, h*W+w] == 1 where 3x3 tap k reads an in-bounds pixel."""
    m = np.zeros((9, H, W), np.float32)
    for k in range(9):
        dh, dw = k // 3 - 1, k % 3 - 1
        m[k, max(0, -dh):H - max(0, dh), max(0, -dw):W - max(0, dw)] = 1.0
    return m.reshape(9, H * W)


# ------------------------------- Pallas kernel --------------------------------
def _cross_res_kernel(x_ref, s2t_ref, s4t_ref, wsum_ref, wd2_ref, wd4_ref,
                      mask_ref, bnb_ref, w1_ref, b1_ref, o_ref,
                      *, width, C, Bt):
    f32 = jnp.float32
    hw = x_ref.shape[1]

    x = x_ref[...]                                   # (rows, HW) f32
    x_lp = x.astype(s2t_ref.dtype)                   # bf16 copy for the MXU

    # bilinear(up(avgpool_k(x))) as right-applied spatial operators (contract HW
    # on the whole batch tile: the FLOP-dominant matmuls get M = Bt*C rows).
    # TODO(synk): for large H*W apply Ah/Aw separably instead of the dense
    #             HW x HW Kronecker operator.
    up2 = jnp.dot(x_lp, s2t_ref[...], preferred_element_type=f32)
    up4 = jnp.dot(x_lp, s4t_ref[...], preferred_element_type=f32)
    up2_lp = up2.astype(x_lp.dtype)
    up4_lp = up4.astype(x_lp.dtype)

    # Hoist the small invariant operands once per grid step.
    wsum = wsum_ref[...]                             # (9C, C) bf16 (BN scale folded)
    wd2 = wd2_ref[...]                               # (9C, C) bf16
    wd4 = wd4_ref[...]                               # (9C, C) bf16
    masks = mask_ref[...]                            # (9, HW) f32
    bnb = bnb_ref[...]                               # (C, 1)  f32
    w1 = w1_ref[...]                                 # (C, C)  bf16 (shared, no kron(I,.))
    b1 = b1_ref[...]                                 # (C, 1)  f32

    # Channel mixing with the *shared* (9C, C) / (C, C) weights, looping over
    # the batch blocks of the tile (no block-diagonal weights, no concat,
    # no d2/d4 subtraction passes -- all folded into the three matmuls).
    for b in range(Bt):
        r0, r1 = b * C, (b + 1) * C
        mix = (jnp.dot(wsum, x_lp[r0:r1, :], preferred_element_type=f32)
               - jnp.dot(wd2, up2_lp[r0:r1, :], preferred_element_type=f32)
               - jnp.dot(wd4, up4_lp[r0:r1, :], preferred_element_type=f32))  # (9C, HW)

        # Shift-after-mix 3x3: start from the centre tap (no roll, all-ones
        # mask), then 8 lane rotations (XLU) + boundary masks.
        y = mix[4 * C:5 * C, :]
        for k in (0, 1, 2, 3, 5, 6, 7, 8):
            dh, dw = k // 3 - 1, k % 3 - 1
            off = dh * width + dw
            blk = pltpu.roll(mix[k * C:(k + 1) * C, :], (-off) % hw, 1)
            y = y + blk * masks[k:k + 1, :]

        # Conv bias + BatchNorm(eval) bias (scale already folded into weights),
        # then ReLU.
        y = jnp.maximum(y + bnb, 0.0)

        # 1x1 conv (shared weight) + sigmoid as a single EUP tanh push.
        z = jnp.dot(w1, y.astype(w1.dtype), preferred_element_type=f32) + b1
        att = 0.5 * (jnp.tanh(0.5 * z) + 1.0)

        o_ref[r0:r1, :] = (x[r0:r1, :] * att).astype(o_ref.dtype)


# ------------------------------ call construction ------------------------------
def choose_batch_tile(B, C, *, target_rows=256, min_grid_steps=2):
    """Largest tile with (Bt*C) % 8 == 0, preferring >=2 grid steps (megacore /
    pipelining) and rows close to the MXU M target (128 on v5e, 256 v6e/v7x)."""
    best_bt, best_score = None, None
    for bt in range(1, B + 1):
        if B % bt or (bt * C) % 8:
            continue
        rows = bt * C
        score = (B // bt >= min_grid_steps, rows <= target_rows,
                 -abs(target_rows - rows))
        if best_score is None or score > best_score:
            best_bt, best_score = bt, score
    if best_bt is None:
        raise ValueError("no batch_tile with (batch_tile*C) % 8 == 0; pad B or C")
    return best_bt


def _build_call(*, B, Bt, C, H, W, single_buffer_invariants):
    HW = H * W
    rows = Bt * C
    grid_steps = B // Bt

    def inv(shape):
        # Grid-invariant operand: fetched once; single-buffer when supported.
        if single_buffer_invariants:
            return pl.BlockSpec(shape, lambda i: (0, 0),
                                pipeline_mode=pl.Buffered(1))
        return pl.BlockSpec(shape, lambda i: (0, 0))

    # Advisory cost estimate so XLA schedules surrounding ops correctly.
    flops = grid_steps * (2 * 2 * rows * HW * HW                     # S2T / S4T
                          + Bt * (3 * 2 * (9 * C) * C * HW           # channel mixing
                                  + 2 * C * C * HW))                 # 1x1 conv
    bytes_accessed = (2 * B * C * HW * 4                             # x in + out
                      + 2 * HW * HW * 2                              # S2T, S4T bf16
                      + (3 * 9 * C * C + C * C) * 2                  # mixing + 1x1 weights
                      + (9 * HW + 2 * C) * 4)                        # masks + biases
    cost = pl.CostEstimate(flops=int(flops),
                           transcendentals=int(grid_steps * rows * HW),
                           bytes_accessed=int(bytes_accessed))

    return pl.pallas_call(
        functools.partial(_cross_res_kernel, width=W, C=C, Bt=Bt),
        out_shape=jax.ShapeDtypeStruct((B * C, HW), jnp.float32),
        grid=(grid_steps,),
        in_specs=[
            pl.BlockSpec((rows, HW), lambda i: (i, 0)),  # x (batch tile)
            inv((HW, HW)),                               # S2^T (bf16)
            inv((HW, HW)),                               # S4^T (bf16)
            inv((9 * C, C)),                             # (Wx+Wd2+Wd4)*bn_scale
            inv((9 * C, C)),                             # Wd2*bn_scale
            inv((9 * C, C)),                             # Wd4*bn_scale
            inv((9, HW)),                                # boundary masks
            inv((C, 1)),                                 # BN/conv bias (folded)
            inv((C, C)),                                 # 1x1 conv weight (shared)
            inv((C, 1)),                                 # 1x1 conv bias
        ],
        out_specs=pl.BlockSpec((rows, HW), lambda i: (i, 0)),   # lane-dense out
        compiler_params=pltpu.CompilerParams(
            dimension_semantics=("parallel",),   # batch tiles shard across TCs
            vmem_limit_bytes=64 * 1024 * 1024),  # explicit (v5e default is 16 MiB)
        cost_estimate=cost,
    )


def cross_resolution_forward(x_nchw, kp, batch_tile=None):
    """x_nchw: (B, C, H, W) float32 -> (B, C, H, W) float32."""
    B, Cx, H, W = x_nchw.shape
    C = kp['C']
    assert Cx == C
    HW = H * W
    Bt = batch_tile if batch_tile is not None else choose_batch_tile(B, C)
    assert B % Bt == 0, "batch must be divisible by the batch tile"
    rows = Bt * C
    # Hard floor for the (8, 128) block tiling; for bf16 MXU operands prefer
    # rows % 16 == 0 and C % 8 == 0 (tile-aligned slices) at realistic sizes.
    assert rows % 8 == 0, "batch_tile*C must be a multiple of 8 (pad B or C)"

    # Channel-major, lane-dense layout: NCHW -> (B*C, H*W) is a pure reshape.
    x_flat = x_nchw.reshape(B * C, HW).astype(jnp.float32)
    args = (x_flat, kp['S2T'], kp['S4T'], kp['Wsum'], kp['Wd2'], kp['Wd4'],
            kp['masks'], kp['bn_bias'], kp['W1'], kp['b1'])

    try:
        out_flat = _build_call(B=B, Bt=Bt, C=C, H=H, W=W,
                               single_buffer_invariants=True)(*args)
    except Exception:
        # pl.Buffered(1) not supported on this build -> default double buffering.
        out_flat = _build_call(B=B, Bt=Bt, C=C, H=H, W=W,
                               single_buffer_invariants=False)(*args)
    return out_flat.reshape(B, C, H, W)


# ----------------------------- parameters / glue ------------------------------
def init_params(key, C):
    ks = jax.random.split(key, 8)
    return dict(
        W3=jax.random.normal(ks[0], (C, 3 * C, 3, 3), jnp.float32) * 0.15,
        b3=jax.random.normal(ks[1], (C,), jnp.float32) * 0.05,
        gamma=1.0 + 0.1 * jax.random.normal(ks[2], (C,), jnp.float32),
        beta=0.1 * jax.random.normal(ks[3], (C,), jnp.float32),
        mean=0.1 * jax.random.normal(ks[4], (C,), jnp.float32),
        var=1.0 + 0.1 * jax.random.uniform(ks[5], (C,), jnp.float32),
        W1=jax.random.normal(ks[6], (C, C, 1, 1), jnp.float32) * 0.3,
        b1=jax.random.normal(ks[7], (C,), jnp.float32) * 0.05)


def prepare_kernel_params(p, *, C, H, W, eps=1e-5, op_dtype=jnp.bfloat16):
    """Fold / repack PyTorch-layout parameters for the channel-major kernel.

    Weights no longer depend on the batch tile (no block-diagonal kron(I, .)),
    so the same parameter dict works for any batch_tile.
    """
    assert H % 4 == 0 and W % 4 == 0, "AvgPool2d(2)/(4) require H, W % 4 == 0"

    # Pool -> bilinear-upsample operators (dyadic entries -> exact in bf16).
    # TODO(synk): for large H*W keep Ah/Aw separate and apply separably in-kernel.
    A2 = np.kron(upsample_matrix(H, H // 2) @ avgpool_matrix(H, 2),
                 upsample_matrix(W, W // 2) @ avgpool_matrix(W, 2))
    A4 = np.kron(upsample_matrix(H, H // 4) @ avgpool_matrix(H, 4),
                 upsample_matrix(W, W // 4) @ avgpool_matrix(W, 4))

    # BatchNorm (eval): fold scale into the 3x3 conv output channels; keep the
    # bias (beta + scale*(b3 - mean)) as a per-channel additive term.
    scale = (np.asarray(p['gamma'], np.float64)
             / np.sqrt(np.asarray(p['var'], np.float64) + eps))
    bias = (np.asarray(p['beta'], np.float64)
            + (np.asarray(p['b3'], np.float64)
               - np.asarray(p['mean'], np.float64)) * scale)

    # 3x3 conv weights over cat([x, d2, d4]) with d2 = x-up2, d4 = x-up4:
    #   conv = (Wx+Wd2+Wd4)@x - Wd2@up2 - Wd4@up4  (no concat, no subtracts).
    W3 = np.asarray(p['W3'], np.float64) * scale[:, None, None, None]  # (C,3C,3,3)
    Wx, Wd2, Wd4 = W3[:, :C], W3[:, C:2 * C], W3[:, 2 * C:]

    def taps(Wm):                       # (C_out, C_in, 3, 3) -> (9*C_out, C_in)
        return Wm.transpose(2, 3, 0, 1).reshape(9 * C, C)

    W1 = np.asarray(p['W1'], np.float64)[:, :, 0, 0]                  # (co, ci)

    lp = lambda a: jnp.asarray(a, op_dtype)
    f32 = lambda a: jnp.asarray(a, jnp.float32)
    return dict(
        C=C,
        S2T=lp(A2.T), S4T=lp(A4.T),
        Wsum=lp(taps(Wx + Wd2 + Wd4)), Wd2=lp(taps(Wd2)), Wd4=lp(taps(Wd4)),
        masks=f32(boundary_masks(H, W)),
        bn_bias=f32(bias.reshape(C, 1)),
        W1=lp(W1),
        b1=f32(np.asarray(p['b1'], np.float64).reshape(C, 1)))


def reference_forward(x_nchw, p, eps=1e-5):
    hi = jax.lax.Precision.HIGHEST
    x = jnp.transpose(x_nchw, (0, 2, 3, 1)).astype(jnp.float32)   # NHWC
    B, H, W, C = x.shape
    U2h = jnp.asarray(upsample_matrix(H, H // 2), jnp.float32)
    U2w = jnp.asarray(upsample_matrix(W, W // 2), jnp.float32)
    U4h = jnp.asarray(upsample_matrix(H, H // 4), jnp.float32)
    U4w = jnp.asarray(upsample_matrix(W, W // 4), jnp.float32)
    d2 = x.reshape(B, H // 2, 2, W // 2, 2, C).mean(axis=(2, 4))
    d4 = x.reshape(B, H // 4, 4, W // 4, 4, C).mean(axis=(2, 4))
    up2 = jnp.einsum('ik,bklc,jl->bijc', U2h, d2, U2w, precision=hi)
    up4 = jnp.einsum('ik,bklc,jl->bijc', U4h, d4, U4w, precision=hi)
    comb = jnp.concatenate([x, x - up2, x - up4], axis=-1)
    W3_hwio = jnp.transpose(p['W3'], (2, 3, 1, 0))
    y = jax.lax.conv_general_dilated(
        comb, W3_hwio, window_strides=(1, 1), padding=((1, 1), (1, 1)),
        dimension_numbers=('NHWC', 'HWIO', 'NHWC'), precision=hi) + p['b3']
    y = (y - p['mean']) / jnp.sqrt(p['var'] + eps) * p['gamma'] + p['beta']
    y = jnp.maximum(y, 0.0)
    z = jnp.einsum('bhwc,oc->bhwo', y, p['W1'][:, :, 0, 0], precision=hi) + p['b1']
    att = jax.nn.sigmoid(z)
    return jnp.transpose(x * att, (0, 3, 1, 2))


if __name__ == "__main__":
    B, C, H, W = 2, 4, 16, 16
    key = jax.random.PRNGKey(0)
    kx, kparam = jax.random.split(key)
    x = jax.random.normal(kx, (B, C, H, W), jnp.float32)

    params = init_params(kparam, C)
    kparams = prepare_kernel_params(params, C=C, H=H, W=W)

    out = jax.block_until_ready(cross_resolution_forward(x, kparams))
    ref = jax.block_until_ready(reference_forward(x, params))

    assert out.shape == x.shape
    assert bool(jnp.all(jnp.isfinite(out)))
    max_err = float(jnp.max(jnp.abs(out - ref)))
    mean_err = float(jnp.mean(jnp.abs(out - ref)))
    # Tolerances account for bf16 MXU operands vs. the f32/HIGHEST reference.
    assert max_err < 5e-2, f"max abs error {max_err}"
    assert mean_err < 5e-3, f"mean abs error {mean_err}"
    print("KERNEL_OK")
</pallas_src>

<mosaic_0001>
module attributes {stable_mosaic.version = 11 : i64} {
  func.func @_cross_res_kernel(%arg0: i32, %arg1: memref<8x256xf32, #tpu.memory_space<vmem>>, %arg2: memref<256x256xbf16, #tpu.memory_space<vmem>>, %arg3: memref<256x256xbf16, #tpu.memory_space<vmem>>, %arg4: memref<36x4xbf16, #tpu.memory_space<vmem>>, %arg5: memref<36x4xbf16, #tpu.memory_space<vmem>>, %arg6: memref<36x4xbf16, #tpu.memory_space<vmem>>, %arg7: memref<9x256xf32, #tpu.memory_space<vmem>>, %arg8: memref<4x1xf32, #tpu.memory_space<vmem>>, %arg9: memref<4x4xbf16, #tpu.memory_space<vmem>>, %arg10: memref<4x1xf32, #tpu.memory_space<vmem>>, %arg11: memref<8x256xf32, #tpu.memory_space<vmem>>) attributes {dimension_semantics = [#tpu.dimension_semantics<parallel>], iteration_bounds = array<i64: 1>, scalar_prefetch = 0 : i64, scratch_operands = 0 : i64, tpu.core_type = #tpu.core_type<tc>, window_params = [{transform_indices = @transform_0, window_bounds = array<i64: 8, 256>}, {pipeline_mode = #tpu.pipeline_mode<synchronous>, transform_indices = @transform_1, window_bounds = array<i64: 256, 256>}, {pipeline_mode = #tpu.pipeline_mode<synchronous>, transform_indices = @transform_2, window_bounds = array<i64: 256, 256>}, {pipeline_mode = #tpu.pipeline_mode<synchronous>, transform_indices = @transform_3, window_bounds = array<i64: 36, 4>}, {pipeline_mode = #tpu.pipeline_mode<synchronous>, transform_indices = @transform_4, window_bounds = array<i64: 36, 4>}, {pipeline_mode = #tpu.pipeline_mode<synchronous>, transform_indices = @transform_5, window_bounds = array<i64: 36, 4>}, {pipeline_mode = #tpu.pipeline_mode<synchronous>, transform_indices = @transform_6, window_bounds = array<i64: 9, 256>}, {pipeline_mode = #tpu.pipeline_mode<synchronous>, transform_indices = @transform_7, window_bounds = array<i64: 4, 1>}, {pipeline_mode = #tpu.pipeline_mode<synchronous>, transform_indices = @transform_8, window_bounds = array<i64: 4, 4>}, {pipeline_mode = #tpu.pipeline_mode<synchronous>, transform_indices = @transform_9, window_bounds = array<i64: 4, 1>}, {transform_indices = @transform_10, window_bounds = array<i64: 8, 256>}]} {
    %c0 = arith.constant 0 : index
    %c0_0 = arith.constant 0 : index
    %0 = vector.load %arg1[%c0, %c0_0] : memref<8x256xf32, #tpu.memory_space<vmem>>, vector<8x256xf32>
    %1 = arith.truncf %0 : vector<8x256xf32> to vector<8x256xbf16>
    %c0_1 = arith.constant 0 : index
    %c0_2 = arith.constant 0 : index
    %2 = vector.load %arg2[%c0_1, %c0_2] : memref<256x256xbf16, #tpu.memory_space<vmem>>, vector<256x256xbf16>
    %cst = arith.constant dense<0.000000e+00> : vector<8x256xf32>
    %3 = tpu.matmul %1, %2, %cst {dimension_numbers = #tpu.dot_dimension_numbers<[1], [0], [0], [1], [0, 0, 1, 1], [], []>} : vector<8x256xbf16>, vector<256x256xbf16>, vector<8x256xf32> -> vector<8x256xf32>
    %c0_3 = arith.constant 0 : index
    %c0_4 = arith.constant 0 : index
    %4 = vector.load %arg3[%c0_3, %c0_4] : memref<256x256xbf16, #tpu.memory_space<vmem>>, vector<256x256xbf16>
    %cst_5 = arith.constant dense<0.000000e+00> : vector<8x256xf32>
    %5 = tpu.matmul %1, %4, %cst_5 {dimension_numbers = #tpu.dot_dimension_numbers<[1], [0], [0], [1], [0, 0, 1, 1], [], []>} : vector<8x256xbf16>, vector<256x256xbf16>, vector<8x256xf32> -> vector<8x256xf32>
    %6 = arith.truncf %3 : vector<8x256xf32> to vector<8x256xbf16>
    %7 = arith.truncf %5 : vector<8x256xf32> to vector<8x256xbf16>
    %c0_6 = arith.constant 0 : index
    %c0_7 = arith.constant 0 : index
    %8 = vector.load %arg4[%c0_6, %c0_7] : memref<36x4xbf16, #tpu.memory_space<vmem>>, vector<36x4xbf16>
    %c0_8 = arith.constant 0 : index
    %c0_9 = arith.constant 0 : index
    %9 = vector.load %arg5[%c0_8, %c0_9] : memref<36x4xbf16, #tpu.memory_space<vmem>>, vector<36x4xbf16>
    %c0_10 = arith.constant 0 : index
    %c0_11 = arith.constant 0 : index
    %10 = vector.load %arg6[%c0_10, %c0_11] : memref<36x4xbf16, #tpu.memory_space<vmem>>, vector<36x4xbf16>
    %c0_12 = arith.constant 0 : index
    %c0_13 = arith.constant 0 : index
    %11 = vector.load %arg7[%c0_12, %c0_13] : memref<9x256xf32, #tpu.memory_space<vmem>>, vector<9x256xf32>
    %c0_14 = arith.constant 0 : index
    %c0_15 = arith.constant 0 : index
    %12 = vector.load %arg8[%c0_14, %c0_15] : memref<4x1xf32, #tpu.memory_space<vmem>>, vector<4x1xf32>
    %c0_16 = arith.constant 0 : index
    %c0_17 = arith.constant 0 : index
    %13 = vector.load %arg9[%c0_16, %c0_17] : memref<4x4xbf16, #tpu.memory_space<vmem>>, vector<4x4xbf16>
    %c0_18 = arith.constant 0 : index
    %c0_19 = arith.constant 0 : index
    %14 = vector.load %arg10[%c0_18, %c0_19] : memref<4x1xf32, #tpu.memory_space<vmem>>, vector<4x1xf32>
    %15 = vector.extract_strided_slice %1 {offsets = [0, 0], sizes = [4, 256], strides = [1, 1]} : vector<8x256xbf16> to vector<4x256xbf16>
    %cst_20 = arith.constant dense<0.000000e+00> : vector<36x256xf32>
    %16 = tpu.matmul %8, %15, %cst_20 {dimension_numbers = #tpu.dot_dimension_numbers<[1], [0], [0], [1], [0, 0, 1, 1], [], []>} : vector<36x4xbf16>, vector<4x256xbf16>, vector<36x256xf32> -> vector<36x256xf32>
    %17 = vector.extract_strided_slice %6 {offsets = [0, 0], sizes = [4, 256], strides = [1, 1]} : vector<8x256xbf16> to vector<4x256xbf16>
    %cst_21 = arith.constant dense<0.000000e+00> : vector<36x256xf32>
    %18 = tpu.matmul %9, %17, %cst_21 {dimension_numbers = #tpu.dot_dimension_numbers<[1], [0], [0], [1], [0, 0, 1, 1], [], []>} : vector<36x4xbf16>, vector<4x256xbf16>, vector<36x256xf32> -> vector<36x256xf32>
    %19 = arith.subf %16, %18 : vector<36x256xf32>
    %20 = vector.extract_strided_slice %7 {offsets = [0, 0], sizes = [4, 256], strides = [1, 1]} : vector<8x256xbf16> to vector<4x256xbf16>
    %cst_22 = arith.constant dense<0.000000e+00> : vector<36x256xf32>
    %21 = tpu.matmul %10, %20, %cst_22 {dimension_numbers = #tpu.dot_dimension_numbers<[1], [0], [0], [1], [0, 0, 1, 1], [], []>} : vector<36x4xbf16>, vector<4x256xbf16>, vector<36x256xf32> -> vector<36x256xf32>
    %22 = arith.subf %19, %21 : vector<36x256xf32>
    %23 = vector.extract_strided_slice %22 {offsets = [16, 0], sizes = [4, 256], strides = [1, 1]} : vector<36x256xf32> to vector<4x256xf32>
    %24 = vector.extract_strided_slice %22 {offsets = [0, 0], sizes = [4, 256], strides = [1, 1]} : vector<36x256xf32> to vector<4x256xf32>
    %c17_i32 = arith.constant 17 : i32
    %25 = tpu.dynamic_rotate %24 by %c17_i32 dim 1 : vector<4x256xf32>, i32 -> vector<4x256xf32>
    %26 = vector.extract_strided_slice %11 {offsets = [0, 0], sizes = [1, 256], strides = [1, 1]} : vector<9x256xf32> to vector<1x256xf32>
    %27 = vector.broadcast %26 : vector<1x256xf32> to vector<4x256xf32>
    %28 = arith.mulf %25, %27 : vector<4x256xf32>
    %29 = arith.addf %23, %28 : vector<4x256xf32>
    %30 = vector.extract_strided_slice %22 {offsets = [4, 0], sizes = [4, 256], strides = [1, 1]} : vector<36x256xf32> to vector<4x256xf32>
    %c16_i32 = arith.constant 16 : i32
    %31 = tpu.dynamic_rotate %30 by %c16_i32 dim 1 : vector<4x256xf32>, i32 -> vector<4x256xf32>
    %32 = vector.extract_strided_slice %11 {offsets = [1, 0], sizes = [1, 256], strides = [1, 1]} : vector<9x256xf32> to vector<1x256xf32>
    %33 = vector.broadcast %32 : vector<1x256xf32> to vector<4x256xf32>
    %34 = arith.mulf %31, %33 : vector<4x256xf32>
    %35 = arith.addf %29, %34 : vector<4x256xf32>
    %36 = vector.extract_strided_slice %22 {offsets = [8, 0], sizes = [4, 256], strides = [1, 1]} : vector<36x256xf32> to vector<4x256xf32>
    %c15_i32 = arith.constant 15 : i32
    %37 = tpu.dynamic_rotate %36 by %c15_i32 dim 1 : vector<4x256xf32>, i32 -> vector<4x256xf32>
    %38 = vector.extract_strided_slice %11 {offsets = [2, 0], sizes = [1, 256], strides = [1, 1]} : vector<9x256xf32> to vector<1x256xf32>
    %39 = vector.broadcast %38 : vector<1x256xf32> to vector<4x256xf32>
    %40 = arith.mulf %37, %39 : vector<4x256xf32>
    %41 = arith.addf %35, %40 : vector<4x256xf32>
    %42 = vector.extract_strided_slice %22 {offsets = [12, 0], sizes = [4, 256], strides = [1, 1]} : vector<36x256xf32> to vector<4x256xf32>
    %c1_i32 = arith.constant 1 : i32
    %43 = tpu.dynamic_rotate %42 by %c1_i32 dim 1 : vector<4x256xf32>, i32 -> vector<4x256xf32>
    %44 = vector.extract_strided_slice %11 {offsets = [3, 0], sizes = [1, 256], strides = [1, 1]} : vector<9x256xf32> to vector<1x256xf32>
    %45 = vector.broadcast %44 : vector<1x256xf32> to vector<4x256xf32>
    %46 = arith.mulf %43, %45 : vector<4x256xf32>
    %47 = arith.addf %41, %46 : vector<4x256xf32>
    %48 = vector.extract_strided_slice %22 {offsets = [20, 0], sizes = [4, 256], strides = [1, 1]} : vector<36x256xf32> to vector<4x256xf32>
    %c255_i32 = arith.constant 255 : i32
    %49 = tpu.dynamic_rotate %48 by %c255_i32 dim 1 : vector<4x256xf32>, i32 -> vector<4x256xf32>
    %50 = vector.extract_strided_slice %11 {offsets = [5, 0], sizes = [1, 256], strides = [1, 1]} : vector<9x256xf32> to vector<1x256xf32>
    %51 = vector.broadcast %50 : vector<1x256xf32> to vector<4x256xf32>
    %52 = arith.mulf %49, %51 : vector<4x256xf32>
    %53 = arith.addf %47, %52 : vector<4x256xf32>
    %54 = vector.extract_strided_slice %22 {offsets = [24, 0], sizes = [4, 256], strides = [1, 1]} : vector<36x256xf32> to vector<4x256xf32>
    %c241_i32 = arith.constant 241 : i32
    %55 = tpu.dynamic_rotate %54 by %c241_i32 dim 1 : vector<4x256xf32>, i32 -> vector<4x256xf32>
    %56 = vector.extract_strided_slice %11 {offsets = [6, 0], sizes = [1, 256], strides = [1, 1]} : vector<9x256xf32> to vector<1x256xf32>
    %57 = vector.broadcast %56 : vector<1x256xf32> to vector<4x256xf32>
    %58 = arith.mulf %55, %57 : vector<4x256xf32>
    %59 = arith.addf %53, %58 : vector<4x256xf32>
    %60 = vector.extract_strided_slice %22 {offsets = [28, 0], sizes = [4, 256], strides = [1, 1]} : vector<36x256xf32> to vector<4x256xf32>
    %c240_i32 = arith.constant 240 : i32
    %61 = tpu.dynamic_rotate %60 by %c240_i32 dim 1 : vector<4x256xf32>, i32 -> vector<4x256xf32>
    %62 = vector.extract_strided_slice %11 {offsets = [7, 0], sizes = [1, 256], strides = [1, 1]} : vector<9x256xf32> to vector<1x256xf32>
    %63 = vector.broadcast %62 : vector<1x256xf32> to vector<4x256xf32>
    %64 = arith.mulf %61, %63 : vector<4x256xf32>
    %65 = arith.addf %59, %64 : vector<4x256xf32>
    %66 = vector.extract_strided_slice %22 {offsets = [32, 0], sizes = [4, 256], strides = [1, 1]} : vector<36x256xf32> to vector<4x256xf32>
    %c239_i32 = arith.constant 239 : i32
    %67 = tpu.dynamic_rotate %66 by %c239_i32 dim 1 : vector<4x256xf32>, i32 -> vector<4x256xf32>
    %68 = vector.extract_strided_slice %11 {offsets = [8, 0], sizes = [1, 256], strides = [1, 1]} : vector<9x256xf32> to vector<1x256xf32>
    %69 = vector.broadcast %68 : vector<1x256xf32> to vector<4x256xf32>
    %70 = arith.mulf %67, %69 : vector<4x256xf32>
    %71 = arith.addf %65, %70 : vector<4x256xf32>
    %72 = vector.broadcast %12 : vector<4x1xf32> to vector<4x256xf32>
    %73 = arith.addf %71, %72 : vector<4x256xf32>
    %cst_23 = arith.constant 0.000000e+00 : f32
    %74 = vector.broadcast %cst_23 : f32 to vector<4x256xf32>
    %75 = arith.maximumf %73, %74 : vector<4x256xf32>
    %76 = arith.truncf %75 : vector<4x256xf32> to vector<4x256xbf16>
    %cst_24 = arith.constant dense<0.000000e+00> : vector<4x256xf32>
    %77 = tpu.matmul %13, %76, %cst_24 {dimension_numbers = #tpu.dot_dimension_numbers<[1], [0], [0], [1], [0, 0, 1, 1], [], []>} : vector<4x4xbf16>, vector<4x256xbf16>, vector<4x256xf32> -> vector<4x256xf32>
    %78 = vector.broadcast %14 : vector<4x1xf32> to vector<4x256xf32>
    %79 = arith.addf %77, %78 : vector<4x256xf32>
    %cst_25 = arith.constant 5.000000e-01 : f32
    %80 = vector.broadcast %cst_25 : f32 to vector<4x256xf32>
    %81 = arith.mulf %80, %79 : vector<4x256xf32>
    %82 = math.tanh %81 : vector<4x256xf32>
    %cst_26 = arith.constant 1.000000e+00 : f32
    %83 = vector.broadcast %cst_26 : f32 to vector<4x256xf32>
    %84 = arith.addf %82, %83 : vector<4x256xf32>
    %cst_27 = arith.constant 5.000000e-01 : f32
    %85 = vector.broadcast %cst_27 : f32 to vector<4x256xf32>
    %86 = arith.mulf %85, %84 : vector<4x256xf32>
    %87 = vector.extract_strided_slice %0 {offsets = [0, 0], sizes = [4, 256], strides = [1, 1]} : vector<8x256xf32> to vector<4x256xf32>
    %88 = arith.mulf %87, %86 : vector<4x256xf32>
    %c0_28 = arith.constant 0 : index
    %c0_29 = arith.constant 0 : index
    %89 = vector.load %arg11[%c0_28, %c0_29] : memref<8x256xf32, #tpu.memory_space<vmem>>, vector<4x256xf32>
    tpu.vector_store %arg11[%c0_28, %c0_29], %88 {strides = array<i32>} : memref<8x256xf32, #tpu.memory_space<vmem>>, vector<4x256xf32>,
    %90 = vector.extract_strided_slice %1 {offsets = [4, 0], sizes = [4, 256], strides = [1, 1]} : vector<8x256xbf16> to vector<4x256xbf16>
    %cst_30 = arith.constant dense<0.000000e+00> : vector<36x256xf32>
    %91 = tpu.matmul %8, %90, %cst_30 {dimension_numbers = #tpu.dot_dimension_numbers<[1], [0], [0], [1], [0, 0, 1, 1], [], []>} : vector<36x4xbf16>, vector<4x256xbf16>, vector<36x256xf32> -> vector<36x256xf32>
    %92 = vector.extract_strided_slice %6 {offsets = [4, 0], sizes = [4, 256], strides = [1, 1]} : vector<8x256xbf16> to vector<4x256xbf16>
    %cst_31 = arith.constant dense<0.000000e+00> : vector<36x256xf32>
    %93 = tpu.matmul %9, %92, %cst_31 {dimension_numbers = #tpu.dot_dimension_numbers<[1], [0], [0], [1], [0, 0, 1, 1], [], []>} : vector<36x4xbf16>, vector<4x256xbf16>, vector<36x256xf32> -> vector<36x256xf32>
    %94 = arith.subf %91, %93 : vector<36x256xf32>
    %95 = vector.extract_strided_slice %7 {offsets = [4, 0], sizes = [4, 256], strides = [1, 1]} : vector<8x256xbf16> to vector<4x256xbf16>
    %cst_32 = arith.constant dense<0.000000e+00> : vector<36x256xf32>
    %96 = tpu.matmul %10, %95, %cst_32 {dimension_numbers = #tpu.dot_dimension_numbers<[1], [0], [0], [1], [0, 0, 1, 1], [], []>} : vector<36x4xbf16>, vector<4x256xbf16>, vector<36x256xf32> -> vector<36x256xf32>
    %97 = arith.subf %94, %96 : vector<36x256xf32>
    %98 = vector.extract_strided_slice %97 {offsets = [16, 0], sizes = [4, 256], strides = [1, 1]} : vector<36x256xf32> to vector<4x256xf32>
    %99 = vector.extract_strided_slice %97 {offsets = [0, 0], sizes = [4, 256], strides = [1, 1]} : vector<36x256xf32> to vector<4x256xf32>
    %c17_i32_33 = arith.constant 17 : i32
    %100 = tpu.dynamic_rotate %99 by %c17_i32_33 dim 1 : vector<4x256xf32>, i32 -> vector<4x256xf32>
    %101 = vector.extract_strided_slice %11 {offsets = [0, 0], sizes = [1, 256], strides = [1, 1]} : vector<9x256xf32> to vector<1x256xf32>
    %102 = vector.broadcast %101 : vector<1x256xf32> to vector<4x256xf32>
    %103 = arith.mulf %100, %102 : vector<4x256xf32>
    %104 = arith.addf %98, %103 : vector<4x256xf32>
    %105 = vector.extract_strided_slice %97 {offsets = [4, 0], sizes = [4, 256], strides = [1, 1]} : vector<36x256xf32> to vector<4x256xf32>
    %c16_i32_34 = arith.constant 16 : i32
    %106 = tpu.dynamic_rotate %105 by %c16_i32_34 dim 1 : vector<4x256xf32>, i32 -> vector<4x256xf32>
    %107 = vector.extract_strided_slice %11 {offsets = [1, 0], sizes = [1, 256], strides = [1, 1]} : vector<9x256xf32> to vector<1x256xf32>
    %108 = vector.broadcast %107 : vector<1x256xf32> to vector<4x256xf32>
    %109 = arith.mulf %106, %108 : vector<4x256xf32>
    %110 = arith.addf %104, %109 : vector<4x256xf32>
    %111 = vector.extract_strided_slice %97 {offsets = [8, 0], sizes = [4, 256], strides = [1, 1]} : vector<36x256xf32> to vector<4x256xf32>
    %c15_i32_35 = arith.constant 15 : i32
    %112 = tpu.dynamic_rotate %111 by %c15_i32_35 dim 1 : vector<4x256xf32>, i32 -> vector<4x256xf32>
    %113 = vector.extract_strided_slice %11 {offsets = [2, 0], sizes = [1, 256], strides = [1, 1]} : vector<9x256xf32> to vector<1x256xf32>
    %114 = vector.broadcast %113 : vector<1x256xf32> to vector<4x256xf32>
    %115 = arith.mulf %112, %114 : vector<4x256xf32>
    %116 = arith.addf %110, %115 : vector<4x256xf32>
    %117 = vector.extract_strided_slice %97 {offsets = [12, 0], sizes = [4, 256], strides = [1, 1]} : vector<36x256xf32> to vector<4x256xf32>
    %c1_i32_36 = arith.constant 1 : i32
    %118 = tpu.dynamic_rotate %117 by %c1_i32_36 dim 1 : vector<4x256xf32>, i32 -> vector<4x256xf32>
    %119 = vector.extract_strided_slice %11 {offsets = [3, 0], sizes = [1, 256], strides = [1, 1]} : vector<9x256xf32> to vector<1x256xf32>
    %120 = vector.broadcast %119 : vector<1x256xf32> to vector<4x256xf32>
    %121 = arith.mulf %118, %120 : vector<4x256xf32>
    %122 = arith.addf %116, %121 : vector<4x256xf32>
    %123 = vector.extract_strided_slice %97 {offsets = [20, 0], sizes = [4, 256], strides = [1, 1]} : vector<36x256xf32> to vector<4x256xf32>
    %c255_i32_37 = arith.constant 255 : i32
    %124 = tpu.dynamic_rotate %123 by %c255_i32_37 dim 1 : vector<4x256xf32>, i32 -> vector<4x256xf32>
    %125 = vector.extract_strided_slice %11 {offsets = [5, 0], sizes = [1, 256], strides = [1, 1]} : vector<9x256xf32> to vector<1x256xf32>
    %126 = vector.broadcast %125 : vector<1x256xf32> to vector<4x256xf32>
    %127 = arith.mulf %124, %126 : vector<4x256xf32>
    %128 = arith.addf %122, %127 : vector<4x256xf32>
    %129 = vector.extract_strided_slice %97 {offsets = [24, 0], sizes = [4, 256], strides = [1, 1]} : vector<36x256xf32> to vector<4x256xf32>
    %c241_i32_38 = arith.constant 241 : i32
    %130 = tpu.dynamic_rotate %129 by %c241_i32_38 dim 1 : vector<4x256xf32>, i32 -> vector<4x256xf32>
    %131 = vector.extract_strided_slice %11 {offsets = [6, 0], sizes = [1, 256], strides = [1, 1]} : vector<9x256xf32> to vector<1x256xf32>
    %132 = vector.broadcast %131 : vector<1x256xf32> to vector<4x256xf32>
    %133 = arith.mulf %130, %132 : vector<4x256xf32>
    %134 = arith.addf %128, %133 : vector<4x256xf32>
    %135 = vector.extract_strided_slice %97 {offsets = [28, 0], sizes = [4, 256], strides = [1, 1]} : vector<36x256xf32> to vector<4x256xf32>
    %c240_i32_39 = arith.constant 240 : i32
    %136 = tpu.dynamic_rotate %135 by %c240_i32_39 dim 1 : vector<4x256xf32>, i32 -> vector<4x256xf32>
    %137 = vector.extract_strided_slice %11 {offsets = [7, 0], sizes = [1, 256], strides = [1, 1]} : vector<9x256xf32> to vector<1x256xf32>
    %138 = vector.broadcast %137 : vector<1x256xf32> to vector<4x256xf32>
    %139 = arith.mulf %136, %138 : vector<4x256xf32>
    %140 = arith.addf %134, %139 : vector<4x256xf32>
    %141 = vector.extract_strided_slice %97 {offsets = [32, 0], sizes = [4, 256], strides = [1, 1]} : vector<36x256xf32> to vector<4x256xf32>
    %c239_i32_40 = arith.constant 239 : i32
    %142 = tpu.dynamic_rotate %141 by %c239_i32_40 dim 1 : vector<4x256xf32>, i32 -> vector<4x256xf32>
    %143 = vector.extract_strided_slice %11 {offsets = [8, 0], sizes = [1, 256], strides = [1, 1]} : vector<9x256xf32> to vector<1x256xf32>
    %144 = vector.broadcast %143 : vector<1x256xf32> to vector<4x256xf32>
    %145 = arith.mulf %142, %144 : vector<4x256xf32>
    %146 = arith.addf %140, %145 : vector<4x256xf32>
    %147 = vector.broadcast %12 : vector<4x1xf32> to vector<4x256xf32>
    %148 = arith.addf %146, %147 : vector<4x256xf32>
    %cst_41 = arith.constant 0.000000e+00 : f32
    %149 = vector.broadcast %cst_41 : f32 to vector<4x256xf32>
    %150 = arith.maximumf %148, %149 : vector<4x256xf32>
    %151 = arith.truncf %150 : vector<4x256xf32> to vector<4x256xbf16>
    %cst_42 = arith.constant dense<0.000000e+00> : vector<4x256xf32>
    %152 = tpu.matmul %13, %151, %cst_42 {dimension_numbers = #tpu.dot_dimension_numbers<[1], [0], [0], [1], [0, 0, 1, 1], [], []>} : vector<4x4xbf16>, vector<4x256xbf16>, vector<4x256xf32> -> vector<4x256xf32>
    %153 = vector.broadcast %14 : vector<4x1xf32> to vector<4x256xf32>
    %154 = arith.addf %152, %153 : vector<4x256xf32>
    %cst_43 = arith.constant 5.000000e-01 : f32
    %155 = vector.broadcast %cst_43 : f32 to vector<4x256xf32>
    %156 = arith.mulf %155, %154 : vector<4x256xf32>
    %157 = math.tanh %156 : vector<4x256xf32>
    %cst_44 = arith.constant 1.000000e+00 : f32
    %158 = vector.broadcast %cst_44 : f32 to vector<4x256xf32>
    %159 = arith.addf %157, %158 : vector<4x256xf32>
    %cst_45 = arith.constant 5.000000e-01 : f32
    %160 = vector.broadcast %cst_45 : f32 to vector<4x256xf32>
    %161 = arith.mulf %160, %159 : vector<4x256xf32>
    %162 = vector.extract_strided_slice %0 {offsets = [4, 0], sizes = [4, 256], strides = [1, 1]} : vector<8x256xf32> to vector<4x256xf32>
    %163 = arith.mulf %162, %161 : vector<4x256xf32>
    %c4 = arith.constant 4 : index
    %c0_46 = arith.constant 0 : index
    %164 = vector.load %arg11[%c4, %c0_46] : memref<8x256xf32, #tpu.memory_space<vmem>>, vector<4x256xf32>
    tpu.vector_store %arg11[%c4, %c0_46], %163 {strides = array<i32>} : memref<8x256xf32, #tpu.memory_space<vmem>>, vector<4x256xf32>,
    return
  }
  func.func @transform_0(%arg0: i32) -> (i32, i32) {
    %c0_i32 = arith.constant 0 : i32
    %c0_i32_0 = arith.constant 0 : i32
    return %arg0, %c0_i32 : i32, i32
  }
  func.func @transform_1(%arg0: i32) -> (i32, i32) {
    %c0_i32 = arith.constant 0 : i32
    %c0_i32_0 = arith.constant 0 : i32
    %c0_i32_1 = arith.constant 0 : i32
    return %c0_i32, %c0_i32_0 : i32, i32
  }
  func.func @transform_2(%arg0: i32) -> (i32, i32) {
    %c0_i32 = arith.constant 0 : i32
    %c0_i32_0 = arith.constant 0 : i32
    %c0_i32_1 = arith.constant 0 : i32
    return %c0_i32, %c0_i32_0 : i32, i32
  }
  func.func @transform_3(%arg0: i32) -> (i32, i32) {
    %c0_i32 = arith.constant 0 : i32
    %c0_i32_0 = arith.constant 0 : i32
    %c0_i32_1 = arith.constant 0 : i32
    return %c0_i32, %c0_i32_0 : i32, i32
  }
  func.func @transform_4(%arg0: i32) -> (i32, i32) {
    %c0_i32 = arith.constant 0 : i32
    %c0_i32_0 = arith.constant 0 : i32
    %c0_i32_1 = arith.constant 0 : i32
    return %c0_i32, %c0_i32_0 : i32, i32
  }
  func.func @transform_5(%arg0: i32) -> (i32, i32) {
    %c0_i32 = arith.constant 0 : i32
    %c0_i32_0 = arith.constant 0 : i32
    %c0_i32_1 = arith.constant 0 : i32
    return %c0_i32, %c0_i32_0 : i32, i32
  }
  func.func @transform_6(%arg0: i32) -> (i32, i32) {
    %c0_i32 = arith.constant 0 : i32
    %c0_i32_0 = arith.constant 0 : i32
    %c0_i32_1 = arith.constant 0 : i32
    return %c0_i32, %c0_i32_0 : i32, i32
  }
  func.func @transform_7(%arg0: i32) -> (i32, i32) {
    %c0_i32 = arith.constant 0 : i32
    %c0_i32_0 = arith.constant 0 : i32
    %c0_i32_1 = arith.constant 0 : i32
    return %c0_i32, %c0_i32_0 : i32, i32
  }
  func.func @transform_8(%arg0: i32) -> (i32, i32) {
    %c0_i32 = arith.constant 0 : i32
    %c0_i32_0 = arith.constant 0 : i32
    %c0_i32_1 = arith.constant 0 : i32
    return %c0_i32, %c0_i32_0 : i32, i32
  }
  func.func @transform_9(%arg0: i32) -> (i32, i32) {
    %c0_i32 = arith.constant 0 : i32
    %c0_i32_0 = arith.constant 0 : i32
    %c0_i32_1 = arith.constant 0 : i32
    return %c0_i32, %c0_i32_0 : i32, i32
  }
  func.func @transform_10(%arg0: i32) -> (i32, i32) {
    %c0_i32 = arith.constant 0 : i32
    %c0_i32_0 = arith.constant 0 : i32
    return %arg0, %c0_i32 : i32, i32
  }
}

module attributes {stable_mosaic.version = 11 : i64} {
  func.func @_cross_res_kernel(%arg0: i32, %arg1: memref<8x256xf32, #tpu.memory_space<vmem>>, %arg2: memref<256x256xbf16, #tpu.memory_space<vmem>>, %arg3: memref<256x256xbf16, #tpu.memory_space<vmem>>, %arg4: memref<36x4xbf16, #tpu.memory_space<vmem>>, %arg5: memref<36x4xbf16, #tpu.memory_space<vmem>>, %arg6: memref<36x4xbf16, #tpu.memory_space<vmem>>, %arg7: memref<9x256xf32, #tpu.memory_space<vmem>>, %arg8: memref<4x1xf32, #tpu.memory_space<vmem>>, %arg9: memref<4x4xbf16, #tpu.memory_space<vmem>>, %arg10: memref<4x1xf32, #tpu.memory_space<vmem>>, %arg11: memref<8x256xf32, #tpu.memory_space<vmem>>) attributes {dimension_semantics = [#tpu.dimension_semantics<parallel>], iteration_bounds = array<i64: 1>, scalar_prefetch = 0 : i64, scratch_operands = 0 : i64, tpu.core_type = #tpu.core_type<tc>, window_params = [{transform_indices = @transform_0, window_bounds = array<i64: 8, 256>}, {pipeline_mode = #tpu.pipeline_mode<synchronous>, transform_indices = @transform_1, window_bounds = array<i64: 256, 256>}, {pipeline_mode = #tpu.pipeline_mode<synchronous>, transform_indices = @transform_2, window_bounds = array<i64: 256, 256>}, {pipeline_mode = #tpu.pipeline_mode<synchronous>, transform_indices = @transform_3, window_bounds = array<i64: 36, 4>}, {pipeline_mode = #tpu.pipeline_mode<synchronous>, transform_indices = @transform_4, window_bounds = array<i64: 36, 4>}, {pipeline_mode = #tpu.pipeline_mode<synchronous>, transform_indices = @transform_5, window_bounds = array<i64: 36, 4>}, {pipeline_mode = #tpu.pipeline_mode<synchronous>, transform_indices = @transform_6, window_bounds = array<i64: 9, 256>}, {pipeline_mode = #tpu.pipeline_mode<synchronous>, transform_indices = @transform_7, window_bounds = array<i64: 4, 1>}, {pipeline_mode = #tpu.pipeline_mode<synchronous>, transform_indices = @transform_8, window_bounds = array<i64: 4, 4>}, {pipeline_mode = #tpu.pipeline_mode<synchronous>, transform_indices = @transform_9, window_bounds = array<i64: 4, 1>}, {transform_indices = @transform_10, window_bounds = array<i64: 8, 256>}]} {
    %c0 = arith.constant 0 : index
    %c0_0 = arith.constant 0 : index
    %0 = vector.load %arg1[%c0, %c0_0] : memref<8x256xf32, #tpu.memory_space<vmem>>, vector<8x256xf32>
    %1 = arith.truncf %0 : vector<8x256xf32> to vector<8x256xbf16>
    %c0_1 = arith.constant 0 : index
    %c0_2 = arith.constant 0 : index
    %2 = vector.load %arg2[%c0_1, %c0_2] : memref<256x256xbf16, #tpu.memory_space<vmem>>, vector<256x256xbf16>
    %cst = arith.constant dense<0.000000e+00> : vector<8x256xf32>
    %3 = tpu.matmul %1, %2, %cst {dimension_numbers = #tpu.dot_dimension_numbers<[1], [0], [0], [1], [0, 0, 1, 1], [], []>} : vector<8x256xbf16>, vector<256x256xbf16>, vector<8x256xf32> -> vector<8x256xf32>
    %c0_3 = arith.constant 0 : index
    %c0_4 = arith.constant 0 : index
    %4 = vector.load %arg3[%c0_3, %c0_4] : memref<256x256xbf16, #tpu.memory_space<vmem>>, vector<256x256xbf16>
    %cst_5 = arith.constant dense<0.000000e+00> : vector<8x256xf32>
    %5 = tpu.matmul %1, %4, %cst_5 {dimension_numbers = #tpu.dot_dimension_numbers<[1], [0], [0], [1], [0, 0, 1, 1], [], []>} : vector<8x256xbf16>, vector<256x256xbf16>, vector<8x256xf32> -> vector<8x256xf32>
    %6 = arith.truncf %3 : vector<8x256xf32> to vector<8x256xbf16>
    %7 = arith.truncf %5 : vector<8x256xf32> to vector<8x256xbf16>
    %c0_6 = arith.constant 0 : index
    %c0_7 = arith.constant 0 : index
    %8 = vector.load %arg4[%c0_6, %c0_7] : memref<36x4xbf16, #tpu.memory_space<vmem>>, vector<36x4xbf16>
    %c0_8 = arith.constant 0 : index
    %c0_9 = arith.constant 0 : index
    %9 = vector.load %arg5[%c0_8, %c0_9] : memref<36x4xbf16, #tpu.memory_space<vmem>>, vector<36x4xbf16>
    %c0_10 = arith.constant 0 : index
    %c0_11 = arith.constant 0 : index
    %10 = vector.load %arg6[%c0_10, %c0_11] : memref<36x4xbf16, #tpu.memory_space<vmem>>, vector<36x4xbf16>
    %c0_12 = arith.constant 0 : index
    %c0_13 = arith.constant 0 : index
    %11 = vector.load %arg7[%c0_12, %c0_13] : memref<9x256xf32, #tpu.memory_space<vmem>>, vector<9x256xf32>
    %c0_14 = arith.constant 0 : index
    %c0_15 = arith.constant 0 : index
    %12 = vector.load %arg8[%c0_14, %c0_15] : memref<4x1xf32, #tpu.memory_space<vmem>>, vector<4x1xf32>
    %c0_16 = arith.constant 0 : index
    %c0_17 = arith.constant 0 : index
    %13 = vector.load %arg9[%c0_16, %c0_17] : memref<4x4xbf16, #tpu.memory_space<vmem>>, vector<4x4xbf16>
    %c0_18 = arith.constant 0 : index
    %c0_19 = arith.constant 0 : index
    %14 = vector.load %arg10[%c0_18, %c0_19] : memref<4x1xf32, #tpu.memory_space<vmem>>, vector<4x1xf32>
    %15 = vector.extract_strided_slice %1 {offsets = [0, 0], sizes = [4, 256], strides = [1, 1]} : vector<8x256xbf16> to vector<4x256xbf16>
    %cst_20 = arith.constant dense<0.000000e+00> : vector<36x256xf32>
    %16 = tpu.matmul %8, %15, %cst_20 {dimension_numbers = #tpu.dot_dimension_numbers<[1], [0], [0], [1], [0, 0, 1, 1], [], []>} : vector<36x4xbf16>, vector<4x256xbf16>, vector<36x256xf32> -> vector<36x256xf32>
    %17 = vector.extract_strided_slice %6 {offsets = [0, 0], sizes = [4, 256], strides = [1, 1]} : vector<8x256xbf16> to vector<4x256xbf16>
    %cst_21 = arith.constant dense<0.000000e+00> : vector<36x256xf32>
    %18 = tpu.matmul %9, %17, %cst_21 {dimension_numbers = #tpu.dot_dimension_numbers<[1], [0], [0], [1], [0, 0, 1, 1], [], []>} : vector<36x4xbf16>, vector<4x256xbf16>, vector<36x256xf32> -> vector<36x256xf32>
    %19 = arith.subf %16, %18 : vector<36x256xf32>
    %20 = vector.extract_strided_slice %7 {offsets = [0, 0], sizes = [4, 256], strides = [1, 1]} : vector<8x256xbf16> to vector<4x256xbf16>
    %cst_22 = arith.constant dense<0.000000e+00> : vector<36x256xf32>
    %21 = tpu.matmul %10, %20, %cst_22 {dimension_numbers = #tpu.dot_dimension_numbers<[1], [0], [0], [1], [0, 0, 1, 1], [], []>} : vector<36x4xbf16>, vector<4x256xbf16>, vector<36x256xf32> -> vector<36x256xf32>
    %22 = arith.subf %19, %21 : vector<36x256xf32>
    %23 = vector.extract_strided_slice %22 {offsets = [16, 0], sizes = [4, 256], strides = [1, 1]} : vector<36x256xf32> to vector<4x256xf32>
    %24 = vector.extract_strided_slice %22 {offsets = [0, 0], sizes = [4, 256], strides = [1, 1]} : vector<36x256xf32> to vector<4x256xf32>
    %c17_i32 = arith.constant 17 : i32
    %25 = tpu.dynamic_rotate %24 by %c17_i32 dim 1 : vector<4x256xf32>, i32 -> vector<4x256xf32>
    %26 = vector.extract_strided_slice %11 {offsets = [0, 0], sizes = [1, 256], strides = [1, 1]} : vector<9x256xf32> to vector<1x256xf32>
    %27 = vector.broadcast %26 : vector<1x256xf32> to vector<4x256xf32>
    %28 = arith.mulf %25, %27 : vector<4x256xf32>
    %29 = arith.addf %23, %28 : vector<4x256xf32>
    %30 = vector.extract_strided_slice %22 {offsets = [4, 0], sizes = [4, 256], strides = [1, 1]} : vector<36x256xf32> to vector<4x256xf32>
    %c16_i32 = arith.constant 16 : i32
    %31 = tpu.dynamic_rotate %30 by %c16_i32 dim 1 : vector<4x256xf32>, i32 -> vector<4x256xf32>
    %32 = vector.extract_strided_slice %11 {offsets = [1, 0], sizes = [1, 256], strides = [1, 1]} : vector<9x256xf32> to vector<1x256xf32>
    %33 = vector.broadcast %32 : vector<1x256xf32> to vector<4x256xf32>
    %34 = arith.mulf %31, %33 : vector<4x256xf32>
    %35 = arith.addf %29, %34 : vector<4x256xf32>
    %36 = vector.extract_strided_slice %22 {offsets = [8, 0], sizes = [4, 256], strides = [1, 1]} : vector<36x256xf32> to vector<4x256xf32>
    %c15_i32 = arith.constant 15 : i32
    %37 = tpu.dynamic_rotate %36 by %c15_i32 dim 1 : vector<4x256xf32>, i32 -> vector<4x256xf32>
    %38 = vector.extract_strided_slice %11 {offsets = [2, 0], sizes = [1, 256], strides = [1, 1]} : vector<9x256xf32> to vector<1x256xf32>
    %39 = vector.broadcast %38 : vector<1x256xf32> to vector<4x256xf32>
    %40 = arith.mulf %37, %39 : vector<4x256xf32>
    %41 = arith.addf %35, %40 : vector<4x256xf32>
    %42 = vector.extract_strided_slice %22 {offsets = [12, 0], sizes = [4, 256], strides = [1, 1]} : vector<36x256xf32> to vector<4x256xf32>
    %c1_i32 = arith.constant 1 : i32
    %43 = tpu.dynamic_rotate %42 by %c1_i32 dim 1 : vector<4x256xf32>, i32 -> vector<4x256xf32>
    %44 = vector.extract_strided_slice %11 {offsets = [3, 0], sizes = [1, 256], strides = [1, 1]} : vector<9x256xf32> to vector<1x256xf32>
    %45 = vector.broadcast %44 : vector<1x256xf32> to vector<4x256xf32>
    %46 = arith.mulf %43, %45 : vector<4x256xf32>
    %47 = arith.addf %41, %46 : vector<4x256xf32>
    %48 = vector.extract_strided_slice %22 {offsets = [20, 0], sizes = [4, 256], strides = [1, 1]} : vector<36x256xf32> to vector<4x256xf32>
    %c255_i32 = arith.constant 255 : i32
    %49 = tpu.dynamic_rotate %48 by %c255_i32 dim 1 : vector<4x256xf32>, i32 -> vector<4x256xf32>
    %50 = vector.extract_strided_slice %11 {offsets = [5, 0], sizes = [1, 256], strides = [1, 1]} : vector<9x256xf32> to vector<1x256xf32>
    %51 = vector.broadcast %50 : vector<1x256xf32> to vector<4x256xf32>
    %52 = arith.mulf %49, %51 : vector<4x256xf32>
    %53 = arith.addf %47, %52 : vector<4x256xf32>
    %54 = vector.extract_strided_slice %22 {offsets = [24, 0], sizes = [4, 256], strides = [1, 1]} : vector<36x256xf32> to vector<4x256xf32>
    %c241_i32 = arith.constant 241 : i32
    %55 = tpu.dynamic_rotate %54 by %c241_i32 dim 1 : vector<4x256xf32>, i32 -> vector<4x256xf32>
    %56 = vector.extract_strided_slice %11 {offsets = [6, 0], sizes = [1, 256], strides = [1, 1]} : vector<9x256xf32> to vector<1x256xf32>
    %57 = vector.broadcast %56 : vector<1x256xf32> to vector<4x256xf32>
    %58 = arith.mulf %55, %57 : vector<4x256xf32>
    %59 = arith.addf %53, %58 : vector<4x256xf32>
    %60 = vector.extract_strided_slice %22 {offsets = [28, 0], sizes = [4, 256], strides = [1, 1]} : vector<36x256xf32> to vector<4x256xf32>
    %c240_i32 = arith.constant 240 : i32
    %61 = tpu.dynamic_rotate %60 by %c240_i32 dim 1 : vector<4x256xf32>, i32 -> vector<4x256xf32>
    %62 = vector.extract_strided_slice %11 {offsets = [7, 0], sizes = [1, 256], strides = [1, 1]} : vector<9x256xf32> to vector<1x256xf32>
    %63 = vector.broadcast %62 : vector<1x256xf32> to vector<4x256xf32>
    %64 = arith.mulf %61, %63 : vector<4x256xf32>
    %65 = arith.addf %59, %64 : vector<4x256xf32>
    %66 = vector.extract_strided_slice %22 {offsets = [32, 0], sizes = [4, 256], strides = [1, 1]} : vector<36x256xf32> to vector<4x256xf32>
    %c239_i32 = arith.constant 239 : i32
    %67 = tpu.dynamic_rotate %66 by %c239_i32 dim 1 : vector<4x256xf32>, i32 -> vector<4x256xf32>
    %68 = vector.extract_strided_slice %11 {offsets = [8, 0], sizes = [1, 256], strides = [1, 1]} : vector<9x256xf32> to vector<1x256xf32>
    %69 = vector.broadcast %68 : vector<1x256xf32> to vector<4x256xf32>
    %70 = arith.mulf %67, %69 : vector<4x256xf32>
    %71 = arith.addf %65, %70 : vector<4x256xf32>
    %72 = vector.broadcast %12 : vector<4x1xf32> to vector<4x256xf32>
    %73 = arith.addf %71, %72 : vector<4x256xf32>
    %cst_23 = arith.constant 0.000000e+00 : f32
    %74 = vector.broadcast %cst_23 : f32 to vector<4x256xf32>
    %75 = arith.maximumf %73, %74 : vector<4x256xf32>
    %76 = arith.truncf %75 : vector<4x256xf32> to vector<4x256xbf16>
    %cst_24 = arith.constant dense<0.000000e+00> : vector<4x256xf32>
    %77 = tpu.matmul %13, %76, %cst_24 {dimension_numbers = #tpu.dot_dimension_numbers<[1], [0], [0], [1], [0, 0, 1, 1], [], []>} : vector<4x4xbf16>, vector<4x256xbf16>, vector<4x256xf32> -> vector<4x256xf32>
    %78 = vector.broadcast %14 : vector<4x1xf32> to vector<4x256xf32>
    %79 = arith.addf %77, %78 : vector<4x256xf32>
    %cst_25 = arith.constant 5.000000e-01 : f32
    %80 = vector.broadcast %cst_25 : f32 to vector<4x256xf32>
    %81 = arith.mulf %80, %79 : vector<4x256xf32>
    %82 = math.tanh %81 : vector<4x256xf32>
    %cst_26 = arith.constant 1.000000e+00 : f32
    %83 = vector.broadcast %cst_26 : f32 to vector<4x256xf32>
    %84 = arith.addf %82, %83 : vector<4x256xf32>
    %cst_27 = arith.constant 5.000000e-01 : f32
    %85 = vector.broadcast %cst_27 : f32 to vector<4x256xf32>
    %86 = arith.mulf %85, %84 : vector<4x256xf32>
    %87 = vector.extract_strided_slice %0 {offsets = [0, 0], sizes = [4, 256], strides = [1, 1]} : vector<8x256xf32> to vector<4x256xf32>
    %88 = arith.mulf %87, %86 : vector<4x256xf32>
    %c0_28 = arith.constant 0 : index
    %c0_29 = arith.constant 0 : index
    %89 = vector.load %arg11[%c0_28, %c0_29] : memref<8x256xf32, #tpu.memory_space<vmem>>, vector<4x256xf32>
    tpu.vector_store %arg11[%c0_28, %c0_29], %88 {strides = array<i32>} : memref<8x256xf32, #tpu.memory_space<vmem>>, vector<4x256xf32>,
    %90 = vector.extract_strided_slice %1 {offsets = [4, 0], sizes = [4, 256], strides = [1, 1]} : vector<8x256xbf16> to vector<4x256xbf16>
    %cst_30 = arith.constant dense<0.000000e+00> : vector<36x256xf32>
    %91 = tpu.matmul %8, %90, %cst_30 {dimension_numbers = #tpu.dot_dimension_numbers<[1], [0], [0], [1], [0, 0, 1, 1], [], []>} : vector<36x4xbf16>, vector<4x256xbf16>, vector<36x256xf32> -> vector<36x256xf32>
    %92 = vector.extract_strided_slice %6 {offsets = [4, 0], sizes = [4, 256], strides = [1, 1]} : vector<8x256xbf16> to vector<4x256xbf16>
    %cst_31 = arith.constant dense<0.000000e+00> : vector<36x256xf32>
    %93 = tpu.matmul %9, %92, %cst_31 {dimension_numbers = #tpu.dot_dimension_numbers<[1], [0], [0], [1], [0, 0, 1, 1], [], []>} : vector<36x4xbf16>, vector<4x256xbf16>, vector<36x256xf32> -> vector<36x256xf32>
    %94 = arith.subf %91, %93 : vector<36x256xf32>
    %95 = vector.extract_strided_slice %7 {offsets = [4, 0], sizes = [4, 256], strides = [1, 1]} : vector<8x256xbf16> to vector<4x256xbf16>
    %cst_32 = arith.constant dense<0.000000e+00> : vector<36x256xf32>
    %96 = tpu.matmul %10, %95, %cst_32 {dimension_numbers = #tpu.dot_dimension_numbers<[1], [0], [0], [1], [0, 0, 1, 1], [], []>} : vector<36x4xbf16>, vector<4x256xbf16>, vector<36x256xf32> -> vector<36x256xf32>
    %97 = arith.subf %94, %96 : vector<36x256xf32>
    %98 = vector.extract_strided_slice %97 {offsets = [16, 0], sizes = [4, 256], strides = [1, 1]} : vector<36x256xf32> to vector<4x256xf32>
    %99 = vector.extract_strided_slice %97 {offsets = [0, 0], sizes = [4, 256], strides = [1, 1]} : vector<36x256xf32> to vector<4x256xf32>
    %c17_i32_33 = arith.constant 17 : i32
    %100 = tpu.dynamic_rotate %99 by %c17_i32_33 dim 1 : vector<4x256xf32>, i32 -> vector<4x256xf32>
    %101 = vector.extract_strided_slice %11 {offsets = [0, 0], sizes = [1, 256], strides = [1, 1]} : vector<9x256xf32> to vector<1x256xf32>
    %102 = vector.broadcast %101 : vector<1x256xf32> to vector<4x256xf32>
    %103 = arith.mulf %100, %102 : vector<4x256xf32>
    %104 = arith.addf %98, %103 : vector<4x256xf32>
    %105 = vector.extract_strided_slice %97 {offsets = [4, 0], sizes = [4, 256], strides = [1, 1]} : vector<36x256xf32> to vector<4x256xf32>
    %c16_i32_34 = arith.constant 16 : i32
    %106 = tpu.dynamic_rotate %105 by %c16_i32_34 dim 1 : vector<4x256xf32>, i32 -> vector<4x256xf32>
    %107 = vector.extract_strided_slice %11 {offsets = [1, 0], sizes = [1, 256], strides = [1, 1]} : vector<9x256xf32> to vector<1x256xf32>
    %108 = vector.broadcast %107 : vector<1x256xf32> to vector<4x256xf32>
    %109 = arith.mulf %106, %108 : vector<4x256xf32>
    %110 = arith.addf %104, %109 : vector<4x256xf32>
    %111 = vector.extract_strided_slice %97 {offsets = [8, 0], sizes = [4, 256], strides = [1, 1]} : vector<36x256xf32> to vector<4x256xf32>
    %c15_i32_35 = arith.constant 15 : i32
    %112 = tpu.dynamic_rotate %111 by %c15_i32_35 dim 1 : vector<4x256xf32>, i32 -> vector<4x256xf32>
    %113 = vector.extract_strided_slice %11 {offsets = [2, 0], sizes = [1, 256], strides = [1, 1]} : vector<9x256xf32> to vector<1x256xf32>
    %114 = vector.broadcast %113 : vector<1x256xf32> to vector<4x256xf32>
    %115 = arith.mulf %112, %114 : vector<4x256xf32>
    %116 = arith.addf %110, %115 : vector<4x256xf32>
    %117 = vector.extract_strided_slice %97 {offsets = [12, 0], sizes = [4, 256], strides = [1, 1]} : vector<36x256xf32> to vector<4x256xf32>
    %c1_i32_36 = arith.constant 1 : i32
    %118 = tpu.dynamic_rotate %117 by %c1_i32_36 dim 1 : vector<4x256xf32>, i32 -> vector<4x256xf32>
    %119 = vector.extract_strided_slice %11 {offsets = [3, 0], sizes = [1, 256], strides = [1, 1]} : vector<9x256xf32> to vector<1x256xf32>
    %120 = vector.broadcast %119 : vector<1x256xf32> to vector<4x256xf32>
    %121 = arith.mulf %118, %120 : vector<4x256xf32>
    %122 = arith.addf %116, %121 : vector<4x256xf32>
    %123 = vector.extract_strided_slice %97 {offsets = [20, 0], sizes = [4, 256], strides = [1, 1]} : vector<36x256xf32> to vector<4x256xf32>
    %c255_i32_37 = arith.constant 255 : i32
    %124 = tpu.dynamic_rotate %123 by %c255_i32_37 dim 1 : vector<4x256xf32>, i32 -> vector<4x256xf32>
    %125 = vector.extract_strided_slice %11 {offsets = [5, 0], sizes = [1, 256], strides = [1, 1]} : vector<9x256xf32> to vector<1x256xf32>
    %126 = vector.broadcast %125 : vector<1x256xf32> to vector<4x256xf32>
    %127 = arith.mulf %124, %126 : vector<4x256xf32>
    %128 = arith.addf %122, %127 : vector<4x256xf32>
    %129 = vector.extract_strided_slice %97 {offsets = [24, 0], sizes = [4, 256], strides = [1, 1]} : vector<36x256xf32> to vector<4x256xf32>
    %c241_i32_38 = arith.constant 241 : i32
    %130 = tpu.dynamic_rotate %129 by %c241_i32_38 dim 1 : vector<4x256xf32>, i32 -> vector<4x256xf32>
    %131 = vector.extract_strided_slice %11 {offsets = [6, 0], sizes = [1, 256], strides = [1, 1]} : vector<9x256xf32> to vector<1x256xf32>
    %132 = vector.broadcast %131 : vector<1x256xf32> to vector<4x256xf32>
    %133 = arith.mulf %130, %132 : vector<4x256xf32>
    %134 = arith.addf %128, %133 : vector<4x256xf32>
    %135 = vector.extract_strided_slice %97 {offsets = [28, 0], sizes = [4, 256], strides = [1, 1]} : vector<36x256xf32> to vector<4x256xf32>
    %c240_i32_39 = arith.constant 240 : i32
    %136 = tpu.dynamic_rotate %135 by %c240_i32_39 dim 1 : vector<4x256xf32>, i32 -> vector<4x256xf32>
    %137 = vector.extract_strided_slice %11 {offsets = [7, 0], sizes = [1, 256], strides = [1, 1]} : vector<9x256xf32> to vector<1x256xf32>
    %138 = vector.broadcast %137 : vector<1x256xf32> to vector<4x256xf32>
    %139 = arith.mulf %136, %138 : vector<4x256xf32>
    %140 = arith.addf %134, %139 : vector<4x256xf32>
    %141 = vector.extract_strided_slice %97 {offsets = [32, 0], sizes = [4, 256], strides = [1, 1]} : vector<36x256xf32> to vector<4x256xf32>
    %c239_i32_40 = arith.constant 239 : i32
    %142 = tpu.dynamic_rotate %141 by %c239_i32_40 dim 1 : vector<4x256xf32>, i32 -> vector<4x256xf32>
    %143 = vector.extract_strided_slice %11 {offsets = [8, 0], sizes = [1, 256], strides = [1, 1]} : vector<9x256xf32> to vector<1x256xf32>
    %144 = vector.broadcast %143 : vector<1x256xf32> to vector<4x256xf32>
    %145 = arith.mulf %142, %144 : vector<4x256xf32>
    %146 = arith.addf %140, %145 : vector<4x256xf32>
    %147 = vector.broadcast %12 : vector<4x1xf32> to vector<4x256xf32>
    %148 = arith.addf %146, %147 : vector<4x256xf32>
    %cst_41 = arith.constant 0.000000e+00 : f32
    %149 = vector.broadcast %cst_41 : f32 to vector<4x256xf32>
    %150 = arith.maximumf %148, %149 : vector<4x256xf32>
    %151 = arith.truncf %150 : vector<4x256xf32> to vector<4x256xbf16>
    %cst_42 = arith.constant dense<0.000000e+00> : vector<4x256xf32>
    %152 = tpu.matmul %13, %151, %cst_42 {dimension_numbers = #tpu.dot_dimension_numbers<[1], [0], [0], [1], [0, 0, 1, 1], [], []>} : vector<4x4xbf16>, vector<4x256xbf16>, vector<4x256xf32> -> vector<4x256xf32>
    %153 = vector.broadcast %14 : vector<4x1xf32> to vector<4x256xf32>
    %154 = arith.addf %152, %153 : vector<4x256xf32>
    %cst_43 = arith.constant 5.000000e-01 : f32
    %155 = vector.broadcast %cst_43 : f32 to vector<4x256xf32>
    %156 = arith.mulf %155, %154 : vector<4x256xf32>
    %157 = math.tanh %156 : vector<4x256xf32>
    %cst_44 = arith.constant 1.000000e+00 : f32
    %158 = vector.broadcast %cst_44 : f32 to vector<4x256xf32>
    %159 = arith.addf %157, %158 : vector<4x256xf32>
    %cst_45 = arith.constant 5.000000e-01 : f32
    %160 = vector.broadcast %cst_45 : f32 to vector<4x256xf32>
    %161 = arith.mulf %160, %159 : vector<4x256xf32>
    %162 = vector.extract_strided_slice %0 {offsets = [4, 0], sizes = [4, 256], strides = [1, 1]} : vector<8x256xf32> to vector<4x256xf32>
    %163 = arith.mulf %162, %161 : vector<4x256xf32>
    %c4 = arith.constant 4 : index
    %c0_46 = arith.constant 0 : index
    %164 = vector.load %arg11[%c4, %c0_46] : memref<8x256xf32, #tpu.memory_space<vmem>>, vector<4x256xf32>
    tpu.vector_store %arg11[%c4, %c0_46], %163 {strides = array<i32>} : memref<8x256xf32, #tpu.memory_space<vmem>>, vector<4x256xf32>,
    return
  }
  func.func @transform_0(%arg0: i32) -> (i32, i32) {
    %c0_i32 = arith.constant 0 : i32
    %c0_i32_0 = arith.constant 0 : i32
    return %arg0, %c0_i32 : i32, i32
  }
  func.func @transform_1(%arg0: i32) -> (i32, i32) {
    %c0_i32 = arith.constant 0 : i32
    %c0_i32_0 = arith.constant 0 : i32
    %c0_i32_1 = arith.constant 0 : i32
    return %c0_i32, %c0_i32_0 : i32, i32
  }
  func.func @transform_2(%arg0: i32) -> (i32, i32) {
    %c0_i32 = arith.constant 0 : i32
    %c0_i32_0 = arith.constant 0 : i32
    %c0_i32_1 = arith.constant 0 : i32
    return %c0_i32, %c0_i32_0 : i32, i32
  }
  func.func @transform_3(%arg0: i32) -> (i32, i32) {
    %c0_i32 = arith.constant 0 : i32
    %c0_i32_0 = arith.constant 0 : i32
    %c0_i32_1 = arith.constant 0 : i32
    return %c0_i32, %c0_i32_0 : i32, i32
  }
  func.func @transform_4(%arg0: i32) -> (i32, i32) {
    %c0_i32 = arith.constant 0 : i32
    %c0_i32_0 = arith.constant 0 : i32
    %c0_i32_1 = arith.constant 0 : i32
    return %c0_i32, %c0_i32_0 : i32, i32
  }
  func.func @transform_5(%arg0: i32) -> (i32, i32) {
    %c0_i32 = arith.constant 0 : i32
    %c0_i32_0 = arith.constant 0 : i32
    %c0_i32_1 = arith.constant 0 : i32
    return %c0_i32, %c0_i32_0 : i32, i32
  }
  func.func @transform_6(%arg0: i32) -> (i32, i32) {
    %c0_i32 = arith.constant 0 : i32
    %c0_i32_0 = arith.constant 0 : i32
    %c0_i32_1 = arith.constant 0 : i32
    return %c0_i32, %c0_i32_0 : i32, i32
  }
  func.func @transform_7(%arg0: i32) -> (i32, i32) {
    %c0_i32 = arith.constant 0 : i32
    %c0_i32_0 = arith.constant 0 : i32
    %c0_i32_1 = arith.constant 0 : i32
    return %c0_i32, %c0_i32_0 : i32, i32
  }
  func.func @transform_8(%arg0: i32) -> (i32, i32) {
    %c0_i32 = arith.constant 0 : i32
    %c0_i32_0 = arith.constant 0 : i32
    %c0_i32_1 = arith.constant 0 : i32
    return %c0_i32, %c0_i32_0 : i32, i32
  }
  func.func @transform_9(%arg0: i32) -> (i32, i32) {
    %c0_i32 = arith.constant 0 : i32
    %c0_i32_0 = arith.constant 0 : i32
    %c0_i32_1 = arith.constant 0 : i32
    return %c0_i32, %c0_i32_0 : i32, i32
  }
  func.func @transform_10(%arg0: i32) -> (i32, i32) {
    %c0_i32 = arith.constant 0 : i32
    %c0_i32_0 = arith.constant 0 : i32
    return %arg0, %c0_i32 : i32, i32
  }
}

</mosaic_0001>

<bundles_post_ra>
// kernel: tpu_custom_call.1
= control target key start
LH: loop header
LB: loop body
LE: loop exit
PB: predicated region body
PF: predicated region fallthrough
CT: control target
= control target key end

     0   :  { %15 = vsyncpa [#allocation3], 0  ;;  %s2369_s0 = inlined_call_operand.vmem [shape: f32[8,256], index: 0, kind: input, shape index: {}]   ;;  %s2370_s1 = inlined_call_operand.hbm [shape: bf16[256,256], index: 1, kind: input, shape index: {}]   ;;  %s2371_s2 = inlined_call_operand.hbm [shape: bf16[256,256], index: 2, kind: input, shape index: {}]   ;;  %s2372_s3 = inlined_call_operand.vmem [shape: bf16[36,4], index: 3, kind: input, shape index: {}]   ;;  %s2373_s4 = inlined_call_operand.vmem [shape: bf16[36,4], index: 4, kind: input, shape index: {}]   ;;  %s2374_s5 = inlined_call_operand.vmem [shape: bf16[36,4], index: 5, kind: input, shape index: {}]   ;;  %s2375_s6 = inlined_call_operand.vmem [shape: f32[9,256], index: 6, kind: input, shape index: {}]   ;;  %s2376_s7 = inlined_call_operand.vmem [shape: f32[4,1], index: 7, kind: input, shape index: {}]   ;;  %s2377_s8 = inlined_call_operand.vmem [shape: bf16[4,4], index: 8, kind: input, shape index: {}]   ;;  %s2378_s9 = inlined_call_operand.vmem [shape: f32[4,1], index: 9, kind: input, shape index: {}]   ;;  %s2379_s10 = inlined_call_operand.hbm [shape: f32[8,256], index: 10, kind: output, shape index: {}]  }
   0x1   :  { %16 = vsyncpa [#allocation6], 0 }
   0x2   :  { %17 = vsyncpa [#allocation4], 0  ;;  %s24_s15 = sshll.u32 %s2370_s1, 4  ;;  %s1894_s16 = smov [#allocation2]   ;;  %s25_s15 = int_to_ptr.hbm [resolvable:$true] %s24_s15 }
   0x3   :  { %s26_s17 = sshll.u32 %s1894_s16, 4  ;;  %s37_s20 = sshll.u32 %s2371_s2, 4  ;;  %s27_s17 = int_to_ptr.vmem [resolvable:$true] %s26_s17  ;;  %s38_s20 = int_to_ptr.hbm [resolvable:$true] %s37_s20 }
   0x4   :  { %s1895_s21 = smov 128   ;;  %s1896_s22 = smov 8  }
   0x5   :  { %32 = dma.hbm_to_vmem [thread:$0]  %s25_s15, 4096, %s27_s17, [#allocation3], %s1895_s21, %s1895_s21, %s1896_s22  }
   0x6   :  { %s1897_s23 = smov [#allocation5]  }
   0x7   :  { %s39_s24 = sshll.u32 %s1897_s23, 4  ;;  %s40_s24 = int_to_ptr.vmem [resolvable:$true] %s39_s24 }
   0x8   :  { %45 = dma.hbm_to_vmem [thread:$0]  %s38_s20, 4096, %s40_s24, [#allocation6], %s1895_s21, %s1895_s21, %s1896_s22  }
   0x9   :  { %1888 = dma.done.wait [#allocation3], 4096  }
   0xa   :  { %1889 = vsyncadd [#allocation3], 4294963200 }
   0xb   :  { %1890 = dma.done.wait [#allocation6], 4096  }
   0xc   :  { %1891 = vsyncadd [#allocation6], 4294963200  ;;  %v1456_v0 = vld [vmem:[#allocation2 + $0x70] sm:$0xf]  ;;  %v1733_v1 = vld [vmem:[#allocation2 + $0x74] sm:$0xf0] }
   0xd   :  { %v1520_v2 = vld [vmem:[#allocation2 + $0xf0] sm:$0xf]  ;;  %v1457_v3 = vor.u32 %v1733_v1, %v1456_v0  ;;  %v1749_v4 = vld [vmem:[#allocation2 + $0xf4] sm:$0xf0]  ;;  %v1732_v5 = vld [vmem:[#allocation2 + $0x74] sm:$0xf] }
   0xe   :  { %v1458_v6 = vld [vmem:[#allocation2 + $0x78] sm:$0xf0]  ;;  %v1521_v7 = vor.u32 %v1749_v4, %v1520_v2  ;;  %v1748_v9 = vld [vmem:[#allocation2 + $0xf4] sm:$0xf]  ;;  %v1448_v11 = vld [vmem:[#allocation2 + $0x60] sm:$0xf] }
   0xf   :  { %v1461_v8 = vor.u32 %v1732_v5, %v1458_v6  ;;  %v1522_v10 = vld [vmem:[#allocation2 + $0xf8] sm:$0xf0]  ;;  %271 = vmatpush.bf16.msra.mxu0 %v1457_v3  ;;  %v1731_v13 = vld [vmem:[#allocation2 + $0x64] sm:$0xf0]  ;;  %v1512_v14 = vld [vmem:[#allocation2 + $0xe0] sm:$0xf] }
  0x10   :  { %v1525_v12 = vor.u32 %v1748_v9, %v1522_v10  ;;  %v1747_v15 = vld [vmem:[#allocation2 + $0xe4] sm:$0xf0]  ;;  %284 = vmatpush.bf16.msra.mxu1 %v1521_v7  ;;  %v1449_v16 = vor.u32 %v1731_v13, %v1448_v11  ;;  %v1730_v18 = vld [vmem:[#allocation2 + $0x64] sm:$0xf]  ;;  %v1450_v19 = vld [vmem:[#allocation2 + $0x68] sm:$0xf0] }
  0x11   :  { %297 = vmatpush.bf16.msra.mxu2 %v1461_v8  ;;  %v1513_v17 = vor.u32 %v1747_v15, %v1512_v14  ;;  %v1746_v20 = vld [vmem:[#allocation2 + $0xe4] sm:$0xf]  ;;  %v1453_v21 = vor.u32 %v1730_v18, %v1450_v19  ;;  %v1514_v22 = vld [vmem:[#allocation2 + $0xe8] sm:$0xf0]  ;;  %v1440_v23 = vld [vmem:[#allocation2 + $0x50] sm:$0xf] }
  0x12   :  { %310 = vmatpush.bf16.msra.mxu3 %v1525_v12  ;;  %v1729_v24 = vld [vmem:[#allocation2 + $0x54] sm:$0xf0]  ;;  %v1517_v25 = vor.u32 %v1746_v20, %v1514_v22  ;;  %v1504_v26 = vld [vmem:[#allocation2 + $0xd0] sm:$0xf]  ;;  %v1728_v28 = vld [vmem:[#allocation2 + $0x54] sm:$0xf] }
  0x13   :  { %v1745_v27 = vld [vmem:[#allocation2 + $0xd4] sm:$0xf0]  ;;  %272 = vmatpush.bf16.msra.mxu0 %v1449_v16  ;;  %v1441_v29 = vor.u32 %v1729_v24, %v1440_v23  ;;  %v1442_v30 = vld [vmem:[#allocation2 + $0x58] sm:$0xf0]  ;;  %v1744_v31 = vld [vmem:[#allocation2 + $0xd4] sm:$0xf] }
  0x14   :  { %v1506_v32 = vld [vmem:[#allocation2 + $0xd8] sm:$0xf0]  ;;  %285 = vmatpush.bf16.msra.mxu1 %v1513_v17  ;;  %v1505_v33 = vor.u32 %v1745_v27, %v1504_v26  ;;  %v1445_v34 = vor.u32 %v1728_v28, %v1442_v30  ;;  %v1432_v35 = vld [vmem:[#allocation2 + $0x40] sm:$0xf]  ;;  %v1727_v36 = vld [vmem:[#allocation2 + $0x44] sm:$0xf0] }
  0x15   :  { %298 = vmatpush.bf16.msra.mxu2 %v1453_v21  ;;  %v1496_v37 = vld [vmem:[#allocation2 + $0xc0] sm:$0xf]  ;;  %v1509_v38 = vor.u32 %v1744_v31, %v1506_v32  ;;  %v1743_v39 = vld [vmem:[#allocation2 + $0xc4] sm:$0xf0]  ;;  %v1726_v40 = vld [vmem:[#allocation2 + $0x44] sm:$0xf]  ;;  %v1433_v44 = vor.u32 %v1727_v36, %v1432_v35 }
  0x16   :  { %311 = vmatpush.bf16.msra.mxu3 %v1517_v25  ;;  %v1434_v41 = vld [vmem:[#allocation2 + $0x48] sm:$0xf0]  ;;  %v1742_v42 = vld [vmem:[#allocation2 + $0xc4] sm:$0xf]  ;;  %v1497_v45 = vor.u32 %v1743_v39, %v1496_v37  ;;  %v1424_v47 = vld [vmem:[#allocation2 + $0x30] sm:$0xf] }
  0x17   :  { %v1498_v43 = vld [vmem:[#allocation2 + $0xc8] sm:$0xf0]  ;;  %273 = vmatpush.bf16.msra.mxu0 %v1441_v29  ;;  %v1437_v46 = vor.u32 %v1726_v40, %v1434_v41  ;;  %v1725_v48 = vld [vmem:[#allocation2 + $0x34] sm:$0xf0]  ;;  %v1488_v49 = vld [vmem:[#allocation2 + $0xb0] sm:$0xf] }
  0x18   :  { %286 = vmatpush.bf16.msra.mxu1 %v1505_v33  ;;  %v1501_v50 = vor.u32 %v1742_v42, %v1498_v43  ;;  %v1741_v51 = vld [vmem:[#allocation2 + $0xb4] sm:$0xf0]  ;;  %v1724_v52 = vld [vmem:[#allocation2 + $0x34] sm:$0xf]  ;;  %v1426_v53 = vld [vmem:[#allocation2 + $0x38] sm:$0xf0]  ;;  %v1425_v56 = vor.u32 %v1725_v48, %v1424_v47 }
  0x19   :  { %299 = vmatpush.bf16.msra.mxu2 %v1445_v34  ;;  %v1740_v54 = vld [vmem:[#allocation2 + $0xb4] sm:$0xf]  ;;  %v1490_v55 = vld [vmem:[#allocation2 + $0xb8] sm:$0xf0]  ;;  %v1489_v57 = vor.u32 %v1741_v51, %v1488_v49  ;;  %v1429_v58 = vor.u32 %v1724_v52, %v1426_v53  ;;  %v1416_v59 = vld [vmem:[#allocation2 + $0x20] sm:$0xf] }
  0x1a   :  { %312 = vmatpush.bf16.msra.mxu3 %v1509_v38  ;;  %v1723_v60 = vld [vmem:[#allocation2 + $0x24] sm:$0xf0]  ;;  %v1480_v61 = vld [vmem:[#allocation2 + $0xa0] sm:$0xf]  ;;  %v1493_v62 = vor.u32 %v1740_v54, %v1490_v55  ;;  %v1722_v0 = vld [vmem:[#allocation2 + $0x24] sm:$0xf] }
  0x1b   :  { %274 = vmatpush.bf16.msra.mxu0 %v1433_v44  ;;  %v1739_v63 = vld [vmem:[#allocation2 + $0xa4] sm:$0xf0]  ;;  %v1418_v1 = vld [vmem:[#allocation2 + $0x28] sm:$0xf0]  ;;  %v1738_v2 = vld [vmem:[#allocation2 + $0xa4] sm:$0xf]  ;;  %v1417_v4 = vor.u32 %v1723_v60, %v1416_v59 }
  0x1c   :  { %287 = vmatpush.bf16.msra.mxu1 %v1497_v45  ;;  %v1482_v3 = vld [vmem:[#allocation2 + $0xa8] sm:$0xf0]  ;;  %v1481_v5 = vor.u32 %v1739_v63, %v1480_v61  ;;  %v1421_v6 = vor.u32 %v1722_v0, %v1418_v1  ;;  %v1408_v7 = vld [vmem:[#allocation2 + $0x10] sm:$0xf]  ;;  %v1721_v8 = vld [vmem:[#allocation2 + $0x14] sm:$0xf0] }
  0x1d   :  { %300 = vmatpush.bf16.msra.mxu2 %v1437_v46  ;;  %v1472_v9 = vld [vmem:[#allocation2 + $0x90] sm:$0xf]  ;;  %v1485_v10 = vor.u32 %v1738_v2, %v1482_v3  ;;  %v1737_v11 = vld [vmem:[#allocation2 + $0x94] sm:$0xf0]  ;;  %v1720_v12 = vld [vmem:[#allocation2 + $0x14] sm:$0xf]  ;;  %v1409_v17 = vor.u32 %v1721_v8, %v1408_v7 }
  0x1e   :  { %313 = vmatpush.bf16.msra.mxu3 %v1501_v50  ;;  %v1410_v13 = vld [vmem:[#allocation2 + $0x18] sm:$0xf0]  ;;  %v1736_v14 = vld [vmem:[#allocation2 + $0x94] sm:$0xf]  ;;  %v1400_v16 = vld [vmem:[#allocation2] sm:$0xf]  ;;  %v1473_v21 = vor.u32 %v1737_v11, %v1472_v9 }
  0x1f   :  { %275 = vmatpush.bf16.msra.mxu0 %v1425_v56  ;;  %v1474_v15 = vld [vmem:[#allocation2 + $0x98] sm:$0xf0]  ;;  %v1719_v18 = vld [vmem:[#allocation2 + $0x4] sm:$0xf0]  ;;  %v1464_v19 = vld [vmem:[#allocation2 + $0x80] sm:$0xf]  ;;  %v1413_v22 = vor.u32 %v1720_v12, %v1410_v13 }
  0x20   :  { %288 = vmatpush.bf16.msra.mxu1 %v1489_v57  ;;  %v1735_v20 = vld [vmem:[#allocation2 + $0x84] sm:$0xf0]  ;;  %v1718_v23 = vld [vmem:[#allocation2 + $0x4] sm:$0xf]  ;;  %v1477_v26 = vor.u32 %v1736_v14, %v1474_v15  ;;  %v1402_v27 = vld [vmem:[#allocation2 + $0x8] sm:$0xf0]  ;;  %v1401_v34 = vor.u32 %v1719_v18, %v1400_v16 }
  0x21   :  { %301 = vmatpush.bf16.msra.mxu2 %v1429_v58  ;;  %v69_v24 = vld [vmem:[%s2369_s0] sm:$0xff]  ;;  %v70_v25 = vld [vmem:[%s2369_s0 + $0x8] sm:$0xff]  ;;  %v1584_v31 = vld [vmem:[#allocation5 + $0x70] sm:$0xf]  ;;  %v1465_v39 = vor.u32 %v1735_v20, %v1464_v19  ;;  %v1405_v40 = vor.u32 %v1718_v23, %v1402_v27  ;;  %vm614_vm0 = vcmask 1041408   ;;  %vm604_vm1 = vcmask 31744  }
  0x22   :  { %314 = vmatpush.bf16.msra.mxu3 %v1493_v62  ;;  %v1734_v28 = vld [vmem:[#allocation2 + $0x84] sm:$0xf]  ;;  %v1466_v29 = vld [vmem:[#allocation2 + $0x88] sm:$0xf0]  ;;  %v71_v30 = vpack.c.bf16 %v70_v25, %v69_v24  ;;  %v1765_v32 = vld [vmem:[#allocation5 + $0x74] sm:$0xf0] }
  0x23   :  { %276 = vmatpush.bf16.msra.mxu0 %v1417_v4  ;;  %v1648_v33 = vld [vmem:[#allocation5 + $0xf0] sm:$0xf]  ;;  %v1781_v35 = vld [vmem:[#allocation5 + $0xf4] sm:$0xf0]  ;;  %v1764_v36 = vld [vmem:[#allocation5 + $0x74] sm:$0xf]  ;;  %v1469_v44 = vor.u32 %v1734_v28, %v1466_v29  ;;  %v1585_v45 = vor.u32 %v1765_v32, %v1584_v31 }
  0x24   :  { %289 = vmatpush.bf16.msra.mxu1 %v1481_v5  ;;  %v1586_v37 = vld [vmem:[#allocation5 + $0x78] sm:$0xf0]  ;;  %v105_v38 = vunpack.c.l.b16 %v71_v30  ;;  %v1780_v41 = vld [vmem:[#allocation5 + $0xf4] sm:$0xf]  ;;  %v106_v43 = vunpack.c.h.b16 %v71_v30  ;;  %v1649_v46 = vor.u32 %v1781_v35, %v1648_v33  ;;  %v1576_v48 = vld [vmem:[#allocation5 + $0x60] sm:$0xf] }
  0x25   :  { %302 = vmatpush.bf16.msra.mxu2 %v1421_v6  ;;  %v1650_v42 = vld [vmem:[#allocation5 + $0xf8] sm:$0xf0]  ;;  %v1589_v47 = vor.u32 %v1764_v36, %v1586_v37  ;;  %v1763_v49 = vld [vmem:[#allocation5 + $0x64] sm:$0xf0]  ;;  %v1640_v50 = vld [vmem:[#allocation5 + $0xe0] sm:$0xf] }
  0x26   :  { %315 = vmatpush.bf16.msra.mxu3 %v1485_v10  ;;  %v1653_v51 = vor.u32 %v1780_v41, %v1650_v42  ;;  %v1975_v52 = vpack.c.b16 %v105_v38, %v105_v38  ;;  %v1779_v53 = vld [vmem:[#allocation5 + $0xe4] sm:$0xf0]  ;;  %v1762_v54 = vld [vmem:[#allocation5 + $0x64] sm:$0xf]  ;;  %v1578_v55 = vld [vmem:[#allocation5 + $0x68] sm:$0xf0]  ;;  %v1977_v56 = vpack.c.b16 %v106_v43, %v106_v43  ;;  %v1577_v59 = vor.u32 %v1763_v49, %v1576_v48 }
  0x27   :  { %277 = vmatpush.bf16.msra.mxu0 %v1409_v17  ;;  %v1778_v57 = vld [vmem:[#allocation5 + $0xe4] sm:$0xf]  ;;  %v1642_v58 = vld [vmem:[#allocation5 + $0xe8] sm:$0xf0]  ;;  %v1641_v60 = vor.u32 %v1779_v53, %v1640_v50  ;;  %v1581_v61 = vor.u32 %v1762_v54, %v1578_v55  ;;  %v1568_v62 = vld [vmem:[#allocation5 + $0x50] sm:$0xf] }
  0x28   :  { %290 = vmatpush.bf16.msra.mxu1 %v1473_v21  ;;  %v1761_v63 = vld [vmem:[#allocation5 + $0x54] sm:$0xf0]  ;;  %v1632_v0 = vld [vmem:[#allocation5 + $0xd0] sm:$0xf]  ;;  %v1645_v1 = vor.u32 %v1778_v57, %v1642_v58  ;;  %v1760_v3 = vld [vmem:[#allocation5 + $0x54] sm:$0xf] }
  0x29   :  { %303 = vmatpush.bf16.msra.mxu2 %v1413_v22  ;;  %v1777_v2 = vld [vmem:[#allocation5 + $0xd4] sm:$0xf0]  ;;  %v1570_v4 = vld [vmem:[#allocation5 + $0x58] sm:$0xf0]  ;;  %v1776_v5 = vld [vmem:[#allocation5 + $0xd4] sm:$0xf]  ;;  %v1569_v7 = vor.u32 %v1761_v63, %v1568_v62 }
  0x2a   :  { %316 = vmatpush.bf16.msra.mxu3 %v1477_v26  ;;  %v1634_v6 = vld [vmem:[#allocation5 + $0xd8] sm:$0xf0]  ;;  %v1633_v8 = vor.u32 %v1777_v2, %v1632_v0  ;;  %v1573_v9 = vor.u32 %v1760_v3, %v1570_v4  ;;  %v1560_v10 = vld [vmem:[#allocation5 + $0x40] sm:$0xf]  ;;  %v1759_v11 = vld [vmem:[#allocation5 + $0x44] sm:$0xf0] }
  0x2b   :  { %278 = vmatpush.bf16.msra.mxu0 %v1401_v34  ;;  %v1624_v12 = vld [vmem:[#allocation5 + $0xc0] sm:$0xf]  ;;  %v1637_v13 = vor.u32 %v1776_v5, %v1634_v6  ;;  %v1775_v14 = vld [vmem:[#allocation5 + $0xc4] sm:$0xf0]  ;;  %v1758_v15 = vld [vmem:[#allocation5 + $0x44] sm:$0xf]  ;;  %v1561_v19 = vor.u32 %v1759_v11, %v1560_v10 }
  0x2c   :  { %291 = vmatpush.bf16.msra.mxu1 %v1465_v39  ;;  %v1562_v16 = vld [vmem:[#allocation5 + $0x48] sm:$0xf0]  ;;  %v1774_v17 = vld [vmem:[#allocation5 + $0xc4] sm:$0xf]  ;;  %v1552_v20 = vld [vmem:[#allocation5 + $0x30] sm:$0xf]  ;;  %v1625_v21 = vor.u32 %v1775_v14, %v1624_v12 }
  0x2d   :  { %304 = vmatpush.bf16.msra.mxu2 %v1405_v40  ;;  %v1626_v18 = vld [vmem:[#allocation5 + $0xc8] sm:$0xf0]  ;;  %v1565_v22 = vor.u32 %v1758_v15, %v1562_v16  ;;  %v1757_v23 = vld [vmem:[#allocation5 + $0x34] sm:$0xf0]  ;;  %v1616_v24 = vld [vmem:[#allocation5 + $0xb0] sm:$0xf] }
  0x2e   :  { %317 = vmatpush.bf16.msra.mxu3 %v1469_v44  ;;  %279 = vmatmul.bf16.vlgmr.msra.gmra.mxu0 %v1975_v52  ;;  %v1773_v25 = vld [vmem:[#allocation5 + $0xb4] sm:$0xf0]  ;;  %v1629_v26 = vor.u32 %v1774_v17, %v1626_v18  ;;  %v1756_v27 = vld [vmem:[#allocation5 + $0x34] sm:$0xf]  ;;  %v1554_v28 = vld [vmem:[#allocation5 + $0x38] sm:$0xf0]  ;;  %v1553_v31 = vor.u32 %v1757_v23, %v1552_v20 }
  0x2f   :  { %515 = vmatpush.bf16.msrb.mxu0 %v1585_v45  ;;  %292 = vmatmul.bf16.vlgmr.msra.gmra.mxu1 %v1977_v56  ;;  %v1772_v29 = vld [vmem:[#allocation5 + $0xb4] sm:$0xf]  ;;  %v1618_v30 = vld [vmem:[#allocation5 + $0xb8] sm:$0xf0]  ;;  %v1617_v32 = vor.u32 %v1773_v25, %v1616_v24  ;;  %v1557_v33 = vor.u32 %v1756_v27, %v1554_v28  ;;  %v1544_v34 = vld [vmem:[#allocation5 + $0x20] sm:$0xf] }
  0x30   :  { %528 = vmatpush.bf16.msrb.mxu1 %v1649_v46  ;;  %305 = vmatmul.bf16.vlgmr.msra.gmra.mxu2 %v1975_v52  ;;  %v1755_v35 = vld [vmem:[#allocation5 + $0x24] sm:$0xf0]  ;;  %v1608_v36 = vld [vmem:[#allocation5 + $0xa0] sm:$0xf]  ;;  %v1621_v37 = vor.u32 %v1772_v29, %v1618_v30  ;;  %v1754_v39 = vld [vmem:[#allocation5 + $0x24] sm:$0xf] }
  0x31   :  { %541 = vmatpush.bf16.msrb.mxu2 %v1589_v47  ;;  %318 = vmatmul.bf16.vlgmr.msra.gmra.mxu3 %v1977_v56  ;;  %v1771_v38 = vld [vmem:[#allocation5 + $0xa4] sm:$0xf0]  ;;  %v1546_v40 = vld [vmem:[#allocation5 + $0x28] sm:$0xf0]  ;;  %v1770_v41 = vld [vmem:[#allocation5 + $0xa4] sm:$0xf]  ;;  %v1545_v43 = vor.u32 %v1755_v35, %v1544_v34 }
  0x32   :  { %554 = vmatpush.bf16.msrb.mxu3 %v1653_v51  ;;  %v1610_v42 = vld [vmem:[#allocation5 + $0xa8] sm:$0xf0]  ;;  %v1609_v44 = vor.u32 %v1771_v38, %v1608_v36  ;;  %v1549_v45 = vor.u32 %v1754_v39, %v1546_v40  ;;  %v1536_v46 = vld [vmem:[#allocation5 + $0x10] sm:$0xf]  ;;  %v1753_v47 = vld [vmem:[#allocation5 + $0x14] sm:$0xf0] }
  0x33   :  { %516 = vmatpush.bf16.msrb.mxu0 %v1577_v59  ;;  %v1600_v48 = vld [vmem:[#allocation5 + $0x90] sm:$0xf]  ;;  %v1613_v49 = vor.u32 %v1770_v41, %v1610_v42  ;;  %v1769_v50 = vld [vmem:[#allocation5 + $0x94] sm:$0xf0]  ;;  %v1752_v51 = vld [vmem:[#allocation5 + $0x14] sm:$0xf]  ;;  %v1537_v57 = vor.u32 %v1753_v47, %v1536_v46 }
  0x34   :  { %529 = vmatpush.bf16.msrb.mxu1 %v1641_v60  ;;  %v1538_v53 = vld [vmem:[#allocation5 + $0x18] sm:$0xf0]  ;;  %v1768_v54 = vld [vmem:[#allocation5 + $0x94] sm:$0xf]  ;;  %v1601_v58 = vor.u32 %v1769_v50, %v1600_v48  ;;  %v1528_v60 = vld [vmem:[#allocation5] sm:$0xf] }
  0x35   :  { %542 = vmatpush.bf16.msrb.mxu2 %v1581_v61  ;;  %v1602_v55 = vld [vmem:[#allocation5 + $0x98] sm:$0xf0]  ;;  %v1541_v59 = vor.u32 %v1752_v51, %v1538_v53  ;;  %v1751_v61 = vld [vmem:[#allocation5 + $0x4] sm:$0xf0]  ;;  %v1592_v62 = vld [vmem:[#allocation5 + $0x80] sm:$0xf] }
  0x36   :  { %555 = vmatpush.bf16.msrb.mxu3 %v1645_v1  ;;  %v1605_v63 = vor.u32 %v1768_v54, %v1602_v55  ;;  %v1767_v0 = vld [vmem:[#allocation5 + $0x84] sm:$0xf0]  ;;  %v1750_v1 = vld [vmem:[#allocation5 + $0x4] sm:$0xf]  ;;  %v1530_v2 = vld [vmem:[#allocation5 + $0x8] sm:$0xf0]  ;;  %v1529_v5 = vor.u32 %v1751_v61, %v1528_v60 }
  0x37   :  { %517 = vmatpush.bf16.msrb.mxu0 %v1569_v7  ;;  %v1766_v3 = vld [vmem:[#allocation5 + $0x84] sm:$0xf]  ;;  %v1594_v4 = vld [vmem:[#allocation5 + $0x88] sm:$0xf0]  ;;  %v1593_v6 = vor.u32 %v1767_v0, %v1592_v62  ;;  %v1533_v7 = vor.u32 %v1750_v1, %v1530_v2  ;;  %v619_v10 = vsel %vm614_vm0, %v1977_v56, 0  ;;  %s1899_s23 = smov 16  }
  0x38   :  { %530 = vmatpush.bf16.msrb.mxu1 %v1633_v8  ;;  %v1597_v8 = vor.u32 %v1766_v3, %v1594_v4  ;;  %v1994_v11 = vld [vmem:[%s2372_s3] sm:$0xff]  ;;  %v2003_v12 = vld [vmem:[%s2372_s3 + $0x8] sm:$0xff]  ;;  %s1900_s24 = smov 15   ;;  %s1902_s1 = smov 1  }
  0x39   :  { %543 = vmatpush.bf16.msrb.mxu2 %v1573_v9  ;;  %v616_v9 = vsel %vm614_vm0, %v1975_v52, 0  ;;  %v1785_v36 = vld [vmem:[%s2373_s4 + $0x8] sm:$0xff]  ;;  %s1903_s2 = smov 127   ;;  %s1904_s25 = smov 113  }
  0x3a   :  { %556 = vmatpush.bf16.msrb.mxu3 %v1637_v13  ;;  %v573_v13 = vld [vmem:[%s2372_s3 + $0x10] sm:$0x3]  ;;  %v2057_v62 = vld [vmem:[%s2374_s5 + $0x8] sm:$0xff]  ;;  %s1905_s26 = smov 112   ;;  %s1906_s29 = smov 111  }
  0x3b   :  { %518 = vmatpush.bf16.msrb.mxu0 %v1561_v19  ;;  %v600_v14 = vunpack.c.l.b16 %v573_v13 }
  0x3c   :  { %531 = vmatpush.bf16.msrb.mxu1 %v1625_v21 }
  0x3d   :  { %544 = vmatpush.bf16.msrb.mxu2 %v1565_v22  ;;  %v2012_v15 = vpack.c.b16 %v600_v14, %v600_v14 }
  0x3e   :  { %557 = vmatpush.bf16.msrb.mxu3 %v1629_v26 }
  0x3f   :  { %519 = vmatpush.bf16.msrb.mxu0 %v1553_v31 }
  0x40   :  { %532 = vmatpush.bf16.msrb.mxu1 %v1617_v32 }
  0x41   :  { %545 = vmatpush.bf16.msrb.mxu2 %v1557_v33  ;;  %v1784_v33 = vld [vmem:[%s2373_s4] sm:$0xff] }
  0x42   :  { %558 = vmatpush.bf16.msrb.mxu3 %v1621_v37 }
  0x43   :  { %520 = vmatpush.bf16.msrb.mxu0 %v1545_v43 }
  0x44   :  { %533 = vmatpush.bf16.msrb.mxu1 %v1609_v44  ;;  %v578_v44 = vld [vmem:[%s2373_s4 + $0x10] sm:$0x3] }
  0x45   :  { %546 = vmatpush.bf16.msrb.mxu2 %v1549_v45  ;;  %v676_v53 = vunpack.c.l.b16 %v578_v44 }
  0x46   :  { %559 = vmatpush.bf16.msrb.mxu3 %v1613_v49 }
  0x47   :  { %521 = vmatpush.bf16.msrb.mxu0 %v1537_v57  ;;  %v679_v61 = vpack.c.b16 %v676_v53, %v676_v53 }
  0x48   :  { %534 = vmatpush.bf16.msrb.mxu1 %v1601_v58  ;;  %v2044_v58 = vld [vmem:[%s2374_s5] sm:$0xff] }
  0x49   :  { %547 = vmatpush.bf16.msrb.mxu2 %v1541_v59 }
  0x4a   :  { %560 = vmatpush.bf16.msrb.mxu3 %v1605_v63  ;;  %v583_v63 = vld [vmem:[%s2374_s5 + $0x10] sm:$0x3]  ;;  %s1898_s5 = smov 17  }
  0x4b   :  { %522 = vmatpush.bf16.msrb.mxu0 %v1529_v5  ;;  %v765_v0 = vunpack.c.l.b16 %v583_v63 }
  0x4c   :  { %535 = vmatpush.bf16.msrb.mxu1 %v1593_v6 }
  0x4d   :  { %548 = vmatpush.bf16.msrb.mxu2 %v1533_v7  ;;  %v2066_v1 = vpack.c.b16 %v765_v0, %v765_v0 }
  0x4e   :  { %561 = vmatpush.bf16.msrb.mxu3 %v1597_v8  ;;  %523 = vmatmul.bf16.vlgmr.msrb.gmra.mxu0 %v1975_v52 }
  0x4f   :  { %628 = vmatpush.bf16.msra.mxu0 %v616_v9  ;;  %536 = vmatmul.bf16.vlgmr.msrb.gmra.mxu1 %v1977_v56 }
  0x50   :  { %651 = vmatpush.bf16.msra.mxu1 %v619_v10  ;;  %549 = vmatmul.bf16.vlgmr.msrb.gmra.mxu2 %v1975_v52 }
  0x51   :  { %562 = vmatmul.bf16.vlgmr.msrb.gmra.mxu3 %v1977_v56 }
  0x5e   :  { %1662 = vmatmul.msk.bf16.vlgmr.msra.gmra.mxu0 %vm604_vm1, %v1994_v11 }
  0x5f   :  { %1665 = vmatmul.msk.bf16.vlgmr.msra.gmra.mxu1 %vm604_vm1, %v1994_v11 }
  0x6e   :  { %1663 = vmatmul.msk.bf16.gmra.mxu0 %vm604_vm1, %v2003_v12 }
  0x6f   :  { %1666 = vmatmul.msk.bf16.gmra.mxu1 %vm604_vm1, %v2003_v12 }
  0x7e   :  { %1664 = vmatmul.msk.bf16.gmra.mxu0 %vm604_vm1, %v2012_v15 }
  0x7f   :  { %1667 = vmatmul.msk.bf16.gmra.mxu1 %vm604_vm1, %v2012_v15 }
  0xab   :  { %v280_v16 = vpop.f32.mrf.mxu0 }
  0xac   :  { %v293_v17 = vpop.f32.mrf.mxu1 }
  0xad   :  { %v294_v18 = vadd.f32 %v293_v17, %v280_v16 }
  0xb3   :  { %v306_v19 = vpop.f32.mrf.mxu2  ;;  %v282_v22 = vpop.f32.mrf.mxu0 }
  0xb4   :  { %v319_v20 = vpop.f32.mrf.mxu3  ;;  %v295_v24 = vpop.f32.mrf.mxu1 }
  0xb5   :  { %v320_v21 = vadd.f32 %v319_v20, %v306_v19 }
  0xb7   :  { %v567_v23 = vpack.c.bf16 %v320_v21, %v294_v18 }
  0xb9   :  { %v681_v25 = vunpack.c.l.b16 %v567_v23  ;;  %v682_v26 = vunpack.c.h.b16 %v567_v23 }
  0xbb   :  { %v683_v27 = vpack.c.b16 %v681_v25, %v681_v25  ;;  %v684_v28 = vpack.c.b16 %v682_v26, %v682_v26  ;;  %v308_v29 = vpop.f32.mrf.mxu2 }
  0xbc   :  { %v321_v30 = vpop.f32.mrf.mxu3 }
  0xbd   :  { %v695_v31 = vsel %vm614_vm0, %v683_v27, 0  ;;  %v698_v32 = vsel %vm614_vm0, %v684_v28, 0  ;;  %v1092_v47 = vrot.slane %v683_v27, 2  ;;  %v1093_v48 = vrot.slane %v684_v28, 2 }
  0xbe   :  { %707 = vmatpush.bf16.msra.mxu2 %v695_v31  ;;  %730 = vmatpush.bf16.msra.mxu3 %v698_v32 }
  0xbf   :  { %v1095_v59 = vsel %vm614_vm0, %v1092_v47, 0  ;;  %v1098_v60 = vsel %vm614_vm0, %v1093_v48, 0 }
  0xc1   :  { %1676 = vmatmul.msk.bf16.vlgmr.msra.gmra.mxu2 %vm604_vm1, %v1784_v33  ;;  %1679 = vmatmul.msk.bf16.vlgmr.msra.gmra.mxu3 %vm604_vm1, %v1784_v33 }
  0xcb   :  { %v524_v34 = vpop.f32.mrf.mxu0 }
  0xcc   :  { %v537_v35 = vpop.f32.mrf.mxu1 }
  0xcd   :  { %v538_v37 = vadd.f32 %v537_v35, %v524_v34 }
  0xd1   :  { %1677 = vmatmul.msk.bf16.gmra.mxu2 %vm604_vm1, %v1785_v36  ;;  %1680 = vmatmul.msk.bf16.gmra.mxu3 %vm604_vm1, %v1785_v36 }
  0xd3   :  { %v550_v38 = vpop.f32.mrf.mxu2  ;;  %v526_v40 = vpop.f32.mrf.mxu0 }
  0xd4   :  { %v563_v39 = vpop.f32.mrf.mxu3  ;;  %v539_v42 = vpop.f32.mrf.mxu1 }
  0xd5   :  { %v564_v41 = vadd.f32 %v563_v39, %v550_v38  ;;  %v1901_v39 = vmov 0  }
  0xd6   :  { %1802 = vset.pattern.permute.xlu1 %v1901_v39  ;;  %1803 = vset.pattern.permute.xlu0 %v1901_v39 }
  0xd7   :  { %v568_v43 = vpack.c.bf16 %v564_v41, %v538_v37 }
  0xd9   :  { %v770_v45 = vunpack.c.l.b16 %v568_v43  ;;  %v771_v46 = vunpack.c.h.b16 %v568_v43 }
  0xdb   :  { %v2033_v49 = vpack.c.b16 %v770_v45, %v770_v45  ;;  %v2035_v50 = vpack.c.b16 %v771_v46, %v771_v46  ;;  %v552_v51 = vpop.f32.mrf.mxu2  ;;  %v630_v2 = vpop.f32.mrf.mxu0 }
  0xdc   :  { %v565_v54 = vpop.f32.mrf.mxu3  ;;  %v653_v3 = vpop.f32.mrf.mxu1 }
  0xdd   :  { %v784_v55 = vsel %vm614_vm0, %v2033_v49, 0  ;;  %v787_v57 = vsel %vm614_vm0, %v2035_v50, 0 }
  0xde   :  { %796 = vmatpush.bf16.msrb.mxu0 %v784_v55  ;;  %819 = vmatpush.bf16.msrb.mxu1 %v787_v57 }
  0xe1   :  { %1690 = vmatmul.msk.bf16.vlgmr.msrb.gmra.mxu0 %vm604_vm1, %v2044_v58  ;;  %1693 = vmatmul.msk.bf16.vlgmr.msrb.gmra.mxu1 %vm604_vm1, %v2044_v58 }
  0xe2   :  { %1107 = vmatpush.bf16.msra.mxu0 %v1095_v59  ;;  %1130 = vmatpush.bf16.msra.mxu1 %v1098_v60 }
  0xe3   :  { %1678 = vmatmul.msk.bf16.gmra.mxu2 %vm604_vm1, %v679_v61  ;;  %1681 = vmatmul.msk.bf16.gmra.mxu3 %vm604_vm1, %v679_v61  ;;  %v632_v4 = vpop.f32.mrf.mxu0 }
  0xe4   :  { %v655_v5 = vpop.f32.mrf.mxu1 }
  0xeb   :  { %v635_v6 = vpop.f32.mrf.mxu0 }
  0xec   :  { %v658_v7 = vpop.f32.mrf.mxu1 }
  0xf1   :  { %1691 = vmatmul.msk.bf16.gmra.mxu0 %vm604_vm1, %v2057_v62  ;;  %1694 = vmatmul.msk.bf16.gmra.mxu1 %vm604_vm1, %v2057_v62 }
  0xf3   :  { %v2074_v8 = vpop.f32.mrf.mxu0 }
  0xf4   :  { %v2076_v9 = vpop.f32.mrf.mxu1 }
  0xfb   :  { %v2080_v10 = vpop.f32.mrf.mxu0 }
  0xfc   :  { %v2082_v13 = vpop.f32.mrf.mxu1 }
 0x101   :  { %1692 = vmatmul.msk.bf16.gmra.mxu0 %vm604_vm1, %v2066_v1  ;;  %1695 = vmatmul.msk.bf16.gmra.mxu1 %vm604_vm1, %v2066_v1 }
 0x103   :  { %v642_v14 = vpop.f32.mrf.mxu0 }
 0x104   :  { %v665_v16 = vpop.f32.mrf.mxu1 }
 0x111   :  { %1704 = vmatmul.msk.bf16.vlgmr.msra.gmra.mxu0 %vm604_vm1, %v1784_v33  ;;  %1707 = vmatmul.msk.bf16.vlgmr.msra.gmra.mxu1 %vm604_vm1, %v1784_v33 }
 0x121   :  { %1705 = vmatmul.msk.bf16.gmra.mxu0 %vm604_vm1, %v1785_v36  ;;  %1708 = vmatmul.msk.bf16.gmra.mxu1 %vm604_vm1, %v1785_v36 }
 0x131   :  { %1706 = vmatmul.msk.bf16.gmra.mxu0 %vm604_vm1, %v679_v61  ;;  %1709 = vmatmul.msk.bf16.gmra.mxu1 %vm604_vm1, %v679_v61 }
 0x144   :  { %v709_v17 = vpop.f32.mrf.mxu2  ;;  %v732_v18 = vpop.f32.mrf.mxu3 }
 0x145   :  { %v746_v23 = vsub.f32 %v630_v2, %v709_v17  ;;  %v747_v30 = vsub.f32 %v653_v3, %v732_v18  ;;  %v588_v18 = vld [vmem:[%s2376_s7] sm:$0xf] }
 0x14c   :  { %v711_v19 = vpop.f32.mrf.mxu2  ;;  %v734_v20 = vpop.f32.mrf.mxu3 }
 0x14d   :  { %v748_v31 = vsub.f32 %v632_v4, %v711_v19  ;;  %v749_v40 = vsub.f32 %v655_v5, %v734_v20 }
 0x154   :  { %v714_v21 = vpop.f32.mrf.mxu2  ;;  %v737_v22 = vpop.f32.mrf.mxu3 }
 0x155   :  { %v750_v47 = vsub.f32 %v635_v6, %v714_v21  ;;  %v751_v48 = vsub.f32 %v658_v7, %v737_v22 }
 0x15c   :  { %v716_v27 = vpop.f32.mrf.mxu2  ;;  %v739_v28 = vpop.f32.mrf.mxu3 }
 0x15d   :  { %v752_v59 = vsub.f32 %v2074_v8, %v716_v27  ;;  %v753_v0 = vsub.f32 %v2076_v9, %v739_v28 }
 0x15e   :  { %v798_v24 = vpop.f32.mrf.mxu0  ;;  %v821_v25 = vpop.f32.mrf.mxu1 }
 0x15f   :  { %v835_v26 = vsub.f32 %v746_v23, %v798_v24  ;;  %v836_v32 = vsub.f32 %v747_v30, %v821_v25  ;;  %v2115_v25 = vld [vmem:[%s2375_s6] sm:$0xff] }
 0x160   :  { %v854_v27 = vperm.slane %v2115_v25, 0 }
 0x161   :  { %845 = vrot.lane.b32.xlu0 %v835_v26, %s1898_s5  ;;  %v862_v29 = vrot.slane %v835_v26, 4  ;;  %v863_v38 = vrot.slane %v836_v32, 4  ;;  %v2120_v26 = vld [vmem:[%s2375_s6 + $0x8] sm:$0xff] }
 0x162   :  { %v855_v28 = vperm.slane %v2120_v26, 0 }
 0x163   :  { %866 = vrot.lane.b32.xlu1 %v862_v29, %s1899_s23 }
 0x166   :  { %v800_v33 = vpop.f32.mrf.mxu0  ;;  %v823_v34 = vpop.f32.mrf.mxu1 }
 0x167   :  { %v837_v35 = vsub.f32 %v748_v31, %v800_v33  ;;  %v719_v36 = vpop.f32.mrf.mxu2  ;;  %v742_v37 = vpop.f32.mrf.mxu3  ;;  %v838_v41 = vsub.f32 %v749_v40, %v823_v34 }
 0x168   :  { %v754_v7 = vsub.f32 %v2080_v10, %v719_v36  ;;  %v755_v8 = vsub.f32 %v2082_v13, %v742_v37  ;;  %v849_v10 = vlaneseq  ;;  %v873_v36 = vperm.slane %v2115_v25, 1 }
 0x169   :  { %847 = vrot.lane.b32.xlu0 %v836_v32, %s1898_s5  ;;  %879 = vrot.lane.b32.xlu2 %v837_v35, %s1900_s24  ;;  %v894_v44 = vrot.slane %v837_v35, 4  ;;  %v895_v51 = vrot.slane %v838_v41, 4  ;;  %v874_v37 = vperm.slane %v2120_v26, 1 }
 0x16a   :  { %v2109_v24 = vand.u32 127, %v849_v10 }
 0x16b   :  { %868 = vrot.lane.b32.xlu1 %v863_v38, %s1899_s23 }
 0x16c   :  { %vm851_vm2 = vcmp.lt.s32.totalorder %v2109_v24, 17  ;;  %vm870_vm3 = vcmp.lt.s32.totalorder %v2109_v24, 16  ;;  %vm883_vm4 = vcmp.lt.s32.totalorder %v2109_v24, 15  ;;  %vm902_vm5 = vcmp.lt.s32.totalorder %v2109_v24, 1 }
 0x16d   :  { %vm921_vm6 = vcmp.lt.s32.totalorder %v2109_v24, 127  ;;  %vm934_vm7 = vcmp.lt.s32.totalorder %v2109_v24, 113  ;;  %vm953_vm8 = vcmp.lt.s32.totalorder %v2109_v24, 112  ;;  %vm966_vm9 = vcmp.lt.s32.totalorder %v2109_v24, 111 }
 0x16e   :  { %v803_v42 = vpop.f32.mrf.mxu0  ;;  %v826_v43 = vpop.f32.mrf.mxu1 }
 0x16f   :  { %v744_v45 = vpop.f32.mrf.mxu3  ;;  %v721_v46 = vpop.f32.mrf.mxu2  ;;  %v839_v53 = vsub.f32 %v750_v47, %v803_v42  ;;  %v840_v54 = vsub.f32 %v751_v48, %v826_v43  ;;  %v905_v48 = vperm.slane %v2115_v25, 3 }
 0x170   :  { %v886_v45 = vperm.slane %v2115_v25, 2  ;;  %v887_v46 = vperm.slane %v2120_v26, 2 }
 0x171   :  { %881 = vrot.lane.b32.xlu2 %v838_v41, %s1900_s24  ;;  %898 = vrot.lane.b32.xlu0 %v894_v44, %s1902_s1  ;;  %v913_v60 = vrot.slane %v839_v53, 4  ;;  %v914_v61 = vrot.slane %v840_v54, 4 }
 0x173   :  { %900 = vrot.lane.b32.xlu1 %v895_v51, %s1902_s1  ;;  %v906_v51 = vperm.slane %v2120_v26, 3 }
 0x176   :  { %v805_v55 = vpop.f32.mrf.mxu0  ;;  %v828_v57 = vpop.f32.mrf.mxu1 }
 0x177   :  { %v841_v63 = vsub.f32 %v752_v59, %v805_v55  ;;  %v842_v2 = vsub.f32 %v753_v0, %v828_v57 }
 0x179   :  { %919 = vrot.lane.b32.xlu0 %v914_v61, %s1903_s2  ;;  %917 = vrot.lane.b32.xlu2 %v913_v60, %s1903_s2  ;;  %v945_v5 = vrot.slane %v841_v63, 4  ;;  %v946_v6 = vrot.slane %v842_v2, 4  ;;  %v924_v61 = vperm.slane %v2115_v25, 5 }
 0x17b   :  { %930 = vrot.lane.b32.xlu1 %v841_v63, %s1904_s25  ;;  %v925_v63 = vperm.slane %v2120_v26, 5 }
 0x17e   :  { %v808_v3 = vpop.f32.mrf.mxu0  ;;  %v831_v4 = vpop.f32.mrf.mxu1 }
 0x17f   :  { %v843_v16 = vsub.f32 %v754_v7, %v808_v3  ;;  %v844_v17 = vsub.f32 %v755_v8, %v831_v4  ;;  %v937_v8 = vperm.slane %v2115_v25, 6 }
 0x181   :  { %932 = vrot.lane.b32.xlu2 %v842_v2, %s1904_s25  ;;  %949 = vrot.lane.b32.xlu0 %v945_v5, %s1905_s26 }
 0x183   :  { %951 = vrot.lane.b32.xlu1 %v946_v6, %s1905_s26 }
 0x186   :  { %v833_v9 = vpop.f32.mrf.mxu1  ;;  %v810_v14 = vpop.f32.mrf.mxu0 }
 0x187   :  { %v938_v9 = vperm.slane %v2120_v26, 6 }
 0x189   :  { %964 = vrot.lane.b32.xlu0 %v844_v17, %s1906_s29  ;;  %962 = vrot.lane.b32.xlu2 %v843_v16, %s1906_s29 }
 0x18b   :  { %977 = vperm.xlu1 %1802, %v588_v18  }
 0x1c3   :  { %v880_v19 = vpop.permute.xlu2 %879 }
 0x1cb   :  { %v882_v13 = vpop.permute.xlu2 %881 }
 0x1cc   :  { %v885_v47 = vsel %vm883_vm4, %v882_v13, %v880_v19 }
 0x1cd   :  { %v888_v0 = vmul.f32 %v886_v45, %v885_v47 }
 0x1d3   :  { %v846_v20 = vpop.permute.xlu0 %845  ;;  %v918_v33 = vpop.permute.xlu2 %917 }
 0x1d5   :  { %v867_v21 = vpop.permute.xlu1 %866 }
 0x1db   :  { %v848_v22 = vpop.permute.xlu0 %847  ;;  %v933_v5 = vpop.permute.xlu2 %932 }
 0x1dc   :  { %v852_v30 = vsel %vm851_vm2, %v846_v20, %v848_v22  ;;  %v853_v31 = vsel %vm851_vm2, %v848_v22, %v846_v20 }
 0x1dd   :  { %v869_v23 = vpop.permute.xlu1 %868  ;;  %v856_v34 = vmul.f32 %v854_v27, %v853_v31  ;;  %v857_v35 = vmul.f32 %v855_v28, %v852_v30 }
 0x1de   :  { %v871_v38 = vsel %vm870_vm3, %v867_v21, %v869_v23  ;;  %v872_v39 = vsel %vm870_vm3, %v869_v23, %v867_v21  ;;  %v957_v23 = vperm.slane %v2120_v26, 7 }
 0x1df   :  { %v858_v40 = vadd.f32 %v856_v34, %v839_v53  ;;  %v859_v41 = vadd.f32 %v857_v35, %v840_v54  ;;  %v875_v42 = vmul.f32 %v873_v36, %v872_v39  ;;  %v876_v43 = vmul.f32 %v874_v37, %v871_v38 }
 0x1e0   :  { %v884_v54 = vsel %vm883_vm4, %v880_v19, %v882_v13  ;;  %v956_v13 = vperm.slane %v2115_v25, 7 }
 0x1e1   :  { %v877_v59 = vadd.f32 %v875_v42, %v858_v40  ;;  %v878_v60 = vadd.f32 %v876_v43, %v859_v41  ;;  %v889_v4 = vmul.f32 %v887_v46, %v884_v54  ;;  %v2202_v40 = vld [vmem:[%s2375_s6 + $0x10] ss:$0 sm:$0xff]  ;;  %v2207_v41 = vld [vmem:[%s2375_s6 + $0x18] ss:$0 sm:$0xff] }
 0x1e3   :  { %v899_v29 = vpop.permute.xlu0 %898  ;;  %v890_v14 = vadd.f32 %v888_v0, %v877_v59  ;;  %v891_v16 = vadd.f32 %v889_v4, %v878_v60  ;;  %v963_v42 = vpop.permute.xlu2 %962 }
 0x1e5   :  { %v901_v32 = vpop.permute.xlu1 %900 }
 0x1e6   :  { %v903_v55 = vsel %vm902_vm5, %v899_v29, %v901_v32  ;;  %v904_v57 = vsel %vm902_vm5, %v901_v32, %v899_v29 }
 0x1e7   :  { %v907_v6 = vmul.f32 %v905_v48, %v904_v57  ;;  %v908_v7 = vmul.f32 %v906_v51, %v903_v55 }
 0x1e9   :  { %v909_v10 = vadd.f32 %v907_v6, %v890_v14  ;;  %v910_v22 = vadd.f32 %v908_v7, %v891_v16  ;;  %v1038_v6 = vrot.slane %v1975_v52, 2  ;;  %v1039_v7 = vrot.slane %v1977_v56, 2  ;;  %v2230_v52 = vld [vmem:[%s2377_s8] sm:$0x3] }
 0x1eb   :  { %v920_v44 = vpop.permute.xlu0 %919 }
 0x1ec   :  { %v922_v2 = vsel %vm921_vm6, %v918_v33, %v920_v44  ;;  %v923_v3 = vsel %vm921_vm6, %v920_v44, %v918_v33 }
 0x1ed   :  { %v931_v53 = vpop.permute.xlu1 %930  ;;  %v926_v17 = vmul.f32 %v924_v61, %v922_v2  ;;  %v927_v18 = vmul.f32 %v925_v63, %v923_v3 }
 0x1ee   :  { %v935_v20 = vsel %vm934_vm7, %v931_v53, %v933_v5  ;;  %v936_v21 = vsel %vm934_vm7, %v933_v5, %v931_v53 }
 0x1ef   :  { %v928_v32 = vadd.f32 %v926_v17, %v909_v10  ;;  %v929_v33 = vadd.f32 %v927_v18, %v910_v22  ;;  %v939_v34 = vmul.f32 %v937_v8, %v935_v20  ;;  %v940_v35 = vmul.f32 %v938_v9, %v936_v21 }
 0x1f0   :  { %v1044_v20 = vsel %vm614_vm0, %v1039_v7, 0  ;;  %v1156_v22 = vrot.slane %v2033_v49, 2 }
 0x1f1   :  { %v941_v43 = vadd.f32 %v939_v34, %v928_v32  ;;  %v942_v44 = vadd.f32 %v940_v35, %v929_v33 }
 0x1f2   :  { %v1159_v56 = vsel %vm614_vm0, %v1156_v22, 0 }
 0x1f3   :  { %v950_v19 = vpop.permute.xlu0 %949 }
 0x1f5   :  { %v952_v29 = vpop.permute.xlu1 %951 }
 0x1f6   :  { %v954_v30 = vsel %vm953_vm8, %v950_v19, %v952_v29  ;;  %v955_v31 = vsel %vm953_vm8, %v952_v29, %v950_v19  ;;  %v1041_v19 = vsel %vm614_vm0, %v1038_v6, 0  ;;  %v1157_v29 = vrot.slane %v2035_v50, 2 }
 0x1f7   :  { %v958_v38 = vmul.f32 %v956_v13, %v954_v30  ;;  %v959_v39 = vmul.f32 %v957_v23, %v955_v31 }
 0x1f8   :  { %v1162_v49 = vsel %vm614_vm0, %v1157_v29, 0 }
 0x1f9   :  { %v960_v55 = vadd.f32 %v958_v38, %v941_v43  ;;  %v961_v57 = vadd.f32 %v959_v39, %v942_v44 }
 0x1fb   :  { %v965_v47 = vpop.permute.xlu0 %964 }
 0x1fc   :  { %v967_v53 = vsel %vm966_vm9, %v963_v42, %v965_v47  ;;  %v968_v54 = vsel %vm966_vm9, %v965_v47, %v963_v42 }
 0x1fd   :  { %v971_v59 = vmul.f32 %v2202_v40, %v967_v53  ;;  %v972_v60 = vmul.f32 %v2207_v41, %v968_v54  ;;  %v2215_v0 = vpop.permute.xlu1 %977 }
 0x1ff   :  { %v973_v2 = vadd.f32 %v971_v59, %v960_v55  ;;  %v974_v3 = vadd.f32 %v972_v60, %v961_v57 }
 0x201   :  { %v980_v4 = vadd.f32 %v2215_v0, %v973_v2  ;;  %v981_v5 = vadd.f32 %v2215_v0, %v974_v3 }
 0x203   :  { %v982_v14 = vmax.f32 %v980_v4, 0.0  ;;  %v983_v16 = vmax.f32 %v981_v5, 0.0 }
 0x205   :  { %v984_v17 = vpack.c.bf16 %v982_v14, %v982_v14  ;;  %v985_v18 = vpack.c.bf16 %v983_v16, %v983_v16 }
 0x207   :  { %v995_v21 = vsel %vm614_vm0, %v984_v17, 0  ;;  %v998_v10 = vsel %vm614_vm0, %v985_v18, 0 }
 0x208   :  { %1007 = vmatpush.bf16.msrb.mxu2 %v995_v21  ;;  %1020 = vmatpush.bf16.msrb.mxu3 %v998_v10 }
 0x20b   :  { %1696 = vmatmul.msk.bf16.vlgmr.msrb.gmra.mxu2 %vm604_vm1, %v2230_v52  ;;  %1697 = vmatmul.msk.bf16.vlgmr.msrb.gmra.mxu3 %vm604_vm1, %v2230_v52 }
 0x20c   :  { %1053 = vmatpush.bf16.msra.mxu2 %v1041_v19  ;;  %1076 = vmatpush.bf16.msra.mxu3 %v1044_v20 }
 0x210   :  { %1171 = vmatpush.bf16.msrb.mxu2 %v1159_v56  ;;  %1194 = vmatpush.bf16.msrb.mxu3 %v1162_v49 }
 0x21b   :  { %1698 = vmatmul.msk.bf16.vlgmr.msra.gmra.mxu2 %vm604_vm1, %v1994_v11  ;;  %1701 = vmatmul.msk.bf16.vlgmr.msra.gmra.mxu3 %vm604_vm1, %v1994_v11  ;;  %v1109_v11 = vpop.f32.mrf.mxu0 }
 0x22b   :  { %1699 = vmatmul.msk.bf16.gmra.mxu2 %vm604_vm1, %v2003_v12  ;;  %1702 = vmatmul.msk.bf16.gmra.mxu3 %vm604_vm1, %v2003_v12  ;;  %v1132_v12 = vpop.f32.mrf.mxu1 }
 0x233   :  { %v1134_v50 = vpop.f32.mrf.mxu1 }
 0x23b   :  { %1700 = vmatmul.msk.bf16.gmra.mxu2 %vm604_vm1, %v2012_v15  ;;  %1703 = vmatmul.msk.bf16.gmra.mxu3 %vm604_vm1, %v2012_v15  ;;  %v1111_v15 = vpop.f32.mrf.mxu0  ;;  %v1137_v32 = vpop.f32.mrf.mxu1 }
 0x24b   :  { %1710 = vmatmul.msk.bf16.vlgmr.msrb.gmra.mxu2 %vm604_vm1, %v2044_v58  ;;  %1713 = vmatmul.msk.bf16.vlgmr.msrb.gmra.mxu3 %vm604_vm1, %v2044_v58  ;;  %v1114_v58 = vpop.f32.mrf.mxu0 }
 0x253   :  { %v1116_v35 = vpop.f32.mrf.mxu0 }
 0x25b   :  { %1711 = vmatmul.msk.bf16.gmra.mxu2 %vm604_vm1, %v2057_v62  ;;  %1714 = vmatmul.msk.bf16.gmra.mxu3 %vm604_vm1, %v2057_v62  ;;  %v1139_v62 = vpop.f32.mrf.mxu1  ;;  %v1119_v42 = vpop.f32.mrf.mxu0 }
 0x263   :  { %v2266_v43 = vpop.f32.mrf.mxu1  ;;  %v1121_v47 = vpop.f32.mrf.mxu0 }
 0x26b   :  { %1712 = vmatmul.msk.bf16.gmra.mxu2 %vm604_vm1, %v2066_v1  ;;  %1715 = vmatmul.msk.bf16.gmra.mxu3 %vm604_vm1, %v2066_v1  ;;  %v1144_v53 = vpop.f32.mrf.mxu1 }
 0x28e   :  { %v2262_v30 = vpop.f32.mrf.mxu2  ;;  %v2264_v31 = vpop.f32.mrf.mxu3 }
 0x296   :  { %v1011_v33 = vpop.f32.mrf.mxu2  ;;  %v1024_v34 = vpop.f32.mrf.mxu3 }
 0x29e   :  { %v1055_v38 = vpop.f32.mrf.mxu2  ;;  %v1078_v39 = vpop.f32.mrf.mxu3 }
 0x29f   :  { %v1146_v5 = vsub.f32 %v1055_v38, %v1109_v11  ;;  %v1147_v6 = vsub.f32 %v1078_v39, %v1132_v12 }
 0x2a6   :  { %v1057_v1 = vpop.f32.mrf.mxu2  ;;  %v1080_v44 = vpop.f32.mrf.mxu3 }
 0x2a7   :  { %v1148_v19 = vsub.f32 %v1057_v1, %v1111_v15  ;;  %v1149_v10 = vsub.f32 %v1080_v44, %v1134_v50 }
 0x2ae   :  { %v1060_v54 = vpop.f32.mrf.mxu2  ;;  %v1083_v55 = vpop.f32.mrf.mxu3 }
 0x2af   :  { %v1150_v49 = vsub.f32 %v1060_v54, %v1114_v58  ;;  %v1151_v39 = vsub.f32 %v1083_v55, %v1137_v32 }
 0x2b6   :  { %v1062_v57 = vpop.f32.mrf.mxu2  ;;  %v1085_v59 = vpop.f32.mrf.mxu3 }
 0x2b7   :  { %v1152_v1 = vsub.f32 %v1062_v57, %v1116_v35  ;;  %v1153_v53 = vsub.f32 %v1085_v59, %v1139_v62  ;;  %v590_v57 = vld [vmem:[%s2378_s9] sm:$0xf] }
 0x2be   :  { %v1065_v60 = vpop.f32.mrf.mxu2  ;;  %v1088_v2 = vpop.f32.mrf.mxu3 }
 0x2bf   :  { %v1155_v35 = vsub.f32 %v1088_v2, %v2266_v43 }
 0x2c6   :  { %v1067_v3 = vpop.f32.mrf.mxu2  ;;  %v1090_v4 = vpop.f32.mrf.mxu3 }
 0x2c7   :  { %v1154_v4 = vsub.f32 %v1065_v60, %v1119_v42 }
 0x2ce   :  { %v1173_v7 = vpop.f32.mrf.mxu2  ;;  %v1196_v14 = vpop.f32.mrf.mxu3 }
 0x2cf   :  { %v1210_v16 = vsub.f32 %v1146_v5, %v1173_v7  ;;  %v1211_v17 = vsub.f32 %v1147_v6, %v1196_v14 }
 0x2d1   :  { %v1232_v18 = vrot.slane %v1210_v16, 4  ;;  %1222 = vrot.lane.b32.xlu0 %v1211_v17, %s1898_s5  ;;  %1220 = vrot.lane.b32.xlu2 %v1210_v16, %s1898_s5  ;;  %v1233_v22 = vrot.slane %v1211_v17, 4  ;;  %s1387_s5 = sshll.u32 %s2379_s10, 4  ;;  %s1388_s5 = int_to_ptr.hbm [resolvable:$true] %s1387_s5 }
 0x2d3   :  { %1236 = vrot.lane.b32.xlu1 %v1232_v18, %s1899_s23 }
 0x2d6   :  { %v1175_v20 = vpop.f32.mrf.mxu2  ;;  %v1198_v21 = vpop.f32.mrf.mxu3 }
 0x2d7   :  { %v1212_v29 = vsub.f32 %v1148_v19, %v1175_v20  ;;  %v1213_v56 = vsub.f32 %v1149_v10, %v1198_v21 }
 0x2d9   :  { %1238 = vrot.lane.b32.xlu2 %v1233_v22, %s1899_s23  ;;  %1246 = vrot.lane.b32.xlu0 %v1212_v29, %s1900_s24  ;;  %v1258_v33 = vrot.slane %v1212_v29, 4  ;;  %v1259_v34 = vrot.slane %v1213_v56, 4 }
 0x2db   :  { %1248 = vrot.lane.b32.xlu1 %v1213_v56, %s1900_s24 }
 0x2de   :  { %v1178_v11 = vpop.f32.mrf.mxu2  ;;  %v1201_v12 = vpop.f32.mrf.mxu3 }
 0x2df   :  { %v1214_v38 = vsub.f32 %v1150_v49, %v1178_v11  ;;  %v1215_v50 = vsub.f32 %v1151_v39, %v1201_v12 }
 0x2e1   :  { %v1274_v15 = vrot.slane %v1214_v38, 4  ;;  %1264 = vrot.lane.b32.xlu0 %v1259_v34, %s1902_s1  ;;  %1262 = vrot.lane.b32.xlu2 %v1258_v33, %s1902_s1  ;;  %v1275_v3 = vrot.slane %v1215_v50, 4 }
 0x2e3   :  { %1278 = vrot.lane.b32.xlu1 %v1274_v15, %s1903_s2 }
 0x2e6   :  { %v1180_v44 = vpop.f32.mrf.mxu2  ;;  %v1203_v47 = vpop.f32.mrf.mxu3 }
 0x2e7   :  { %v1216_v58 = vsub.f32 %v1152_v1, %v1180_v44  ;;  %v1217_v54 = vsub.f32 %v1153_v53, %v1203_v47 }
 0x2e9   :  { %1280 = vrot.lane.b32.xlu2 %v1275_v3, %s1903_s2  ;;  %1288 = vrot.lane.b32.xlu0 %v1216_v58, %s1904_s25  ;;  %v1300_v5 = vrot.slane %v1216_v58, 4  ;;  %v1301_v6 = vrot.slane %v1217_v54, 4 }
 0x2eb   :  { %1290 = vrot.lane.b32.xlu1 %v1217_v54, %s1904_s25 }
 0x2ee   :  { %v1183_v32 = vpop.f32.mrf.mxu2  ;;  %v1206_v55 = vpop.f32.mrf.mxu3 }
 0x2ef   :  { %v1218_v7 = vsub.f32 %v1154_v4, %v1183_v32  ;;  %v1219_v14 = vsub.f32 %v1155_v35, %v1206_v55 }
 0x2f1   :  { %1306 = vrot.lane.b32.xlu0 %v1301_v6, %s1905_s26  ;;  %1304 = vrot.lane.b32.xlu2 %v1300_v5, %s1905_s26 }
 0x2f3   :  { %1314 = vrot.lane.b32.xlu1 %v1218_v7, %s1906_s29 }
 0x2f6   :  { %v1185_v62 = vpop.f32.mrf.mxu2  ;;  %v1208_v59 = vpop.f32.mrf.mxu3 }
 0x2f9   :  { %988 = vperm.xlu0 %1803, %v590_v57   ;;  %1316 = vrot.lane.b32.xlu2 %v1219_v14, %s1906_s29 }
 0x32b   :  { %v1221_v42 = vpop.permute.xlu2 %1220 }
 0x333   :  { %v1239_v60 = vpop.permute.xlu2 %1238 }
 0x33b   :  { %v1263_v18 = vpop.permute.xlu2 %1262 }
 0x343   :  { %v1223_v16 = vpop.permute.xlu0 %1222  ;;  %v1281_v21 = vpop.permute.xlu2 %1280 }
 0x344   :  { %v1224_v43 = vsel %vm851_vm2, %v1221_v42, %v1223_v16  ;;  %v1225_v2 = vsel %vm851_vm2, %v1223_v16, %v1221_v42 }
 0x345   :  { %v1237_v17 = vpop.permute.xlu1 %1236  ;;  %v1226_v10 = vmul.f32 %v1225_v2, %v854_v27  ;;  %v1227_v22 = vmul.f32 %v1224_v43, %v855_v28 }
 0x346   :  { %v1240_v56 = vsel %vm870_vm3, %v1237_v17, %v1239_v60  ;;  %v1241_v49 = vsel %vm870_vm3, %v1239_v60, %v1237_v17 }
 0x347   :  { %v1228_v34 = vadd.f32 %v1226_v10, %v1214_v38  ;;  %v1229_v39 = vadd.f32 %v1227_v22, %v1215_v50  ;;  %v1242_v27 = vmul.f32 %v1241_v49, %v873_v36  ;;  %v1243_v28 = vmul.f32 %v1240_v56, %v874_v37 }
 0x349   :  { %v1244_v38 = vadd.f32 %v1242_v27, %v1228_v34  ;;  %v1245_v50 = vadd.f32 %v1243_v28, %v1229_v39  ;;  %v1814_v27 = vld [vmem:[%s2369_s0] sm:$0xff] }
 0x34b   :  { %v1247_v19 = vpop.permute.xlu0 %1246  ;;  %v1305_v53 = vpop.permute.xlu2 %1304 }
 0x34d   :  { %v1249_v20 = vpop.permute.xlu1 %1248 }
 0x34e   :  { %v1250_v12 = vsel %vm883_vm4, %v1247_v19, %v1249_v20  ;;  %v1251_v33 = vsel %vm883_vm4, %v1249_v20, %v1247_v19 }
 0x34f   :  { %v1252_v44 = vmul.f32 %v1251_v33, %v886_v45  ;;  %v1253_v47 = vmul.f32 %v1250_v12, %v887_v46 }
 0x351   :  { %v1254_v45 = vadd.f32 %v1252_v44, %v1244_v38  ;;  %v1255_v32 = vadd.f32 %v1253_v47, %v1245_v50 }
 0x353   :  { %v1265_v29 = vpop.permute.xlu0 %1264  ;;  %v1317_v60 = vpop.permute.xlu2 %1316 }
 0x354   :  { %v1266_v15 = vsel %vm902_vm5, %v1263_v18, %v1265_v29  ;;  %v1267_v1 = vsel %vm902_vm5, %v1265_v29, %v1263_v18 }
 0x355   :  { %v1279_v11 = vpop.permute.xlu1 %1278  ;;  %v1268_v36 = vmul.f32 %v1267_v1, %v905_v48  ;;  %v1269_v37 = vmul.f32 %v1266_v15, %v906_v51  ;;  %v1815_v15 = vld [vmem:[%s2369_s0 + $0x8] sm:$0xff]  ;;  %s1907_s0 = smov [#allocation7]  }
 0x356   :  { %v1282_v58 = vsel %vm921_vm6, %v1279_v11, %v1281_v21  ;;  %v1283_v54 = vsel %vm921_vm6, %v1281_v21, %v1279_v11  ;;  %s1385_s20 = sshll.u32 %s1907_s0, 4  ;;  %s1386_s20 = int_to_ptr.vmem [resolvable:$true] %s1385_s20 }
 0x357   :  { %v1270_v48 = vadd.f32 %v1268_v36, %v1254_v45  ;;  %v1271_v5 = vadd.f32 %v1269_v37, %v1255_v32  ;;  %v1284_v51 = vmul.f32 %v1282_v58, %v924_v61  ;;  %v1285_v6 = vmul.f32 %v1283_v54, %v925_v63 }
 0x359   :  { %v1286_v62 = vadd.f32 %v1284_v51, %v1270_v48  ;;  %v1287_v57 = vadd.f32 %v1285_v6, %v1271_v5 }
 0x35b   :  { %v1289_v3 = vpop.permute.xlu0 %1288 }
 0x35d   :  { %v1291_v55 = vpop.permute.xlu1 %1290 }
 0x35e   :  { %v1292_v46 = vsel %vm934_vm7, %v1289_v3, %v1291_v55  ;;  %v1293_v4 = vsel %vm934_vm7, %v1291_v55, %v1289_v3 }
 0x35f   :  { %v1294_v7 = vmul.f32 %v1292_v46, %v937_v8  ;;  %v1295_v35 = vmul.f32 %v1293_v4, %v938_v9 }
 0x361   :  { %v1296_v61 = vadd.f32 %v1294_v7, %v1286_v62  ;;  %v1297_v16 = vadd.f32 %v1295_v35, %v1287_v57 }
 0x363   :  { %v1307_v59 = vpop.permute.xlu0 %1306 }
 0x364   :  { %v1308_v14 = vsel %vm953_vm8, %v1305_v53, %v1307_v59  ;;  %v1309_v42 = vsel %vm953_vm8, %v1307_v59, %v1305_v53 }
 0x365   :  { %v1310_v63 = vmul.f32 %v1308_v14, %v956_v13  ;;  %v1311_v8 = vmul.f32 %v1309_v42, %v957_v23  ;;  %v1315_v17 = vpop.permute.xlu1 %1314 }
 0x366   :  { %v1318_v9 = vsel %vm966_vm9, %v1315_v17, %v1317_v60  ;;  %v1319_v18 = vsel %vm966_vm9, %v1317_v60, %v1315_v17 }
 0x367   :  { %v1312_v19 = vadd.f32 %v1310_v63, %v1296_v61  ;;  %v1313_v20 = vadd.f32 %v1311_v8, %v1297_v16  ;;  %v1320_v43 = vmul.f32 %v2202_v40, %v1318_v9  ;;  %v1321_v2 = vmul.f32 %v2207_v41, %v1319_v18 }
 0x369   :  { %v1322_v21 = vadd.f32 %v1320_v43, %v1312_v19  ;;  %v1323_v10 = vadd.f32 %v1321_v2, %v1313_v20 }
 0x36b   :  { %v989_v25 = vpop.permute.xlu0 %988  ;;  %v1324_v13 = vadd.f32 %v1322_v21, %v2215_v0  ;;  %v1325_v26 = vadd.f32 %v1323_v10, %v2215_v0 }
 0x36c   :  { %v1010_v23 = vadd.f32 %v2262_v30, %v989_v25  ;;  %v1023_v22 = vadd.f32 %v2264_v31, %v989_v25 }
 0x36d   :  { %v1326_v29 = vmax.f32 %v1324_v13, 0.0  ;;  %v1327_v24 = vmax.f32 %v1325_v26, 0.0 }
 0x36e   :  { %v1026_v56 = vmul.f32 0.5, %v1010_v23  ;;  %v1027_v49 = vmul.f32 0.5, %v1023_v22 }
 0x36f   :  { %v1328_v11 = vpack.c.bf16 %v1326_v29, %v1326_v29  ;;  %v1329_v12 = vpack.c.bf16 %v1327_v24, %v1327_v24 }
 0x370   :  { %1806 = vtanh.f32 %v1026_v56 }
 0x371   :  { %1808 = vtanh.f32 %v1027_v49  ;;  %v1331_v40 = vsel %vm614_vm0, %v1328_v11, 0  ;;  %v1334_v41 = vsel %vm614_vm0, %v1329_v12, 0 }
 0x372   :  { %1343 = vmatpush.bf16.msrb.mxu0 %v1331_v40  ;;  %1356 = vmatpush.bf16.msrb.mxu1 %v1334_v41 }
 0x375   :  { %1716 = vmatmul.msk.bf16.vlgmr.msrb.gmra.mxu0 %vm604_vm1, %v2230_v52  ;;  %1717 = vmatmul.msk.bf16.vlgmr.msrb.gmra.mxu1 %vm604_vm1, %v2230_v52 }
 0x376   :  { %v1807_v0 = vpop.eup %1806 }
 0x377   :  { %v1809_v30 = vpop.eup %1808  ;;  %v1030_v31 = vadd.f32 1.0, %v1807_v0 }
 0x378   :  { %v1031_v33 = vadd.f32 1.0, %v1809_v30 }
 0x379   :  { %v1032_v34 = vmul.f32 0.5, %v1030_v31 }
 0x37a   :  { %v1033_v39 = vmul.f32 0.5, %v1031_v33 }
 0x37b   :  { %v1034_v28 = vmul.f32 %v1814_v27, %v1032_v34 }
 0x37c   :  { %v1035_v1 = vmul.f32 %v1815_v15, %v1033_v39 }
 0x37d   :  { %1036 = vst [vmem:[#allocation7] sm:$0xf] %v1034_v28 }
 0x37e   :  { %1037 = vst [vmem:[#allocation7 + $0x8] sm:$0xf] %v1035_v1 }
 0x3f2   :  { %v1345_v44 = vpop.f32.mrf.mxu0  ;;  %v1358_v52 = vpop.f32.mrf.mxu1 }
 0x3f3   :  { %v1346_v47 = vadd.f32 %v1345_v44, %v989_v25  ;;  %v1359_v38 = vadd.f32 %v1358_v52, %v989_v25 }
 0x3f5   :  { %v1362_v50 = vmul.f32 0.5, %v1346_v47  ;;  %v1363_v53 = vmul.f32 0.5, %v1359_v38 }
 0x3f7   :  { %1810 = vtanh.f32 %v1362_v50 }
 0x3f8   :  { %1812 = vtanh.f32 %v1363_v53 }
 0x3fa   :  { %v1347_v36 = vpop.f32.mrf.mxu0  ;;  %v1360_v37 = vpop.f32.mrf.mxu1 }
 0x3fd   :  { %v1811_v3 = vpop.eup %1810 }
 0x3fe   :  { %v1813_v58 = vpop.eup %1812  ;;  %v1366_v54 = vadd.f32 1.0, %v1811_v3 }
 0x3ff   :  { %v1367_v45 = vadd.f32 1.0, %v1813_v58 }
 0x400   :  { %v1368_v32 = vmul.f32 0.5, %v1366_v54 }
 0x401   :  { %v1369_v55 = vmul.f32 0.5, %v1367_v45 }
 0x402   :  { %v1372_v46 = vrot.slane %v1368_v32, 4 }
 0x403   :  { %v1373_v4 = vrot.slane %v1369_v55, 4 }
 0x404   :  { %v1376_v48 = vmul.f32 %v1814_v27, %v1372_v46 }
 0x405   :  { %v1377_v5 = vmul.f32 %v1815_v15, %v1373_v4 }
 0x406   :  { %1378 = vst [vmem:[#allocation7] sm:$0xf0] %v1376_v48 }
 0x407   :  { %1379 = vst [vmem:[#allocation7 + $0x8] sm:$0xf0] %v1377_v5 }
 0x408   :  { %1390 = dma.vmem_to_hbm [thread:$0]  %s1386_s20, 256, %s1388_s5, [#allocation4]  }
 0x409   :  { %1892 = dma.done.wait [#allocation4], 256  }
 0x40a   :  { %1893 = vsyncadd [#allocation4], 4294967040 }
 0x40b   :  { %1395 = vsyncpa [#allocation3], 1 }
 0x40c   :  { %1396 = vsyncpa [#allocation6], 1 }
 0x40d   :  { %1397 = vsyncpa [#allocation4], 1 }

// kernel: tpu_custom_call.1
= control target key start
LH: loop header
LB: loop body
LE: loop exit
PB: predicated region body
PF: predicated region fallthrough
CT: control target
= control target key end

     0   :  { %15 = vsyncpa [#allocation3], 0  ;;  %s2369_s0 = inlined_call_operand.vmem [shape: f32[8,256], index: 0, kind: input, shape index: {}]   ;;  %s2370_s1 = inlined_call_operand.hbm [shape: bf16[256,256], index: 1, kind: input, shape index: {}]   ;;  %s2371_s2 = inlined_call_operand.hbm [shape: bf16[256,256], index: 2, kind: input, shape index: {}]   ;;  %s2372_s3 = inlined_call_operand.vmem [shape: bf16[36,4], index: 3, kind: input, shape index: {}]   ;;  %s2373_s4 = inlined_call_operand.vmem [shape: bf16[36,4], index: 4, kind: input, shape index: {}]   ;;  %s2374_s5 = inlined_call_operand.vmem [shape: bf16[36,4], index: 5, kind: input, shape index: {}]   ;;  %s2375_s6 = inlined_call_operand.vmem [shape: f32[9,256], index: 6, kind: input, shape index: {}]   ;;  %s2376_s7 = inlined_call_operand.vmem [shape: f32[4,1], index: 7, kind: input, shape index: {}]   ;;  %s2377_s8 = inlined_call_operand.vmem [shape: bf16[4,4], index: 8, kind: input, shape index: {}]   ;;  %s2378_s9 = inlined_call_operand.vmem [shape: f32[4,1], index: 9, kind: input, shape index: {}]   ;;  %s2379_s10 = inlined_call_operand.hbm [shape: f32[8,256], index: 10, kind: output, shape index: {}]  }
   0x1   :  { %16 = vsyncpa [#allocation6], 0 }
   0x2   :  { %17 = vsyncpa [#allocation4], 0  ;;  %s24_s15 = sshll.u32 %s2370_s1, 4  ;;  %s1894_s16 = smov [#allocation2]   ;;  %s25_s15 = int_to_ptr.hbm [resolvable:$true] %s24_s15 }
   0x3   :  { %s26_s17 = sshll.u32 %s1894_s16, 4  ;;  %s37_s20 = sshll.u32 %s2371_s2, 4  ;;  %s27_s17 = int_to_ptr.vmem [resolvable:$true] %s26_s17  ;;  %s38_s20 = int_to_ptr.hbm [resolvable:$true] %s37_s20 }
   0x4   :  { %s1895_s21 = smov 128   ;;  %s1896_s22 = smov 8  }
   0x5   :  { %32 = dma.hbm_to_vmem [thread:$0]  %s25_s15, 4096, %s27_s17, [#allocation3], %s1895_s21, %s1895_s21, %s1896_s22  }
   0x6   :  { %s1897_s23 = smov [#allocation5]  }
   0x7   :  { %s39_s24 = sshll.u32 %s1897_s23, 4  ;;  %s40_s24 = int_to_ptr.vmem [resolvable:$true] %s39_s24 }
   0x8   :  { %45 = dma.hbm_to_vmem [thread:$0]  %s38_s20, 4096, %s40_s24, [#allocation6], %s1895_s21, %s1895_s21, %s1896_s22  }
   0x9   :  { %1888 = dma.done.wait [#allocation3], 4096  }
   0xa   :  { %1889 = vsyncadd [#allocation3], 4294963200 }
   0xb   :  { %1890 = dma.done.wait [#allocation6], 4096  }
   0xc   :  { %1891 = vsyncadd [#allocation6], 4294963200  ;;  %v1456_v0 = vld [vmem:[#allocation2 + $0x70] sm:$0xf]  ;;  %v1733_v1 = vld [vmem:[#allocation2 + $0x74] sm:$0xf0] }
   0xd   :  { %v1520_v2 = vld [vmem:[#allocation2 + $0xf0] sm:$0xf]  ;;  %v1457_v3 = vor.u32 %v1733_v1, %v1456_v0  ;;  %v1749_v4 = vld [vmem:[#allocation2 + $0xf4] sm:$0xf0]  ;;  %v1732_v5 = vld [vmem:[#allocation2 + $0x74] sm:$0xf] }
   0xe   :  { %v1458_v6 = vld [vmem:[#allocation2 + $0x78] sm:$0xf0]  ;;  %v1521_v7 = vor.u32 %v1749_v4, %v1520_v2  ;;  %v1748_v9 = vld [vmem:[#allocation2 + $0xf4] sm:$0xf]  ;;  %v1448_v11 = vld [vmem:[#allocation2 + $0x60] sm:$0xf] }
   0xf   :  { %v1461_v8 = vor.u32 %v1732_v5, %v1458_v6  ;;  %v1522_v10 = vld [vmem:[#allocation2 + $0xf8] sm:$0xf0]  ;;  %271 = vmatpush.bf16.msra.mxu0 %v1457_v3  ;;  %v1731_v13 = vld [vmem:[#allocation2 + $0x64] sm:$0xf0]  ;;  %v1512_v14 = vld [vmem:[#allocation2 + $0xe0] sm:$0xf] }
  0x10   :  { %v1525_v12 = vor.u32 %v1748_v9, %v1522_v10  ;;  %v1747_v15 = vld [vmem:[#allocation2 + $0xe4] sm:$0xf0]  ;;  %284 = vmatpush.bf16.msra.mxu1 %v1521_v7  ;;  %v1449_v16 = vor.u32 %v1731_v13, %v1448_v11  ;;  %v1730_v18 = vld [vmem:[#allocation2 + $0x64] sm:$0xf]  ;;  %v1450_v19 = vld [vmem:[#allocation2 + $0x68] sm:$0xf0] }
  0x11   :  { %297 = vmatpush.bf16.msra.mxu2 %v1461_v8  ;;  %v1513_v17 = vor.u32 %v1747_v15, %v1512_v14  ;;  %v1746_v20 = vld [vmem:[#allocation2 + $0xe4] sm:$0xf]  ;;  %v1453_v21 = vor.u32 %v1730_v18, %v1450_v19  ;;  %v1514_v22 = vld [vmem:[#allocation2 + $0xe8] sm:$0xf0]  ;;  %v1440_v23 = vld [vmem:[#allocation2 + $0x50] sm:$0xf] }
  0x12   :  { %310 = vmatpush.bf16.msra.mxu3 %v1525_v12  ;;  %v1729_v24 = vld [vmem:[#allocation2 + $0x54] sm:$0xf0]  ;;  %v1517_v25 = vor.u32 %v1746_v20, %v1514_v22  ;;  %v1504_v26 = vld [vmem:[#allocation2 + $0xd0] sm:$0xf]  ;;  %v1728_v28 = vld [vmem:[#allocation2 + $0x54] sm:$0xf] }
  0x13   :  { %v1745_v27 = vld [vmem:[#allocation2 + $0xd4] sm:$0xf0]  ;;  %272 = vmatpush.bf16.msra.mxu0 %v1449_v16  ;;  %v1441_v29 = vor.u32 %v1729_v24, %v1440_v23  ;;  %v1442_v30 = vld [vmem:[#allocation2 + $0x58] sm:$0xf0]  ;;  %v1744_v31 = vld [vmem:[#allocation2 + $0xd4] sm:$0xf] }
  0x14   :  { %v1506_v32 = vld [vmem:[#allocation2 + $0xd8] sm:$0xf0]  ;;  %285 = vmatpush.bf16.msra.mxu1 %v1513_v17  ;;  %v1505_v33 = vor.u32 %v1745_v27, %v1504_v26  ;;  %v1445_v34 = vor.u32 %v1728_v28, %v1442_v30  ;;  %v1432_v35 = vld [vmem:[#allocation2 + $0x40] sm:$0xf]  ;;  %v1727_v36 = vld [vmem:[#allocation2 + $0x44] sm:$0xf0] }
  0x15   :  { %298 = vmatpush.bf16.msra.mxu2 %v1453_v21  ;;  %v1496_v37 = vld [vmem:[#allocation2 + $0xc0] sm:$0xf]  ;;  %v1509_v38 = vor.u32 %v1744_v31, %v1506_v32  ;;  %v1743_v39 = vld [vmem:[#allocation2 + $0xc4] sm:$0xf0]  ;;  %v1726_v40 = vld [vmem:[#allocation2 + $0x44] sm:$0xf]  ;;  %v1433_v44 = vor.u32 %v1727_v36, %v1432_v35 }
  0x16   :  { %311 = vmatpush.bf16.msra.mxu3 %v1517_v25  ;;  %v1434_v41 = vld [vmem:[#allocation2 + $0x48] sm:$0xf0]  ;;  %v1742_v42 = vld [vmem:[#allocation2 + $0xc4] sm:$0xf]  ;;  %v1497_v45 = vor.u32 %v1743_v39, %v1496_v37  ;;  %v1424_v47 = vld [vmem:[#allocation2 + $0x30] sm:$0xf] }
  0x17   :  { %v1498_v43 = vld [vmem:[#allocation2 + $0xc8] sm:$0xf0]  ;;  %273 = vmatpush.bf16.msra.mxu0 %v1441_v29  ;;  %v1437_v46 = vor.u32 %v1726_v40, %v1434_v41  ;;  %v1725_v48 = vld [vmem:[#allocation2 + $0x34] sm:$0xf0]  ;;  %v1488_v49 = vld [vmem:[#allocation2 + $0xb0] sm:$0xf] }
  0x18   :  { %286 = vmatpush.bf16.msra.mxu1 %v1505_v33  ;;  %v1501_v50 = vor.u32 %v1742_v42, %v1498_v43  ;;  %v1741_v51 = vld [vmem:[#allocation2 + $0xb4] sm:$0xf0]  ;;  %v1724_v52 = vld [vmem:[#allocation2 + $0x34] sm:$0xf]  ;;  %v1426_v53 = vld [vmem:[#allocation2 + $0x38] sm:$0xf0]  ;;  %v1425_v56 = vor.u32 %v1725_v48, %v1424_v47 }
  0x19   :  { %299 = vmatpush.bf16.msra.mxu2 %v1445_v34  ;;  %v1740_v54 = vld [vmem:[#allocation2 + $0xb4] sm:$0xf]  ;;  %v1490_v55 = vld [vmem:[#allocation2 + $0xb8] sm:$0xf0]  ;;  %v1489_v57 = vor.u32 %v1741_v51, %v1488_v49  ;;  %v1429_v58 = vor.u32 %v1724_v52, %v1426_v53  ;;  %v1416_v59 = vld [vmem:[#allocation2 + $0x20] sm:$0xf] }
  0x1a   :  { %312 = vmatpush.bf16.msra.mxu3 %v1509_v38  ;;  %v1723_v60 = vld [vmem:[#allocation2 + $0x24] sm:$0xf0]  ;;  %v1480_v61 = vld [vmem:[#allocation2 + $0xa0] sm:$0xf]  ;;  %v1493_v62 = vor.u32 %v1740_v54, %v1490_v55  ;;  %v1722_v0 = vld [vmem:[#allocation2 + $0x24] sm:$0xf] }
  0x1b   :  { %274 = vmatpush.bf16.msra.mxu0 %v1433_v44  ;;  %v1739_v63 = vld [vmem:[#allocation2 + $0xa4] sm:$0xf0]  ;;  %v1418_v1 = vld [vmem:[#allocation2 + $0x28] sm:$0xf0]  ;;  %v1738_v2 = vld [vmem:[#allocation2 + $0xa4] sm:$0xf]  ;;  %v1417_v4 = vor.u32 %v1723_v60, %v1416_v59 }
  0x1c   :  { %287 = vmatpush.bf16.msra.mxu1 %v1497_v45  ;;  %v1482_v3 = vld [vmem:[#allocation2 + $0xa8] sm:$0xf0]  ;;  %v1481_v5 = vor.u32 %v1739_v63, %v1480_v61  ;;  %v1421_v6 = vor.u32 %v1722_v0, %v1418_v1  ;;  %v1408_v7 = vld [vmem:[#allocation2 + $0x10] sm:$0xf]  ;;  %v1721_v8 = vld [vmem:[#allocation2 + $0x14] sm:$0xf0] }
  0x1d   :  { %300 = vmatpush.bf16.msra.mxu2 %v1437_v46  ;;  %v1472_v9 = vld [vmem:[#allocation2 + $0x90] sm:$0xf]  ;;  %v1485_v10 = vor.u32 %v1738_v2, %v1482_v3  ;;  %v1737_v11 = vld [vmem:[#allocation2 + $0x94] sm:$0xf0]  ;;  %v1720_v12 = vld [vmem:[#allocation2 + $0x14] sm:$0xf]  ;;  %v1409_v17 = vor.u32 %v1721_v8, %v1408_v7 }
  0x1e   :  { %313 = vmatpush.bf16.msra.mxu3 %v1501_v50  ;;  %v1410_v13 = vld [vmem:[#allocation2 + $0x18] sm:$0xf0]  ;;  %v1736_v14 = vld [vmem:[#allocation2 + $0x94] sm:$0xf]  ;;  %v1400_v16 = vld [vmem:[#allocation2] sm:$0xf]  ;;  %v1473_v21 = vor.u32 %v1737_v11, %v1472_v9 }
  0x1f   :  { %275 = vmatpush.bf16.msra.mxu0 %v1425_v56  ;;  %v1474_v15 = vld [vmem:[#allocation2 + $0x98] sm:$0xf0]  ;;  %v1719_v18 = vld [vmem:[#allocation2 + $0x4] sm:$0xf0]  ;;  %v1464_v19 = vld [vmem:[#allocation2 + $0x80] sm:$0xf]  ;;  %v1413_v22 = vor.u32 %v1720_v12, %v1410_v13 }
  0x20   :  { %288 = vmatpush.bf16.msra.mxu1 %v1489_v57  ;;  %v1735_v20 = vld [vmem:[#allocation2 + $0x84] sm:$0xf0]  ;;  %v1718_v23 = vld [vmem:[#allocation2 + $0x4] sm:$0xf]  ;;  %v1477_v26 = vor.u32 %v1736_v14, %v1474_v15  ;;  %v1402_v27 = vld [vmem:[#allocation2 + $0x8] sm:$0xf0]  ;;  %v1401_v34 = vor.u32 %v1719_v18, %v1400_v16 }
  0x21   :  { %301 = vmatpush.bf16.msra.mxu2 %v1429_v58  ;;  %v69_v24 = vld [vmem:[%s2369_s0] sm:$0xff]  ;;  %v70_v25 = vld [vmem:[%s2369_s0 + $0x8] sm:$0xff]  ;;  %v1584_v31 = vld [vmem:[#allocation5 + $0x70] sm:$0xf]  ;;  %v1465_v39 = vor.u32 %v1735_v20, %v1464_v19  ;;  %v1405_v40 = vor.u32 %v1718_v23, %v1402_v27  ;;  %vm614_vm0 = vcmask 1041408   ;;  %vm604_vm1 = vcmask 31744  }
  0x22   :  { %314 = vmatpush.bf16.msra.mxu3 %v1493_v62  ;;  %v1734_v28 = vld [vmem:[#allocation2 + $0x84] sm:$0xf]  ;;  %v1466_v29 = vld [vmem:[#allocation2 + $0x88] sm:$0xf0]  ;;  %v71_v30 = vpack.c.bf16 %v70_v25, %v69_v24  ;;  %v1765_v32 = vld [vmem:[#allocation5 + $0x74] sm:$0xf0] }
  0x23   :  { %276 = vmatpush.bf16.msra.mxu0 %v1417_v4  ;;  %v1648_v33 = vld [vmem:[#allocation5 + $0xf0] sm:$0xf]  ;;  %v1781_v35 = vld [vmem:[#allocation5 + $0xf4] sm:$0xf0]  ;;  %v1764_v36 = vld [vmem:[#allocation5 + $0x74] sm:$0xf]  ;;  %v1469_v44 = vor.u32 %v1734_v28, %v1466_v29  ;;  %v1585_v45 = vor.u32 %v1765_v32, %v1584_v31 }
  0x24   :  { %289 = vmatpush.bf16.msra.mxu1 %v1481_v5  ;;  %v1586_v37 = vld [vmem:[#allocation5 + $0x78] sm:$0xf0]  ;;  %v105_v38 = vunpack.c.l.b16 %v71_v30  ;;  %v1780_v41 = vld [vmem:[#allocation5 + $0xf4] sm:$0xf]  ;;  %v106_v43 = vunpack.c.h.b16 %v71_v30  ;;  %v1649_v46 = vor.u32 %v1781_v35, %v1648_v33  ;;  %v1576_v48 = vld [vmem:[#allocation5 + $0x60] sm:$0xf] }
  0x25   :  { %302 = vmatpush.bf16.msra.mxu2 %v1421_v6  ;;  %v1650_v42 = vld [vmem:[#allocation5 + $0xf8] sm:$0xf0]  ;;  %v1589_v47 = vor.u32 %v1764_v36, %v1586_v37  ;;  %v1763_v49 = vld [vmem:[#allocation5 + $0x64] sm:$0xf0]  ;;  %v1640_v50 = vld [vmem:[#allocation5 + $0xe0] sm:$0xf] }
  0x26   :  { %315 = vmatpush.bf16.msra.mxu3 %v1485_v10  ;;  %v1653_v51 = vor.u32 %v1780_v41, %v1650_v42  ;;  %v1975_v52 = vpack.c.b16 %v105_v38, %v105_v38  ;;  %v1779_v53 = vld [vmem:[#allocation5 + $0xe4] sm:$0xf0]  ;;  %v1762_v54 = vld [vmem:[#allocation5 + $0x64] sm:$0xf]  ;;  %v1578_v55 = vld [vmem:[#allocation5 + $0x68] sm:$0xf0]  ;;  %v1977_v56 = vpack.c.b16 %v106_v43, %v106_v43  ;;  %v1577_v59 = vor.u32 %v1763_v49, %v1576_v48 }
  0x27   :  { %277 = vmatpush.bf16.msra.mxu0 %v1409_v17  ;;  %v1778_v57 = vld [vmem:[#allocation5 + $0xe4] sm:$0xf]  ;;  %v1642_v58 = vld [vmem:[#allocation5 + $0xe8] sm:$0xf0]  ;;  %v1641_v60 = vor.u32 %v1779_v53, %v1640_v50  ;;  %v1581_v61 = vor.u32 %v1762_v54, %v1578_v55  ;;  %v1568_v62 = vld [vmem:[#allocation5 + $0x50] sm:$0xf] }
  0x28   :  { %290 = vmatpush.bf16.msra.mxu1 %v1473_v21  ;;  %v1761_v63 = vld [vmem:[#allocation5 + $0x54] sm:$0xf0]  ;;  %v1632_v0 = vld [vmem:[#allocation5 + $0xd0] sm:$0xf]  ;;  %v1645_v1 = vor.u32 %v1778_v57, %v1642_v58  ;;  %v1760_v3 = vld [vmem:[#allocation5 + $0x54] sm:$0xf] }
  0x29   :  { %303 = vmatpush.bf16.msra.mxu2 %v1413_v22  ;;  %v1777_v2 = vld [vmem:[#allocation5 + $0xd4] sm:$0xf0]  ;;  %v1570_v4 = vld [vmem:[#allocation5 + $0x58] sm:$0xf0]  ;;  %v1776_v5 = vld [vmem:[#allocation5 + $0xd4] sm:$0xf]  ;;  %v1569_v7 = vor.u32 %v1761_v63, %v1568_v62 }
  0x2a   :  { %316 = vmatpush.bf16.msra.mxu3 %v1477_v26  ;;  %v1634_v6 = vld [vmem:[#allocation5 + $0xd8] sm:$0xf0]  ;;  %v1633_v8 = vor.u32 %v1777_v2, %v1632_v0  ;;  %v1573_v9 = vor.u32 %v1760_v3, %v1570_v4  ;;  %v1560_v10 = vld [vmem:[#allocation5 + $0x40] sm:$0xf]  ;;  %v1759_v11 = vld [vmem:[#allocation5 + $0x44] sm:$0xf0] }
  0x2b   :  { %278 = vmatpush.bf16.msra.mxu0 %v1401_v34  ;;  %v1624_v12 = vld [vmem:[#allocation5 + $0xc0] sm:$0xf]  ;;  %v1637_v13 = vor.u32 %v1776_v5, %v1634_v6  ;;  %v1775_v14 = vld [vmem:[#allocation5 + $0xc4] sm:$0xf0]  ;;  %v1758_v15 = vld [vmem:[#allocation5 + $0x44] sm:$0xf]  ;;  %v1561_v19 = vor.u32 %v1759_v11, %v1560_v10 }
  0x2c   :  { %291 = vmatpush.bf16.msra.mxu1 %v1465_v39  ;;  %v1562_v16 = vld [vmem:[#allocation5 + $0x48] sm:$0xf0]  ;;  %v1774_v17 = vld [vmem:[#allocation5 + $0xc4] sm:$0xf]  ;;  %v1552_v20 = vld [vmem:[#allocation5 + $0x30] sm:$0xf]  ;;  %v1625_v21 = vor.u32 %v1775_v14, %v1624_v12 }
  0x2d   :  { %304 = vmatpush.bf16.msra.mxu2 %v1405_v40  ;;  %v1626_v18 = vld [vmem:[#allocation5 + $0xc8] sm:$0xf0]  ;;  %v1565_v22 = vor.u32 %v1758_v15, %v1562_v16  ;;  %v1757_v23 = vld [vmem:[#allocation5 + $0x34] sm:$0xf0]  ;;  %v1616_v24 = vld [vmem:[#allocation5 + $0xb0] sm:$0xf] }
  0x2e   :  { %317 = vmatpush.bf16.msra.mxu3 %v1469_v44  ;;  %279 = vmatmul.bf16.vlgmr.msra.gmra.mxu0 %v1975_v52  ;;  %v1773_v25 = vld [vmem:[#allocation5 + $0xb4] sm:$0xf0]  ;;  %v1629_v26 = vor.u32 %v1774_v17, %v1626_v18  ;;  %v1756_v27 = vld [vmem:[#allocation5 + $0x34] sm:$0xf]  ;;  %v1554_v28 = vld [vmem:[#allocation5 + $0x38] sm:$0xf0]  ;;  %v1553_v31 = vor.u32 %v1757_v23, %v1552_v20 }
  0x2f   :  { %515 = vmatpush.bf16.msrb.mxu0 %v1585_v45  ;;  %292 = vmatmul.bf16.vlgmr.msra.gmra.mxu1 %v1977_v56  ;;  %v1772_v29 = vld [vmem:[#allocation5 + $0xb4] sm:$0xf]  ;;  %v1618_v30 = vld [vmem:[#allocation5 + $0xb8] sm:$0xf0]  ;;  %v1617_v32 = vor.u32 %v1773_v25, %v1616_v24  ;;  %v1557_v33 = vor.u32 %v1756_v27, %v1554_v28  ;;  %v1544_v34 = vld [vmem:[#allocation5 + $0x20] sm:$0xf] }
  0x30   :  { %528 = vmatpush.bf16.msrb.mxu1 %v1649_v46  ;;  %305 = vmatmul.bf16.vlgmr.msra.gmra.mxu2 %v1975_v52  ;;  %v1755_v35 = vld [vmem:[#allocation5 + $0x24] sm:$0xf0]  ;;  %v1608_v36 = vld [vmem:[#allocation5 + $0xa0] sm:$0xf]  ;;  %v1621_v37 = vor.u32 %v1772_v29, %v1618_v30  ;;  %v1754_v39 = vld [vmem:[#allocation5 + $0x24] sm:$0xf] }
  0x31   :  { %541 = vmatpush.bf16.msrb.mxu2 %v1589_v47  ;;  %318 = vmatmul.bf16.vlgmr.msra.gmra.mxu3 %v1977_v56  ;;  %v1771_v38 = vld [vmem:[#allocation5 + $0xa4] sm:$0xf0]  ;;  %v1546_v40 = vld [vmem:[#allocation5 + $0x28] sm:$0xf0]  ;;  %v1770_v41 = vld [vmem:[#allocation5 + $0xa4] sm:$0xf]  ;;  %v1545_v43 = vor.u32 %v1755_v35, %v1544_v34 }
  0x32   :  { %554 = vmatpush.bf16.msrb.mxu3 %v1653_v51  ;;  %v1610_v42 = vld [vmem:[#allocation5 + $0xa8] sm:$0xf0]  ;;  %v1609_v44 = vor.u32 %v1771_v38, %v1608_v36  ;;  %v1549_v45 = vor.u32 %v1754_v39, %v1546_v40  ;;  %v1536_v46 = vld [vmem:[#allocation5 + $0x10] sm:$0xf]  ;;  %v1753_v47 = vld [vmem:[#allocation5 + $0x14] sm:$0xf0] }
  0x33   :  { %516 = vmatpush.bf16.msrb.mxu0 %v1577_v59  ;;  %v1600_v48 = vld [vmem:[#allocation5 + $0x90] sm:$0xf]  ;;  %v1613_v49 = vor.u32 %v1770_v41, %v1610_v42  ;;  %v1769_v50 = vld [vmem:[#allocation5 + $0x94] sm:$0xf0]  ;;  %v1752_v51 = vld [vmem:[#allocation5 + $0x14] sm:$0xf]  ;;  %v1537_v57 = vor.u32 %v1753_v47, %v1536_v46 }
  0x34   :  { %529 = vmatpush.bf16.msrb.mxu1 %v1641_v60  ;;  %v1538_v53 = vld [vmem:[#allocation5 + $0x18] sm:$0xf0]  ;;  %v1768_v54 = vld [vmem:[#allocation5 + $0x94] sm:$0xf]  ;;  %v1601_v58 = vor.u32 %v1769_v50, %v1600_v48  ;;  %v1528_v60 = vld [vmem:[#allocation5] sm:$0xf] }
  0x35   :  { %542 = vmatpush.bf16.msrb.mxu2 %v1581_v61  ;;  %v1602_v55 = vld [vmem:[#allocation5 + $0x98] sm:$0xf0]  ;;  %v1541_v59 = vor.u32 %v1752_v51, %v1538_v53  ;;  %v1751_v61 = vld [vmem:[#allocation5 + $0x4] sm:$0xf0]  ;;  %v1592_v62 = vld [vmem:[#allocation5 + $0x80] sm:$0xf] }
  0x36   :  { %555 = vmatpush.bf16.msrb.mxu3 %v1645_v1  ;;  %v1605_v63 = vor.u32 %v1768_v54, %v1602_v55  ;;  %v1767_v0 = vld [vmem:[#allocation5 + $0x84] sm:$0xf0]  ;;  %v1750_v1 = vld [vmem:[#allocation5 + $0x4] sm:$0xf]  ;;  %v1530_v2 = vld [vmem:[#allocation5 + $0x8] sm:$0xf0]  ;;  %v1529_v5 = vor.u32 %v1751_v61, %v1528_v60 }
  0x37   :  { %517 = vmatpush.bf16.msrb.mxu0 %v1569_v7  ;;  %v1766_v3 = vld [vmem:[#allocation5 + $0x84] sm:$0xf]  ;;  %v1594_v4 = vld [vmem:[#allocation5 + $0x88] sm:$0xf0]  ;;  %v1593_v6 = vor.u32 %v1767_v0, %v1592_v62  ;;  %v1533_v7 = vor.u32 %v1750_v1, %v1530_v2  ;;  %v619_v10 = vsel %vm614_vm0, %v1977_v56, 0  ;;  %s1899_s23 = smov 16  }
  0x38   :  { %530 = vmatpush.bf16.msrb.mxu1 %v1633_v8  ;;  %v1597_v8 = vor.u32 %v1766_v3, %v1594_v4  ;;  %v1994_v11 = vld [vmem:[%s2372_s3] sm:$0xff]  ;;  %v2003_v12 = vld [vmem:[%s2372_s3 + $0x8] sm:$0xff]  ;;  %s1900_s24 = smov 15   ;;  %s1902_s1 = smov 1  }
  0x39   :  { %543 = vmatpush.bf16.msrb.mxu2 %v1573_v9  ;;  %v616_v9 = vsel %vm614_vm0, %v1975_v52, 0  ;;  %v1785_v36 = vld [vmem:[%s2373_s4 + $0x8] sm:$0xff]  ;;  %s1903_s2 = smov 127   ;;  %s1904_s25 = smov 113  }
  0x3a   :  { %556 = vmatpush.bf16.msrb.mxu3 %v1637_v13  ;;  %v573_v13 = vld [vmem:[%s2372_s3 + $0x10] sm:$0x3]  ;;  %v2057_v62 = vld [vmem:[%s2374_s5 + $0x8] sm:$0xff]  ;;  %s1905_s26 = smov 112   ;;  %s1906_s29 = smov 111  }
  0x3b   :  { %518 = vmatpush.bf16.msrb.mxu0 %v1561_v19  ;;  %v600_v14 = vunpack.c.l.b16 %v573_v13 }
  0x3c   :  { %531 = vmatpush.bf16.msrb.mxu1 %v1625_v21 }
  0x3d   :  { %544 = vmatpush.bf16.msrb.mxu2 %v1565_v22  ;;  %v2012_v15 = vpack.c.b16 %v600_v14, %v600_v14 }
  0x3e   :  { %557 = vmatpush.bf16.msrb.mxu3 %v1629_v26 }
  0x3f   :  { %519 = vmatpush.bf16.msrb.mxu0 %v1553_v31 }
  0x40   :  { %532 = vmatpush.bf16.msrb.mxu1 %v1617_v32 }
  0x41   :  { %545 = vmatpush.bf16.msrb.mxu2 %v1557_v33  ;;  %v1784_v33 = vld [vmem:[%s2373_s4] sm:$0xff] }
  0x42   :  { %558 = vmatpush.bf16.msrb.mxu3 %v1621_v37 }
  0x43   :  { %520 = vmatpush.bf16.msrb.mxu0 %v1545_v43 }
  0x44   :  { %533 = vmatpush.bf16.msrb.mxu1 %v1609_v44  ;;  %v578_v44 = vld [vmem:[%s2373_s4 + $0x10] sm:$0x3] }
  0x45   :  { %546 = vmatpush.bf16.msrb.mxu2 %v1549_v45  ;;  %v676_v53 = vunpack.c.l.b16 %v578_v44 }
  0x46   :  { %559 = vmatpush.bf16.msrb.mxu3 %v1613_v49 }
  0x47   :  { %521 = vmatpush.bf16.msrb.mxu0 %v1537_v57  ;;  %v679_v61 = vpack.c.b16 %v676_v53, %v676_v53 }
  0x48   :  { %534 = vmatpush.bf16.msrb.mxu1 %v1601_v58  ;;  %v2044_v58 = vld [vmem:[%s2374_s5] sm:$0xff] }
  0x49   :  { %547 = vmatpush.bf16.msrb.mxu2 %v1541_v59 }
  0x4a   :  { %560 = vmatpush.bf16.msrb.mxu3 %v1605_v63  ;;  %v583_v63 = vld [vmem:[%s2374_s5 + $0x10] sm:$0x3]  ;;  %s1898_s5 = smov 17  }
  0x4b   :  { %522 = vmatpush.bf16.msrb.mxu0 %v1529_v5  ;;  %v765_v0 = vunpack.c.l.b16 %v583_v63 }
  0x4c   :  { %535 = vmatpush.bf16.msrb.mxu1 %v1593_v6 }
  0x4d   :  { %548 = vmatpush.bf16.msrb.mxu2 %v1533_v7  ;;  %v2066_v1 = vpack.c.b16 %v765_v0, %v765_v0 }
  0x4e   :  { %561 = vmatpush.bf16.msrb.mxu3 %v1597_v8  ;;  %523 = vmatmul.bf16.vlgmr.msrb.gmra.mxu0 %v1975_v52 }
  0x4f   :  { %628 = vmatpush.bf16.msra.mxu0 %v616_v9  ;;  %536 = vmatmul.bf16.vlgmr.msrb.gmra.mxu1 %v1977_v56 }
  0x50   :  { %651 = vmatpush.bf16.msra.mxu1 %v619_v10  ;;  %549 = vmatmul.bf16.vlgmr.msrb.gmra.mxu2 %v1975_v52 }
  0x51   :  { %562 = vmatmul.bf16.vlgmr.msrb.gmra.mxu3 %v1977_v56 }
  0x5e   :  { %1662 = vmatmul.msk.bf16.vlgmr.msra.gmra.mxu0 %vm604_vm1, %v1994_v11 }
  0x5f   :  { %1665 = vmatmul.msk.bf16.vlgmr.msra.gmra.mxu1 %vm604_vm1, %v1994_v11 }
  0x6e   :  { %1663 = vmatmul.msk.bf16.gmra.mxu0 %vm604_vm1, %v2003_v12 }
  0x6f   :  { %1666 = vmatmul.msk.bf16.gmra.mxu1 %vm604_vm1, %v2003_v12 }
  0x7e   :  { %1664 = vmatmul.msk.bf16.gmra.mxu0 %vm604_vm1, %v2012_v15 }
  0x7f   :  { %1667 = vmatmul.msk.bf16.gmra.mxu1 %vm604_vm1, %v2012_v15 }
  0xab   :  { %v280_v16 = vpop.f32.mrf.mxu0 }
  0xac   :  { %v293_v17 = vpop.f32.mrf.mxu1 }
  0xad   :  { %v294_v18 = vadd.f32 %v293_v17, %v280_v16 }
  0xb3   :  { %v306_v19 = vpop.f32.mrf.mxu2  ;;  %v282_v22 = vpop.f32.mrf.mxu0 }
  0xb4   :  { %v319_v20 = vpop.f32.mrf.mxu3  ;;  %v295_v24 = vpop.f32.mrf.mxu1 }
  0xb5   :  { %v320_v21 = vadd.f32 %v319_v20, %v306_v19 }
  0xb7   :  { %v567_v23 = vpack.c.bf16 %v320_v21, %v294_v18 }
  0xb9   :  { %v681_v25 = vunpack.c.l.b16 %v567_v23  ;;  %v682_v26 = vunpack.c.h.b16 %v567_v23 }
  0xbb   :  { %v683_v27 = vpack.c.b16 %v681_v25, %v681_v25  ;;  %v684_v28 = vpack.c.b16 %v682_v26, %v682_v26  ;;  %v308_v29 = vpop.f32.mrf.mxu2 }
  0xbc   :  { %v321_v30 = vpop.f32.mrf.mxu3 }
  0xbd   :  { %v695_v31 = vsel %vm614_vm0, %v683_v27, 0  ;;  %v698_v32 = vsel %vm614_vm0, %v684_v28, 0  ;;  %v1092_v47 = vrot.slane %v683_v27, 2  ;;  %v1093_v48 = vrot.slane %v684_v28, 2 }
  0xbe   :  { %707 = vmatpush.bf16.msra.mxu2 %v695_v31  ;;  %730 = vmatpush.bf16.msra.mxu3 %v698_v32 }
  0xbf   :  { %v1095_v59 = vsel %vm614_vm0, %v1092_v47, 0  ;;  %v1098_v60 = vsel %vm614_vm0, %v1093_v48, 0 }
  0xc1   :  { %1676 = vmatmul.msk.bf16.vlgmr.msra.gmra.mxu2 %vm604_vm1, %v1784_v33  ;;  %1679 = vmatmul.msk.bf16.vlgmr.msra.gmra.mxu3 %vm604_vm1, %v1784_v33 }
  0xcb   :  { %v524_v34 = vpop.f32.mrf.mxu0 }
  0xcc   :  { %v537_v35 = vpop.f32.mrf.mxu1 }
  0xcd   :  { %v538_v37 = vadd.f32 %v537_v35, %v524_v34 }
  0xd1   :  { %1677 = vmatmul.msk.bf16.gmra.mxu2 %vm604_vm1, %v1785_v36  ;;  %1680 = vmatmul.msk.bf16.gmra.mxu3 %vm604_vm1, %v1785_v36 }
  0xd3   :  { %v550_v38 = vpop.f32.mrf.mxu2  ;;  %v526_v40 = vpop.f32.mrf.mxu0 }
  0xd4   :  { %v563_v39 = vpop.f32.mrf.mxu3  ;;  %v539_v42 = vpop.f32.mrf.mxu1 }
  0xd5   :  { %v564_v41 = vadd.f32 %v563_v39, %v550_v38  ;;  %v1901_v39 = vmov 0  }
  0xd6   :  { %1802 = vset.pattern.permute.xlu1 %v1901_v39  ;;  %1803 = vset.pattern.permute.xlu0 %v1901_v39 }
  0xd7   :  { %v568_v43 = vpack.c.bf16 %v564_v41, %v538_v37 }
  0xd9   :  { %v770_v45 = vunpack.c.l.b16 %v568_v43  ;;  %v771_v46 = vunpack.c.h.b16 %v568_v43 }
  0xdb   :  { %v2033_v49 = vpack.c.b16 %v770_v45, %v770_v45  ;;  %v2035_v50 = vpack.c.b16 %v771_v46, %v771_v46  ;;  %v552_v51 = vpop.f32.mrf.mxu2  ;;  %v630_v2 = vpop.f32.mrf.mxu0 }
  0xdc   :  { %v565_v54 = vpop.f32.mrf.mxu3  ;;  %v653_v3 = vpop.f32.mrf.mxu1 }
  0xdd   :  { %v784_v55 = vsel %vm614_vm0, %v2033_v49, 0  ;;  %v787_v57 = vsel %vm614_vm0, %v2035_v50, 0 }
  0xde   :  { %796 = vmatpush.bf16.msrb.mxu0 %v784_v55  ;;  %819 = vmatpush.bf16.msrb.mxu1 %v787_v57 }
  0xe1   :  { %1690 = vmatmul.msk.bf16.vlgmr.msrb.gmra.mxu0 %vm604_vm1, %v2044_v58  ;;  %1693 = vmatmul.msk.bf16.vlgmr.msrb.gmra.mxu1 %vm604_vm1, %v2044_v58 }
  0xe2   :  { %1107 = vmatpush.bf16.msra.mxu0 %v1095_v59  ;;  %1130 = vmatpush.bf16.msra.mxu1 %v1098_v60 }
  0xe3   :  { %1678 = vmatmul.msk.bf16.gmra.mxu2 %vm604_vm1, %v679_v61  ;;  %1681 = vmatmul.msk.bf16.gmra.mxu3 %vm604_vm1, %v679_v61  ;;  %v632_v4 = vpop.f32.mrf.mxu0 }
  0xe4   :  { %v655_v5 = vpop.f32.mrf.mxu1 }
  0xeb   :  { %v635_v6 = vpop.f32.mrf.mxu0 }
  0xec   :  { %v658_v7 = vpop.f32.mrf.mxu1 }
  0xf1   :  { %1691 = vmatmul.msk.bf16.gmra.mxu0 %vm604_vm1, %v2057_v62  ;;  %1694 = vmatmul.msk.bf16.gmra.mxu1 %vm604_vm1, %v2057_v62 }
  0xf3   :  { %v2074_v8 = vpop.f32.mrf.mxu0 }
  0xf4   :  { %v2076_v9 = vpop.f32.mrf.mxu1 }
  0xfb   :  { %v2080_v10 = vpop.f32.mrf.mxu0 }
  0xfc   :  { %v2082_v13 = vpop.f32.mrf.mxu1 }
 0x101   :  { %1692 = vmatmul.msk.bf16.gmra.mxu0 %vm604_vm1, %v2066_v1  ;;  %1695 = vmatmul.msk.bf16.gmra.mxu1 %vm604_vm1, %v2066_v1 }
 0x103   :  { %v642_v14 = vpop.f32.mrf.mxu0 }
 0x104   :  { %v665_v16 = vpop.f32.mrf.mxu1 }
 0x111   :  { %1704 = vmatmul.msk.bf16.vlgmr.msra.gmra.mxu0 %vm604_vm1, %v1784_v33  ;;  %1707 = vmatmul.msk.bf16.vlgmr.msra.gmra.mxu1 %vm604_vm1, %v1784_v33 }
 0x121   :  { %1705 = vmatmul.msk.bf16.gmra.mxu0 %vm604_vm1, %v1785_v36  ;;  %1708 = vmatmul.msk.bf16.gmra.mxu1 %vm604_vm1, %v1785_v36 }
 0x131   :  { %1706 = vmatmul.msk.bf16.gmra.mxu0 %vm604_vm1, %v679_v61  ;;  %1709 = vmatmul.msk.bf16.gmra.mxu1 %vm604_vm1, %v679_v61 }
 0x144   :  { %v709_v17 = vpop.f32.mrf.mxu2  ;;  %v732_v18 = vpop.f32.mrf.mxu3 }
 0x145   :  { %v746_v23 = vsub.f32 %v630_v2, %v709_v17  ;;  %v747_v30 = vsub.f32 %v653_v3, %v732_v18  ;;  %v588_v18 = vld [vmem:[%s2376_s7] sm:$0xf] }
 0x14c   :  { %v711_v19 = vpop.f32.mrf.mxu2  ;;  %v734_v20 = vpop.f32.mrf.mxu3 }
 0x14d   :  { %v748_v31 = vsub.f32 %v632_v4, %v711_v19  ;;  %v749_v40 = vsub.f32 %v655_v5, %v734_v20 }
 0x154   :  { %v714_v21 = vpop.f32.mrf.mxu2  ;;  %v737_v22 = vpop.f32.mrf.mxu3 }
 0x155   :  { %v750_v47 = vsub.f32 %v635_v6, %v714_v21  ;;  %v751_v48 = vsub.f32 %v658_v7, %v737_v22 }
 0x15c   :  { %v716_v27 = vpop.f32.mrf.mxu2  ;;  %v739_v28 = vpop.f32.mrf.mxu3 }
 0x15d   :  { %v752_v59 = vsub.f32 %v2074_v8, %v716_v27  ;;  %v753_v0 = vsub.f32 %v2076_v9, %v739_v28 }
 0x15e   :  { %v798_v24 = vpop.f32.mrf.mxu0  ;;  %v821_v25 = vpop.f32.mrf.mxu1 }
 0x15f   :  { %v835_v26 = vsub.f32 %v746_v23, %v798_v24  ;;  %v836_v32 = vsub.f32 %v747_v30, %v821_v25  ;;  %v2115_v25 = vld [vmem:[%s2375_s6] sm:$0xff] }
 0x160   :  { %v854_v27 = vperm.slane %v2115_v25, 0 }
 0x161   :  { %845 = vrot.lane.b32.xlu0 %v835_v26, %s1898_s5  ;;  %v862_v29 = vrot.slane %v835_v26, 4  ;;  %v863_v38 = vrot.slane %v836_v32, 4  ;;  %v2120_v26 = vld [vmem:[%s2375_s6 + $0x8] sm:$0xff] }
 0x162   :  { %v855_v28 = vperm.slane %v2120_v26, 0 }
 0x163   :  { %866 = vrot.lane.b32.xlu1 %v862_v29, %s1899_s23 }
 0x166   :  { %v800_v33 = vpop.f32.mrf.mxu0  ;;  %v823_v34 = vpop.f32.mrf.mxu1 }
 0x167   :  { %v837_v35 = vsub.f32 %v748_v31, %v800_v33  ;;  %v719_v36 = vpop.f32.mrf.mxu2  ;;  %v742_v37 = vpop.f32.mrf.mxu3  ;;  %v838_v41 = vsub.f32 %v749_v40, %v823_v34 }
 0x168   :  { %v754_v7 = vsub.f32 %v2080_v10, %v719_v36  ;;  %v755_v8 = vsub.f32 %v2082_v13, %v742_v37  ;;  %v849_v10 = vlaneseq  ;;  %v873_v36 = vperm.slane %v2115_v25, 1 }
 0x169   :  { %847 = vrot.lane.b32.xlu0 %v836_v32, %s1898_s5  ;;  %879 = vrot.lane.b32.xlu2 %v837_v35, %s1900_s24  ;;  %v894_v44 = vrot.slane %v837_v35, 4  ;;  %v895_v51 = vrot.slane %v838_v41, 4  ;;  %v874_v37 = vperm.slane %v2120_v26, 1 }
 0x16a   :  { %v2109_v24 = vand.u32 127, %v849_v10 }
 0x16b   :  { %868 = vrot.lane.b32.xlu1 %v863_v38, %s1899_s23 }
 0x16c   :  { %vm851_vm2 = vcmp.lt.s32.totalorder %v2109_v24, 17  ;;  %vm870_vm3 = vcmp.lt.s32.totalorder %v2109_v24, 16  ;;  %vm883_vm4 = vcmp.lt.s32.totalorder %v2109_v24, 15  ;;  %vm902_vm5 = vcmp.lt.s32.totalorder %v2109_v24, 1 }
 0x16d   :  { %vm921_vm6 = vcmp.lt.s32.totalorder %v2109_v24, 127  ;;  %vm934_vm7 = vcmp.lt.s32.totalorder %v2109_v24, 113  ;;  %vm953_vm8 = vcmp.lt.s32.totalorder %v2109_v24, 112  ;;  %vm966_vm9 = vcmp.lt.s32.totalorder %v2109_v24, 111 }
 0x16e   :  { %v803_v42 = vpop.f32.mrf.mxu0  ;;  %v826_v43 = vpop.f32.mrf.mxu1 }
 0x16f   :  { %v744_v45 = vpop.f32.mrf.mxu3  ;;  %v721_v46 = vpop.f32.mrf.mxu2  ;;  %v839_v53 = vsub.f32 %v750_v47, %v803_v42  ;;  %v840_v54 = vsub.f32 %v751_v48, %v826_v43  ;;  %v905_v48 = vperm.slane %v2115_v25, 3 }
 0x170   :  { %v886_v45 = vperm.slane %v2115_v25, 2  ;;  %v887_v46 = vperm.slane %v2120_v26, 2 }
 0x171   :  { %881 = vrot.lane.b32.xlu2 %v838_v41, %s1900_s24  ;;  %898 = vrot.lane.b32.xlu0 %v894_v44, %s1902_s1  ;;  %v913_v60 = vrot.slane %v839_v53, 4  ;;  %v914_v61 = vrot.slane %v840_v54, 4 }
 0x173   :  { %900 = vrot.lane.b32.xlu1 %v895_v51, %s1902_s1  ;;  %v906_v51 = vperm.slane %v2120_v26, 3 }
 0x176   :  { %v805_v55 = vpop.f32.mrf.mxu0  ;;  %v828_v57 = vpop.f32.mrf.mxu1 }
 0x177   :  { %v841_v63 = vsub.f32 %v752_v59, %v805_v55  ;;  %v842_v2 = vsub.f32 %v753_v0, %v828_v57 }
 0x179   :  { %919 = vrot.lane.b32.xlu0 %v914_v61, %s1903_s2  ;;  %917 = vrot.lane.b32.xlu2 %v913_v60, %s1903_s2  ;;  %v945_v5 = vrot.slane %v841_v63, 4  ;;  %v946_v6 = vrot.slane %v842_v2, 4  ;;  %v924_v61 = vperm.slane %v2115_v25, 5 }
 0x17b   :  { %930 = vrot.lane.b32.xlu1 %v841_v63, %s1904_s25  ;;  %v925_v63 = vperm.slane %v2120_v26, 5 }
 0x17e   :  { %v808_v3 = vpop.f32.mrf.mxu0  ;;  %v831_v4 = vpop.f32.mrf.mxu1 }
 0x17f   :  { %v843_v16 = vsub.f32 %v754_v7, %v808_v3  ;;  %v844_v17 = vsub.f32 %v755_v8, %v831_v4  ;;  %v937_v8 = vperm.slane %v2115_v25, 6 }
 0x181   :  { %932 = vrot.lane.b32.xlu2 %v842_v2, %s1904_s25  ;;  %949 = vrot.lane.b32.xlu0 %v945_v5, %s1905_s26 }
 0x183   :  { %951 = vrot.lane.b32.xlu1 %v946_v6, %s1905_s26 }
 0x186   :  { %v833_v9 = vpop.f32.mrf.mxu1  ;;  %v810_v14 = vpop.f32.mrf.mxu0 }
 0x187   :  { %v938_v9 = vperm.slane %v2120_v26, 6 }
 0x189   :  { %964 = vrot.lane.b32.xlu0 %v844_v17, %s1906_s29  ;;  %962 = vrot.lane.b32.xlu2 %v843_v16, %s1906_s29 }
 0x18b   :  { %977 = vperm.xlu1 %1802, %v588_v18  }
 0x1c3   :  { %v880_v19 = vpop.permute.xlu2 %879 }
 0x1cb   :  { %v882_v13 = vpop.permute.xlu2 %881 }
 0x1cc   :  { %v885_v47 = vsel %vm883_vm4, %v882_v13, %v880_v19 }
 0x1cd   :  { %v888_v0 = vmul.f32 %v886_v45, %v885_v47 }
 0x1d3   :  { %v846_v20 = vpop.permute.xlu0 %845  ;;  %v918_v33 = vpop.permute.xlu2 %917 }
 0x1d5   :  { %v867_v21 = vpop.permute.xlu1 %866 }
 0x1db   :  { %v848_v22 = vpop.permute.xlu0 %847  ;;  %v933_v5 = vpop.permute.xlu2 %932 }
 0x1dc   :  { %v852_v30 = vsel %vm851_vm2, %v846_v20, %v848_v22  ;;  %v853_v31 = vsel %vm851_vm2, %v848_v22, %v846_v20 }
 0x1dd   :  { %v869_v23 = vpop.permute.xlu1 %868  ;;  %v856_v34 = vmul.f32 %v854_v27, %v853_v31  ;;  %v857_v35 = vmul.f32 %v855_v28, %v852_v30 }
 0x1de   :  { %v871_v38 = vsel %vm870_vm3, %v867_v21, %v869_v23  ;;  %v872_v39 = vsel %vm870_vm3, %v869_v23, %v867_v21  ;;  %v957_v23 = vperm.slane %v2120_v26, 7 }
 0x1df   :  { %v858_v40 = vadd.f32 %v856_v34, %v839_v53  ;;  %v859_v41 = vadd.f32 %v857_v35, %v840_v54  ;;  %v875_v42 = vmul.f32 %v873_v36, %v872_v39  ;;  %v876_v43 = vmul.f32 %v874_v37, %v871_v38 }
 0x1e0   :  { %v884_v54 = vsel %vm883_vm4, %v880_v19, %v882_v13  ;;  %v956_v13 = vperm.slane %v2115_v25, 7 }
 0x1e1   :  { %v877_v59 = vadd.f32 %v875_v42, %v858_v40  ;;  %v878_v60 = vadd.f32 %v876_v43, %v859_v41  ;;  %v889_v4 = vmul.f32 %v887_v46, %v884_v54  ;;  %v2202_v40 = vld [vmem:[%s2375_s6 + $0x10] ss:$0 sm:$0xff]  ;;  %v2207_v41 = vld [vmem:[%s2375_s6 + $0x18] ss:$0 sm:$0xff] }
 0x1e3   :  { %v899_v29 = vpop.permute.xlu0 %898  ;;  %v890_v14 = vadd.f32 %v888_v0, %v877_v59  ;;  %v891_v16 = vadd.f32 %v889_v4, %v878_v60  ;;  %v963_v42 = vpop.permute.xlu2 %962 }
 0x1e5   :  { %v901_v32 = vpop.permute.xlu1 %900 }
 0x1e6   :  { %v903_v55 = vsel %vm902_vm5, %v899_v29, %v901_v32  ;;  %v904_v57 = vsel %vm902_vm5, %v901_v32, %v899_v29 }
 0x1e7   :  { %v907_v6 = vmul.f32 %v905_v48, %v904_v57  ;;  %v908_v7 = vmul.f32 %v906_v51, %v903_v55 }
 0x1e9   :  { %v909_v10 = vadd.f32 %v907_v6, %v890_v14  ;;  %v910_v22 = vadd.f32 %v908_v7, %v891_v16  ;;  %v1038_v6 = vrot.slane %v1975_v52, 2  ;;  %v1039_v7 = vrot.slane %v1977_v56, 2  ;;  %v2230_v52 = vld [vmem:[%s2377_s8] sm:$0x3] }
 0x1eb   :  { %v920_v44 = vpop.permute.xlu0 %919 }
 0x1ec   :  { %v922_v2 = vsel %vm921_vm6, %v918_v33, %v920_v44  ;;  %v923_v3 = vsel %vm921_vm6, %v920_v44, %v918_v33 }
 0x1ed   :  { %v931_v53 = vpop.permute.xlu1 %930  ;;  %v926_v17 = vmul.f32 %v924_v61, %v922_v2  ;;  %v927_v18 = vmul.f32 %v925_v63, %v923_v3 }
 0x1ee   :  { %v935_v20 = vsel %vm934_vm7, %v931_v53, %v933_v5  ;;  %v936_v21 = vsel %vm934_vm7, %v933_v5, %v931_v53 }
 0x1ef   :  { %v928_v32 = vadd.f32 %v926_v17, %v909_v10  ;;  %v929_v33 = vadd.f32 %v927_v18, %v910_v22  ;;  %v939_v34 = vmul.f32 %v937_v8, %v935_v20  ;;  %v940_v35 = vmul.f32 %v938_v9, %v936_v21 }
 0x1f0   :  { %v1044_v20 = vsel %vm614_vm0, %v1039_v7, 0  ;;  %v1156_v22 = vrot.slane %v2033_v49, 2 }
 0x1f1   :  { %v941_v43 = vadd.f32 %v939_v34, %v928_v32  ;;  %v942_v44 = vadd.f32 %v940_v35, %v929_v33 }
 0x1f2   :  { %v1159_v56 = vsel %vm614_vm0, %v1156_v22, 0 }
 0x1f3   :  { %v950_v19 = vpop.permute.xlu0 %949 }
 0x1f5   :  { %v952_v29 = vpop.permute.xlu1 %951 }
 0x1f6   :  { %v954_v30 = vsel %vm953_vm8, %v950_v19, %v952_v29  ;;  %v955_v31 = vsel %vm953_vm8, %v952_v29, %v950_v19  ;;  %v1041_v19 = vsel %vm614_vm0, %v1038_v6, 0  ;;  %v1157_v29 = vrot.slane %v2035_v50, 2 }
 0x1f7   :  { %v958_v38 = vmul.f32 %v956_v13, %v954_v30  ;;  %v959_v39 = vmul.f32 %v957_v23, %v955_v31 }
 0x1f8   :  { %v1162_v49 = vsel %vm614_vm0, %v1157_v29, 0 }
 0x1f9   :  { %v960_v55 = vadd.f32 %v958_v38, %v941_v43  ;;  %v961_v57 = vadd.f32 %v959_v39, %v942_v44 }
 0x1fb   :  { %v965_v47 = vpop.permute.xlu0 %964 }
 0x1fc   :  { %v967_v53 = vsel %vm966_vm9, %v963_v42, %v965_v47  ;;  %v968_v54 = vsel %vm966_vm9, %v965_v47, %v963_v42 }
 0x1fd   :  { %v971_v59 = vmul.f32 %v2202_v40, %v967_v53  ;;  %v972_v60 = vmul.f32 %v2207_v41, %v968_v54  ;;  %v2215_v0 = vpop.permute.xlu1 %977 }
 0x1ff   :  { %v973_v2 = vadd.f32 %v971_v59, %v960_v55  ;;  %v974_v3 = vadd.f32 %v972_v60, %v961_v57 }
 0x201   :  { %v980_v4 = vadd.f32 %v2215_v0, %v973_v2  ;;  %v981_v5 = vadd.f32 %v2215_v0, %v974_v3 }
 0x203   :  { %v982_v14 = vmax.f32 %v980_v4, 0.0  ;;  %v983_v16 = vmax.f32 %v981_v5, 0.0 }
 0x205   :  { %v984_v17 = vpack.c.bf16 %v982_v14, %v982_v14  ;;  %v985_v18 = vpack.c.bf16 %v983_v16, %v983_v16 }
 0x207   :  { %v995_v21 = vsel %vm614_vm0, %v984_v17, 0  ;;  %v998_v10 = vsel %vm614_vm0, %v985_v18, 0 }
 0x208   :  { %1007 = vmatpush.bf16.msrb.mxu2 %v995_v21  ;;  %1020 = vmatpush.bf16.msrb.mxu3 %v998_v10 }
 0x20b   :  { %1696 = vmatmul.msk.bf16.vlgmr.msrb.gmra.mxu2 %vm604_vm1, %v2230_v52  ;;  %1697 = vmatmul.msk.bf16.vlgmr.msrb.gmra.mxu3 %vm604_vm1, %v2230_v52 }
 0x20c   :  { %1053 = vmatpush.bf16.msra.mxu2 %v1041_v19  ;;  %1076 = vmatpush.bf16.msra.mxu3 %v1044_v20 }
 0x210   :  { %1171 = vmatpush.bf16.msrb.mxu2 %v1159_v56  ;;  %1194 = vmatpush.bf16.msrb.mxu3 %v1162_v49 }
 0x21b   :  { %1698 = vmatmul.msk.bf16.vlgmr.msra.gmra.mxu2 %vm604_vm1, %v1994_v11  ;;  %1701 = vmatmul.msk.bf16.vlgmr.msra.gmra.mxu3 %vm604_vm1, %v1994_v11  ;;  %v1109_v11 = vpop.f32.mrf.mxu0 }
 0x22b   :  { %1699 = vmatmul.msk.bf16.gmra.mxu2 %vm604_vm1, %v2003_v12  ;;  %1702 = vmatmul.msk.bf16.gmra.mxu3 %vm604_vm1, %v2003_v12  ;;  %v1132_v12 = vpop.f32.mrf.mxu1 }
 0x233   :  { %v1134_v50 = vpop.f32.mrf.mxu1 }
 0x23b   :  { %1700 = vmatmul.msk.bf16.gmra.mxu2 %vm604_vm1, %v2012_v15  ;;  %1703 = vmatmul.msk.bf16.gmra.mxu3 %vm604_vm1, %v2012_v15  ;;  %v1111_v15 = vpop.f32.mrf.mxu0  ;;  %v1137_v32 = vpop.f32.mrf.mxu1 }
 0x24b   :  { %1710 = vmatmul.msk.bf16.vlgmr.msrb.gmra.mxu2 %vm604_vm1, %v2044_v58  ;;  %1713 = vmatmul.msk.bf16.vlgmr.msrb.gmra.mxu3 %vm604_vm1, %v2044_v58  ;;  %v1114_v58 = vpop.f32.mrf.mxu0 }
 0x253   :  { %v1116_v35 = vpop.f32.mrf.mxu0 }
 0x25b   :  { %1711 = vmatmul.msk.bf16.gmra.mxu2 %vm604_vm1, %v2057_v62  ;;  %1714 = vmatmul.msk.bf16.gmra.mxu3 %vm604_vm1, %v2057_v62  ;;  %v1139_v62 = vpop.f32.mrf.mxu1  ;;  %v1119_v42 = vpop.f32.mrf.mxu0 }
 0x263   :  { %v2266_v43 = vpop.f32.mrf.mxu1  ;;  %v1121_v47 = vpop.f32.mrf.mxu0 }
 0x26b   :  { %1712 = vmatmul.msk.bf16.gmra.mxu2 %vm604_vm1, %v2066_v1  ;;  %1715 = vmatmul.msk.bf16.gmra.mxu3 %vm604_vm1, %v2066_v1  ;;  %v1144_v53 = vpop.f32.mrf.mxu1 }
 0x28e   :  { %v2262_v30 = vpop.f32.mrf.mxu2  ;;  %v2264_v31 = vpop.f32.mrf.mxu3 }
 0x296   :  { %v1011_v33 = vpop.f32.mrf.mxu2  ;;  %v1024_v34 = vpop.f32.mrf.mxu3 }
 0x29e   :  { %v1055_v38 = vpop.f32.mrf.mxu2  ;;  %v1078_v39 = vpop.f32.mrf.mxu3 }
 0x29f   :  { %v1146_v5 = vsub.f32 %v1055_v38, %v1109_v11  ;;  %v1147_v6 = vsub.f32 %v1078_v39, %v1132_v12 }
 0x2a6   :  { %v1057_v1 = vpop.f32.mrf.mxu2  ;;  %v1080_v44 = vpop.f32.mrf.mxu3 }
 0x2a7   :  { %v1148_v19 = vsub.f32 %v1057_v1, %v1111_v15  ;;  %v1149_v10 = vsub.f32 %v1080_v44, %v1134_v50 }
 0x2ae   :  { %v1060_v54 = vpop.f32.mrf.mxu2  ;;  %v1083_v55 = vpop.f32.mrf.mxu3 }
 0x2af   :  { %v1150_v49 = vsub.f32 %v1060_v54, %v1114_v58  ;;  %v1151_v39 = vsub.f32 %v1083_v55, %v1137_v32 }
 0x2b6   :  { %v1062_v57 = vpop.f32.mrf.mxu2  ;;  %v1085_v59 = vpop.f32.mrf.mxu3 }
 0x2b7   :  { %v1152_v1 = vsub.f32 %v1062_v57, %v1116_v35  ;;  %v1153_v53 = vsub.f32 %v1085_v59, %v1139_v62  ;;  %v590_v57 = vld [vmem:[%s2378_s9] sm:$0xf] }
 0x2be   :  { %v1065_v60 = vpop.f32.mrf.mxu2  ;;  %v1088_v2 = vpop.f32.mrf.mxu3 }
 0x2bf   :  { %v1155_v35 = vsub.f32 %v1088_v2, %v2266_v43 }
 0x2c6   :  { %v1067_v3 = vpop.f32.mrf.mxu2  ;;  %v1090_v4 = vpop.f32.mrf.mxu3 }
 0x2c7   :  { %v1154_v4 = vsub.f32 %v1065_v60, %v1119_v42 }
 0x2ce   :  { %v1173_v7 = vpop.f32.mrf.mxu2  ;;  %v1196_v14 = vpop.f32.mrf.mxu3 }
 0x2cf   :  { %v1210_v16 = vsub.f32 %v1146_v5, %v1173_v7  ;;  %v1211_v17 = vsub.f32 %v1147_v6, %v1196_v14 }
 0x2d1   :  { %v1232_v18 = vrot.slane %v1210_v16, 4  ;;  %1222 = vrot.lane.b32.xlu0 %v1211_v17, %s1898_s5  ;;  %1220 = vrot.lane.b32.xlu2 %v1210_v16, %s1898_s5  ;;  %v1233_v22 = vrot.slane %v1211_v17, 4  ;;  %s1387_s5 = sshll.u32 %s2379_s10, 4  ;;  %s1388_s5 = int_to_ptr.hbm [resolvable:$true] %s1387_s5 }
 0x2d3   :  { %1236 = vrot.lane.b32.xlu1 %v1232_v18, %s1899_s23 }
 0x2d6   :  { %v1175_v20 = vpop.f32.mrf.mxu2  ;;  %v1198_v21 = vpop.f32.mrf.mxu3 }
 0x2d7   :  { %v1212_v29 = vsub.f32 %v1148_v19, %v1175_v20  ;;  %v1213_v56 = vsub.f32 %v1149_v10, %v1198_v21 }
 0x2d9   :  { %1238 = vrot.lane.b32.xlu2 %v1233_v22, %s1899_s23  ;;  %1246 = vrot.lane.b32.xlu0 %v1212_v29, %s1900_s24  ;;  %v1258_v33 = vrot.slane %v1212_v29, 4  ;;  %v1259_v34 = vrot.slane %v1213_v56, 4 }
 0x2db   :  { %1248 = vrot.lane.b32.xlu1 %v1213_v56, %s1900_s24 }
 0x2de   :  { %v1178_v11 = vpop.f32.mrf.mxu2  ;;  %v1201_v12 = vpop.f32.mrf.mxu3 }
 0x2df   :  { %v1214_v38 = vsub.f32 %v1150_v49, %v1178_v11  ;;  %v1215_v50 = vsub.f32 %v1151_v39, %v1201_v12 }
 0x2e1   :  { %v1274_v15 = vrot.slane %v1214_v38, 4  ;;  %1264 = vrot.lane.b32.xlu0 %v1259_v34, %s1902_s1  ;;  %1262 = vrot.lane.b32.xlu2 %v1258_v33, %s1902_s1  ;;  %v1275_v3 = vrot.slane %v1215_v50, 4 }
 0x2e3   :  { %1278 = vrot.lane.b32.xlu1 %v1274_v15, %s1903_s2 }
 0x2e6   :  { %v1180_v44 = vpop.f32.mrf.mxu2  ;;  %v1203_v47 = vpop.f32.mrf.mxu3 }
 0x2e7   :  { %v1216_v58 = vsub.f32 %v1152_v1, %v1180_v44  ;;  %v1217_v54 = vsub.f32 %v1153_v53, %v1203_v47 }
 0x2e9   :  { %1280 = vrot.lane.b32.xlu2 %v1275_v3, %s1903_s2  ;;  %1288 = vrot.lane.b32.xlu0 %v1216_v58, %s1904_s25  ;;  %v1300_v5 = vrot.slane %v1216_v58, 4  ;;  %v1301_v6 = vrot.slane %v1217_v54, 4 }
 0x2eb   :  { %1290 = vrot.lane.b32.xlu1 %v1217_v54, %s1904_s25 }
 0x2ee   :  { %v1183_v32 = vpop.f32.mrf.mxu2  ;;  %v1206_v55 = vpop.f32.mrf.mxu3 }
 0x2ef   :  { %v1218_v7 = vsub.f32 %v1154_v4, %v1183_v32  ;;  %v1219_v14 = vsub.f32 %v1155_v35, %v1206_v55 }
 0x2f1   :  { %1306 = vrot.lane.b32.xlu0 %v1301_v6, %s1905_s26  ;;  %1304 = vrot.lane.b32.xlu2 %v1300_v5, %s1905_s26 }
 0x2f3   :  { %1314 = vrot.lane.b32.xlu1 %v1218_v7, %s1906_s29 }
 0x2f6   :  { %v1185_v62 = vpop.f32.mrf.mxu2  ;;  %v1208_v59 = vpop.f32.mrf.mxu3 }
 0x2f9   :  { %988 = vperm.xlu0 %1803, %v590_v57   ;;  %1316 = vrot.lane.b32.xlu2 %v1219_v14, %s1906_s29 }
 0x32b   :  { %v1221_v42 = vpop.permute.xlu2 %1220 }
 0x333   :  { %v1239_v60 = vpop.permute.xlu2 %1238 }
 0x33b   :  { %v1263_v18 = vpop.permute.xlu2 %1262 }
 0x343   :  { %v1223_v16 = vpop.permute.xlu0 %1222  ;;  %v1281_v21 = vpop.permute.xlu2 %1280 }
 0x344   :  { %v1224_v43 = vsel %vm851_vm2, %v1221_v42, %v1223_v16  ;;  %v1225_v2 = vsel %vm851_vm2, %v1223_v16, %v1221_v42 }
 0x345   :  { %v1237_v17 = vpop.permute.xlu1 %1236  ;;  %v1226_v10 = vmul.f32 %v1225_v2, %v854_v27  ;;  %v1227_v22 = vmul.f32 %v1224_v43, %v855_v28 }
 0x346   :  { %v1240_v56 = vsel %vm870_vm3, %v1237_v17, %v1239_v60  ;;  %v1241_v49 = vsel %vm870_vm3, %v1239_v60, %v1237_v17 }
 0x347   :  { %v1228_v34 = vadd.f32 %v1226_v10, %v1214_v38  ;;  %v1229_v39 = vadd.f32 %v1227_v22, %v1215_v50  ;;  %v1242_v27 = vmul.f32 %v1241_v49, %v873_v36  ;;  %v1243_v28 = vmul.f32 %v1240_v56, %v874_v37 }
 0x349   :  { %v1244_v38 = vadd.f32 %v1242_v27, %v1228_v34  ;;  %v1245_v50 = vadd.f32 %v1243_v28, %v1229_v39  ;;  %v1814_v27 = vld [vmem:[%s2369_s0] sm:$0xff] }
 0x34b   :  { %v1247_v19 = vpop.permute.xlu0 %1246  ;;  %v1305_v53 = vpop.permute.xlu2 %1304 }
 0x34d   :  { %v1249_v20 = vpop.permute.xlu1 %1248 }
 0x34e   :  { %v1250_v12 = vsel %vm883_vm4, %v1247_v19, %v1249_v20  ;;  %v1251_v33 = vsel %vm883_vm4, %v1249_v20, %v1247_v19 }
 0x34f   :  { %v1252_v44 = vmul.f32 %v1251_v33, %v886_v45  ;;  %v1253_v47 = vmul.f32 %v1250_v12, %v887_v46 }
 0x351   :  { %v1254_v45 = vadd.f32 %v1252_v44, %v1244_v38  ;;  %v1255_v32 = vadd.f32 %v1253_v47, %v1245_v50 }
 0x353   :  { %v1265_v29 = vpop.permute.xlu0 %1264  ;;  %v1317_v60 = vpop.permute.xlu2 %1316 }
 0x354   :  { %v1266_v15 = vsel %vm902_vm5, %v1263_v18, %v1265_v29  ;;  %v1267_v1 = vsel %vm902_vm5, %v1265_v29, %v1263_v18 }
 0x355   :  { %v1279_v11 = vpop.permute.xlu1 %1278  ;;  %v1268_v36 = vmul.f32 %v1267_v1, %v905_v48  ;;  %v1269_v37 = vmul.f32 %v1266_v15, %v906_v51  ;;  %v1815_v15 = vld [vmem:[%s2369_s0 + $0x8] sm:$0xff]  ;;  %s1907_s0 = smov [#allocation7]  }
 0x356   :  { %v1282_v58 = vsel %vm921_vm6, %v1279_v11, %v1281_v21  ;;  %v1283_v54 = vsel %vm921_vm6, %v1281_v21, %v1279_v11  ;;  %s1385_s20 = sshll.u32 %s1907_s0, 4  ;;  %s1386_s20 = int_to_ptr.vmem [resolvable:$true] %s1385_s20 }
 0x357   :  { %v1270_v48 = vadd.f32 %v1268_v36, %v1254_v45  ;;  %v1271_v5 = vadd.f32 %v1269_v37, %v1255_v32  ;;  %v1284_v51 = vmul.f32 %v1282_v58, %v924_v61  ;;  %v1285_v6 = vmul.f32 %v1283_v54, %v925_v63 }
 0x359   :  { %v1286_v62 = vadd.f32 %v1284_v51, %v1270_v48  ;;  %v1287_v57 = vadd.f32 %v1285_v6, %v1271_v5 }
 0x35b   :  { %v1289_v3 = vpop.permute.xlu0 %1288 }
 0x35d   :  { %v1291_v55 = vpop.permute.xlu1 %1290 }
 0x35e   :  { %v1292_v46 = vsel %vm934_vm7, %v1289_v3, %v1291_v55  ;;  %v1293_v4 = vsel %vm934_vm7, %v1291_v55, %v1289_v3 }
 0x35f   :  { %v1294_v7 = vmul.f32 %v1292_v46, %v937_v8  ;;  %v1295_v35 = vmul.f32 %v1293_v4, %v938_v9 }
 0x361   :  { %v1296_v61 = vadd.f32 %v1294_v7, %v1286_v62  ;;  %v1297_v16 = vadd.f32 %v1295_v35, %v1287_v57 }
 0x363   :  { %v1307_v59 = vpop.permute.xlu0 %1306 }
 0x364   :  { %v1308_v14 = vsel %vm953_vm8, %v1305_v53, %v1307_v59  ;;  %v1309_v42 = vsel %vm953_vm8, %v1307_v59, %v1305_v53 }
 0x365   :  { %v1310_v63 = vmul.f32 %v1308_v14, %v956_v13  ;;  %v1311_v8 = vmul.f32 %v1309_v42, %v957_v23  ;;  %v1315_v17 = vpop.permute.xlu1 %1314 }
 0x366   :  { %v1318_v9 = vsel %vm966_vm9, %v1315_v17, %v1317_v60  ;;  %v1319_v18 = vsel %vm966_vm9, %v1317_v60, %v1315_v17 }
 0x367   :  { %v1312_v19 = vadd.f32 %v1310_v63, %v1296_v61  ;;  %v1313_v20 = vadd.f32 %v1311_v8, %v1297_v16  ;;  %v1320_v43 = vmul.f32 %v2202_v40, %v1318_v9  ;;  %v1321_v2 = vmul.f32 %v2207_v41, %v1319_v18 }
 0x369   :  { %v1322_v21 = vadd.f32 %v1320_v43, %v1312_v19  ;;  %v1323_v10 = vadd.f32 %v1321_v2, %v1313_v20 }
 0x36b   :  { %v989_v25 = vpop.permute.xlu0 %988  ;;  %v1324_v13 = vadd.f32 %v1322_v21, %v2215_v0  ;;  %v1325_v26 = vadd.f32 %v1323_v10, %v2215_v0 }
 0x36c   :  { %v1010_v23 = vadd.f32 %v2262_v30, %v989_v25  ;;  %v1023_v22 = vadd.f32 %v2264_v31, %v989_v25 }
 0x36d   :  { %v1326_v29 = vmax.f32 %v1324_v13, 0.0  ;;  %v1327_v24 = vmax.f32 %v1325_v26, 0.0 }
 0x36e   :  { %v1026_v56 = vmul.f32 0.5, %v1010_v23  ;;  %v1027_v49 = vmul.f32 0.5, %v1023_v22 }
 0x36f   :  { %v1328_v11 = vpack.c.bf16 %v1326_v29, %v1326_v29  ;;  %v1329_v12 = vpack.c.bf16 %v1327_v24, %v1327_v24 }
 0x370   :  { %1806 = vtanh.f32 %v1026_v56 }
 0x371   :  { %1808 = vtanh.f32 %v1027_v49  ;;  %v1331_v40 = vsel %vm614_vm0, %v1328_v11, 0  ;;  %v1334_v41 = vsel %vm614_vm0, %v1329_v12, 0 }
 0x372   :  { %1343 = vmatpush.bf16.msrb.mxu0 %v1331_v40  ;;  %1356 = vmatpush.bf16.msrb.mxu1 %v1334_v41 }
 0x375   :  { %1716 = vmatmul.msk.bf16.vlgmr.msrb.gmra.mxu0 %vm604_vm1, %v2230_v52  ;;  %1717 = vmatmul.msk.bf16.vlgmr.msrb.gmra.mxu1 %vm604_vm1, %v2230_v52 }
 0x376   :  { %v1807_v0 = vpop.eup %1806 }
 0x377   :  { %v1809_v30 = vpop.eup %1808  ;;  %v1030_v31 = vadd.f32 1.0, %v1807_v0 }
 0x378   :  { %v1031_v33 = vadd.f32 1.0, %v1809_v30 }
 0x379   :  { %v1032_v34 = vmul.f32 0.5, %v1030_v31 }
 0x37a   :  { %v1033_v39 = vmul.f32 0.5, %v1031_v33 }
 0x37b   :  { %v1034_v28 = vmul.f32 %v1814_v27, %v1032_v34 }
 0x37c   :  { %v1035_v1 = vmul.f32 %v1815_v15, %v1033_v39 }
 0x37d   :  { %1036 = vst [vmem:[#allocation7] sm:$0xf] %v1034_v28 }
 0x37e   :  { %1037 = vst [vmem:[#allocation7 + $0x8] sm:$0xf] %v1035_v1 }
 0x3f2   :  { %v1345_v44 = vpop.f32.mrf.mxu0  ;;  %v1358_v52 = vpop.f32.mrf.mxu1 }
 0x3f3   :  { %v1346_v47 = vadd.f32 %v1345_v44, %v989_v25  ;;  %v1359_v38 = vadd.f32 %v1358_v52, %v989_v25 }
 0x3f5   :  { %v1362_v50 = vmul.f32 0.5, %v1346_v47  ;;  %v1363_v53 = vmul.f32 0.5, %v1359_v38 }
 0x3f7   :  { %1810 = vtanh.f32 %v1362_v50 }
 0x3f8   :  { %1812 = vtanh.f32 %v1363_v53 }
 0x3fa   :  { %v1347_v36 = vpop.f32.mrf.mxu0  ;;  %v1360_v37 = vpop.f32.mrf.mxu1 }
 0x3fd   :  { %v1811_v3 = vpop.eup %1810 }
 0x3fe   :  { %v1813_v58 = vpop.eup %1812  ;;  %v1366_v54 = vadd.f32 1.0, %v1811_v3 }
 0x3ff   :  { %v1367_v45 = vadd.f32 1.0, %v1813_v58 }
 0x400   :  { %v1368_v32 = vmul.f32 0.5, %v1366_v54 }
 0x401   :  { %v1369_v55 = vmul.f32 0.5, %v1367_v45 }
 0x402   :  { %v1372_v46 = vrot.slane %v1368_v32, 4 }
 0x403   :  { %v1373_v4 = vrot.slane %v1369_v55, 4 }
 0x404   :  { %v1376_v48 = vmul.f32 %v1814_v27, %v1372_v46 }
 0x405   :  { %v1377_v5 = vmul.f32 %v1815_v15, %v1373_v4 }
 0x406   :  { %1378 = vst [vmem:[#allocation7] sm:$0xf0] %v1376_v48 }
 0x407   :  { %1379 = vst [vmem:[#allocation7 + $0x8] sm:$0xf0] %v1377_v5 }
 0x408   :  { %1390 = dma.vmem_to_hbm [thread:$0]  %s1386_s20, 256, %s1388_s5, [#allocation4]  }
 0x409   :  { %1892 = dma.done.wait [#allocation4], 256  }
 0x40a   :  { %1893 = vsyncadd [#allocation4], 4294967040 }
 0x40b   :  { %1395 = vsyncpa [#allocation3], 1 }
 0x40c   :  { %1396 = vsyncpa [#allocation6], 1 }
 0x40d   :  { %1397 = vsyncpa [#allocation4], 1 }

</bundles_post_ra>
